<compile_context>
chip_gen: v6e
topology: v6e:2x2x1
jax: 0.10.0
libtpu: 0.0.40
codegen_flags: <defaults>
</compile_context>

<pallas_src>
import math

import jax
import jax.numpy as jnp
import numpy as np
from jax.experimental import pallas as pl
from jax.experimental.pallas import tpu as pltpu


def _round_up(x, m):
    return ((x + m - 1) // m) * m


def _batch_block(n):
    """Largest batch chunk (<=8) dividing n that still leaves >=2 grid steps,
    so the "parallel" grid axis can be sharded across both v7x TensorCores."""
    for nb in (8, 4, 2, 1):
        if n % nb == 0 and n // nb >= 2:
            return nb
    return 1


# ------------------------------ conv kernel ---------------------------------

def conv2d_relu_pallas(x_flat, w_taps, bias, *, C, H, W, OC, KH=5, KW=5, nb=1):
    """relu(valid-conv(x) + b) with the im2col built in-kernel.

    x_flat : (N, C, H*W + KW-1) bf16 -- rows flattened, KW-1 zero tail lanes so
             every tap's shifted window is an in-bounds lane slice.
    w_taps : (KH*KW, OC, C) bf16 -- w_taps[i*KW+j] is the (OC, C) tap matrix.
    bias   : (OC, 1) float32.
    Returns (N, OC, OH, W) float32; only [..., :OW] are valid conv outputs
    (columns OW..W-1 are the usual full-width-trick wrap garbage, sliced off
    by the caller before pooling).
    """
    N = x_flat.shape[0]
    OH = H - KH + 1
    ohw = OH * W
    offs = [i * W + j for i in range(KH) for j in range(KW)]

    def kernel(x_ref, w_ref, b_ref, o_ref):
        wv = w_ref[...]                      # (KH*KW, OC, C) bf16, resident
        bv = b_ref[...]                      # (OC, 1) f32, resident
        for s in range(nb):                  # static unroll over batch chunk
            xv = x_ref[s]                    # (C, H*W + KW-1) bf16
            acc = jnp.zeros((OC, ohw), jnp.float32)
            for t, off in enumerate(offs):   # 25-tap accumulation on the MXU
                acc = acc + jnp.dot(wv[t], xv[:, off:off + ohw],
                                    preferred_element_type=jnp.float32)
            o_ref[s] = jnp.maximum(acc + bv, 0.0).astype(o_ref.dtype)

    out = pl.pallas_call(
        kernel,
        out_shape=jax.ShapeDtypeStruct((N, OC, ohw), jnp.float32),
        grid=(N // nb,),
        in_specs=[
            pl.BlockSpec((nb, C, H * W + KW - 1), lambda n: (n, 0, 0)),
            pl.BlockSpec((KH * KW, OC, C), lambda n: (0, 0, 0)),   # resident
            pl.BlockSpec((OC, 1), lambda n: (0, 0)),               # resident
        ],
        out_specs=pl.BlockSpec((nb, OC, ohw), lambda n: (n, 0, 0)),
        compiler_params=pltpu.CompilerParams(
            dimension_semantics=("parallel",)),
    )(x_flat, w_taps, bias)
    return out.reshape(N, OC, OH, W)


# ------------------------------- MLP kernel ---------------------------------

def _mlp_kernel(x_ref, w1_ref, b1_ref, w2_ref, b2_ref, w3_ref, b3_ref, o_ref):
    # Fused fc1 -> relu -> fc2 -> relu -> fc3; hidden dims padded to 128 lanes
    # so every intermediate is a full-lane f32 slab kept on-chip.
    h = jnp.dot(x_ref[...], w1_ref[...], preferred_element_type=jnp.float32)
    h = jnp.maximum(h + b1_ref[...], 0.0)
    h = jnp.dot(h, w2_ref[...], preferred_element_type=jnp.float32)
    h = jnp.maximum(h + b2_ref[...], 0.0)
    o = jnp.dot(h, w3_ref[...], preferred_element_type=jnp.float32) + b3_ref[...]
    o_ref[...] = o.astype(o_ref.dtype)


def mlp_fused(x, w1, b1, w2, b2, w3, b3, n_out):
    """Fused 3-layer MLP. x:(M,K); weights pre-transposed to (K,N), N padded to 128."""
    M, K = x.shape
    Hd = w1.shape[1]                       # padded lane width (128)
    # Row tile: per-step VMEM is tiny on every generation, so size by step
    # overhead; split into >=2 steps once M>=16 so v7x can use both cores.
    if M < 16:
        tm = _round_up(M, 8)
    else:
        tm = min(512, _round_up((M + 1) // 2, 8))
    mp = _round_up(M, tm)
    if mp != M:
        x = jnp.pad(x, ((0, mp - M), (0, 0)))

    # The six weight/bias blocks are constant-index (loaded once, resident).
    # TODO(synk): pipeline_mode=pl.Buffered(1) on them would drop the unused
    # second buffer; left off since the total footprint is already tiny.
    out = pl.pallas_call(
        _mlp_kernel,
        out_shape=jax.ShapeDtypeStruct((mp, Hd), jnp.float32),
        grid=(mp // tm,),
        in_specs=[
            pl.BlockSpec((tm, K), lambda m: (m, 0)),
            pl.BlockSpec((K, Hd), lambda m: (0, 0)),
            pl.BlockSpec((1, Hd), lambda m: (0, 0)),
            pl.BlockSpec((Hd, Hd), lambda m: (0, 0)),
            pl.BlockSpec((1, Hd), lambda m: (0, 0)),
            pl.BlockSpec((Hd, Hd), lambda m: (0, 0)),
            pl.BlockSpec((1, Hd), lambda m: (0, 0)),
        ],
        out_specs=pl.BlockSpec((tm, Hd), lambda m: (m, 0)),
        compiler_params=pltpu.CompilerParams(
            dimension_semantics=("parallel",)),
    )(x, w1, b1, w2, b2, w3, b3)
    return out[:M, :n_out]


# ------------------------------- parameters ---------------------------------

def init_params(key):
    """Deterministic PyTorch-default-style init: U(-1/sqrt(fan_in), 1/sqrt(fan_in))."""
    ks = jax.random.split(key, 10)

    def u(k, shape, fan_in):
        bnd = 1.0 / math.sqrt(fan_in)
        return jax.random.uniform(k, shape, jnp.float32, -bnd, bnd)

    return {
        "conv1_w": u(ks[0], (6, 3, 5, 5), 3 * 25),
        "conv1_b": u(ks[1], (6,), 3 * 25),
        "conv2_w": u(ks[2], (16, 6, 5, 5), 6 * 25),
        "conv2_b": u(ks[3], (16,), 6 * 25),
        "fc1_w": u(ks[4], (120, 400), 400),
        "fc1_b": u(ks[5], (120,), 400),
        "fc2_w": u(ks[6], (84, 120), 120),
        "fc2_b": u(ks[7], (84,), 120),
        "fc3_w": u(ks[8], (10, 84), 84),
        "fc3_b": u(ks[9], (10,), 84),
    }


def prepare_params(p):
    """One-time re-layout of torch-style params into kernel-friendly shapes.

    Conv weights -> bf16 (KH*KW, OC, C) tap matrices with channels padded to 8;
    fc weights -> transposed (K, N) with N zero-padded to 128 lanes (padded
    rows of the next layer are zero too, so the padding is numerically inert)."""
    CP = 8     # conv channel padding (conv1 in 3->8, conv1 out / conv2 in 6->8)
    Hd = 128   # MLP hidden widths zero-padded to one full lane tile

    def conv_w(w, oc_pad, ic_pad):
        oc, ic, kh, kw = w.shape
        w = jnp.pad(w, ((0, oc_pad - oc), (0, ic_pad - ic), (0, 0), (0, 0)))
        # -> (KH*KW, OC, C): one (OC, C) tap matrix per shifted input slice.
        return jnp.transpose(w, (2, 3, 0, 1)).reshape(
            kh * kw, oc_pad, ic_pad).astype(jnp.bfloat16)

    def pad_to(a, rows, cols):
        return jnp.pad(a, ((0, rows - a.shape[0]), (0, cols - a.shape[1])))

    return {
        "c1_w": conv_w(p["conv1_w"], CP, CP),
        "c1_b": pad_to(p["conv1_b"].reshape(-1, 1), CP, 1),
        "c2_w": conv_w(p["conv2_w"], 16, CP),
        "c2_b": p["conv2_b"].reshape(16, 1),
        "f1_w": pad_to(p["fc1_w"].T, 400, Hd),
        "f1_b": pad_to(p["fc1_b"].reshape(1, -1), 1, Hd),
        "f2_w": pad_to(p["fc2_w"].T, Hd, Hd),
        "f2_b": pad_to(p["fc2_b"].reshape(1, -1), 1, Hd),
        "f3_w": pad_to(p["fc3_w"].T, Hd, Hd),
        "f3_b": pad_to(p["fc3_b"].reshape(1, -1), 1, Hd),
    }


# ------------------------------- the model ----------------------------------

def _flatten_rows(x_nchw, kw=5):
    """(N,C,H,W) -> bf16 (N, C, H*W + kw-1): flatten rows and add kw-1 zero
    tail lanes so every conv tap's shifted window is an in-bounds slice."""
    n, c, h, w = x_nchw.shape
    x = x_nchw.reshape(n, c, h * w)
    return jnp.pad(x, ((0, 0), (0, 0), (0, kw - 1))).astype(jnp.bfloat16)


def maxpool2x2(y):
    """2x2/2 max pool on NCHW -- pure-XLA reshape+max."""
    n, c, h, w = y.shape
    return y.reshape(n, c, h // 2, 2, w // 2, 2).max(axis=(3, 5))


@jax.jit
def net_forward(pp, x):
    # x: (N, 3, 32, 32) float32, NCHW (PyTorch convention).
    n = x.shape[0]
    nb = _batch_block(n)

    # conv1 (3->6 channels, both zero-padded to 8) + relu, then 2x2 pool.
    x8 = jnp.pad(x, ((0, 0), (0, 5), (0, 0), (0, 0)))            # (N, 8, 32, 32)
    y = conv2d_relu_pallas(_flatten_rows(x8), pp["c1_w"], pp["c1_b"],
                           C=8, H=32, W=32, OC=8, nb=nb)         # (N, 8, 28, 32)
    y = maxpool2x2(y[..., :28])                                  # (N, 8, 14, 14)

    # conv2 (8->16 channels) + relu, then 2x2 pool.
    y = conv2d_relu_pallas(_flatten_rows(y), pp["c2_w"], pp["c2_b"],
                           C=8, H=14, W=14, OC=16, nb=nb)        # (N, 16, 10, 14)
    y = maxpool2x2(y[..., :10])                                  # (N, 16, 5, 5)

    flat = y.reshape(n, 16 * 5 * 5)                              # torch .view order
    return mlp_fused(flat, pp["f1_w"], pp["f1_b"], pp["f2_w"],
                     pp["f2_b"], pp["f3_w"], pp["f3_b"], n_out=10)


def reference_forward(params, x):
    """Pure-JAX reference for validation (torch-layout params)."""
    def conv(x, w, b):
        y = jax.lax.conv_general_dilated(
            x, w, window_strides=(1, 1), padding="VALID",
            dimension_numbers=("NCHW", "OIHW", "NCHW"),
            precision=jax.lax.Precision.HIGHEST)
        return jax.nn.relu(y + b[None, :, None, None])

    def pool(x):
        return jax.lax.reduce_window(x, -jnp.inf, jax.lax.max,
                                     (1, 1, 2, 2), (1, 1, 2, 2), "VALID")

    x = pool(conv(x, params["conv1_w"], params["conv1_b"]))
    x = pool(conv(x, params["conv2_w"], params["conv2_b"]))
    x = x.reshape(x.shape[0], -1)
    x = jax.nn.relu(x @ params["fc1_w"].T + params["fc1_b"])
    x = jax.nn.relu(x @ params["fc2_w"].T + params["fc2_b"])
    return x @ params["fc3_w"].T + params["fc3_b"]


# ---------------------------------- main -------------------------------------

if __name__ == "__main__":
    key = jax.random.PRNGKey(0)
    pkey, xkey = jax.random.split(key)
    params = init_params(pkey)
    pp = prepare_params(params)

    # 32x32 spatial is fixed by fc1 (16*5*5); keep batch small.
    x = jax.random.normal(xkey, (2, 3, 32, 32), dtype=jnp.float32)

    out = jax.block_until_ready(net_forward(pp, x))
    assert out.shape == (2, 10), out.shape

    ref = jax.block_until_ready(reference_forward(params, x))
    # bf16 conv inputs/weights (f32 accumulate) vs. a Precision.HIGHEST
    # reference: observed error is O(1e-3); 2e-2 gives comfortable margin.
    np.testing.assert_allclose(np.asarray(out), np.asarray(ref), rtol=2e-2, atol=2e-2)

    print("KERNEL_OK")
</pallas_src>

<mosaic_0001>
module attributes {stable_mosaic.version = 11 : i64} {
  func.func @kernel(%arg0: i32, %arg1: memref<1x8x1028xbf16, #tpu.memory_space<vmem>>, %arg2: memref<25x8x8xbf16, #tpu.memory_space<vmem>>, %arg3: memref<8x1xf32, #tpu.memory_space<vmem>>, %arg4: memref<1x8x896xf32, #tpu.memory_space<vmem>>) attributes {dimension_semantics = [#tpu.dimension_semantics<parallel>], iteration_bounds = array<i64: 2>, scalar_prefetch = 0 : i64, scratch_operands = 0 : i64, tpu.core_type = #tpu.core_type<tc>, window_params = [{transform_indices = @transform_0, window_bounds = array<i64: 1, 8, 1028>}, {pipeline_mode = #tpu.pipeline_mode<synchronous>, transform_indices = @transform_1, window_bounds = array<i64: 25, 8, 8>}, {pipeline_mode = #tpu.pipeline_mode<synchronous>, transform_indices = @transform_2, window_bounds = array<i64: 8, 1>}, {transform_indices = @transform_3, window_bounds = array<i64: 1, 8, 896>}]} {
    %c0 = arith.constant 0 : index
    %c0_0 = arith.constant 0 : index
    %c0_1 = arith.constant 0 : index
    %0 = vector.load %arg2[%c0, %c0_0, %c0_1] : memref<25x8x8xbf16, #tpu.memory_space<vmem>>, vector<25x8x8xbf16>
    %c0_2 = arith.constant 0 : index
    %c0_3 = arith.constant 0 : index
    %1 = vector.load %arg3[%c0_2, %c0_3] : memref<8x1xf32, #tpu.memory_space<vmem>>, vector<8x1xf32>
    %c0_4 = arith.constant 0 : index
    %c0_5 = arith.constant 0 : index
    %c0_6 = arith.constant 0 : index
    %2 = vector.load %arg1[%c0_4, %c0_5, %c0_6] : memref<1x8x1028xbf16, #tpu.memory_space<vmem>>, vector<1x8x1028xbf16>
    %3 = vector.shape_cast %2 : vector<1x8x1028xbf16> to vector<8x1028xbf16>
    %cst = arith.constant 0.000000e+00 : f32
    %4 = vector.broadcast %cst : f32 to vector<8x896xf32>
    %5 = vector.extract_strided_slice %0 {offsets = [0, 0, 0], sizes = [1, 8, 8], strides = [1, 1, 1]} : vector<25x8x8xbf16> to vector<1x8x8xbf16>
    %6 = vector.shape_cast %5 : vector<1x8x8xbf16> to vector<8x8xbf16>
    %7 = vector.extract_strided_slice %3 {offsets = [0, 0], sizes = [8, 896], strides = [1, 1]} : vector<8x1028xbf16> to vector<8x896xbf16>
    %cst_7 = arith.constant dense<0.000000e+00> : vector<8x896xf32>
    %8 = tpu.matmul %6, %7, %cst_7 {dimension_numbers = #tpu.dot_dimension_numbers<[1], [0], [0], [1], [0, 0, 1, 1], [], []>} : vector<8x8xbf16>, vector<8x896xbf16>, vector<8x896xf32> -> vector<8x896xf32>
    %9 = arith.addf %4, %8 : vector<8x896xf32>
    %10 = vector.extract_strided_slice %0 {offsets = [1, 0, 0], sizes = [1, 8, 8], strides = [1, 1, 1]} : vector<25x8x8xbf16> to vector<1x8x8xbf16>
    %11 = vector.shape_cast %10 : vector<1x8x8xbf16> to vector<8x8xbf16>
    %12 = vector.extract_strided_slice %3 {offsets = [0, 1], sizes = [8, 896], strides = [1, 1]} : vector<8x1028xbf16> to vector<8x896xbf16>
    %cst_8 = arith.constant dense<0.000000e+00> : vector<8x896xf32>
    %13 = tpu.matmul %11, %12, %cst_8 {dimension_numbers = #tpu.dot_dimension_numbers<[1], [0], [0], [1], [0, 0, 1, 1], [], []>} : vector<8x8xbf16>, vector<8x896xbf16>, vector<8x896xf32> -> vector<8x896xf32>
    %14 = arith.addf %9, %13 : vector<8x896xf32>
    %15 = vector.extract_strided_slice %0 {offsets = [2, 0, 0], sizes = [1, 8, 8], strides = [1, 1, 1]} : vector<25x8x8xbf16> to vector<1x8x8xbf16>
    %16 = vector.shape_cast %15 : vector<1x8x8xbf16> to vector<8x8xbf16>
    %17 = vector.extract_strided_slice %3 {offsets = [0, 2], sizes = [8, 896], strides = [1, 1]} : vector<8x1028xbf16> to vector<8x896xbf16>
    %cst_9 = arith.constant dense<0.000000e+00> : vector<8x896xf32>
    %18 = tpu.matmul %16, %17, %cst_9 {dimension_numbers = #tpu.dot_dimension_numbers<[1], [0], [0], [1], [0, 0, 1, 1], [], []>} : vector<8x8xbf16>, vector<8x896xbf16>, vector<8x896xf32> -> vector<8x896xf32>
    %19 = arith.addf %14, %18 : vector<8x896xf32>
    %20 = vector.extract_strided_slice %0 {offsets = [3, 0, 0], sizes = [1, 8, 8], strides = [1, 1, 1]} : vector<25x8x8xbf16> to vector<1x8x8xbf16>
    %21 = vector.shape_cast %20 : vector<1x8x8xbf16> to vector<8x8xbf16>
    %22 = vector.extract_strided_slice %3 {offsets = [0, 3], sizes = [8, 896], strides = [1, 1]} : vector<8x1028xbf16> to vector<8x896xbf16>
    %cst_10 = arith.constant dense<0.000000e+00> : vector<8x896xf32>
    %23 = tpu.matmul %21, %22, %cst_10 {dimension_numbers = #tpu.dot_dimension_numbers<[1], [0], [0], [1], [0, 0, 1, 1], [], []>} : vector<8x8xbf16>, vector<8x896xbf16>, vector<8x896xf32> -> vector<8x896xf32>
    %24 = arith.addf %19, %23 : vector<8x896xf32>
    %25 = vector.extract_strided_slice %0 {offsets = [4, 0, 0], sizes = [1, 8, 8], strides = [1, 1, 1]} : vector<25x8x8xbf16> to vector<1x8x8xbf16>
    %26 = vector.shape_cast %25 : vector<1x8x8xbf16> to vector<8x8xbf16>
    %27 = vector.extract_strided_slice %3 {offsets = [0, 4], sizes = [8, 896], strides = [1, 1]} : vector<8x1028xbf16> to vector<8x896xbf16>
    %cst_11 = arith.constant dense<0.000000e+00> : vector<8x896xf32>
    %28 = tpu.matmul %26, %27, %cst_11 {dimension_numbers = #tpu.dot_dimension_numbers<[1], [0], [0], [1], [0, 0, 1, 1], [], []>} : vector<8x8xbf16>, vector<8x896xbf16>, vector<8x896xf32> -> vector<8x896xf32>
    %29 = arith.addf %24, %28 : vector<8x896xf32>
    %30 = vector.extract_strided_slice %0 {offsets = [5, 0, 0], sizes = [1, 8, 8], strides = [1, 1, 1]} : vector<25x8x8xbf16> to vector<1x8x8xbf16>
    %31 = vector.shape_cast %30 : vector<1x8x8xbf16> to vector<8x8xbf16>
    %32 = vector.extract_strided_slice %3 {offsets = [0, 32], sizes = [8, 896], strides = [1, 1]} : vector<8x1028xbf16> to vector<8x896xbf16>
    %cst_12 = arith.constant dense<0.000000e+00> : vector<8x896xf32>
    %33 = tpu.matmul %31, %32, %cst_12 {dimension_numbers = #tpu.dot_dimension_numbers<[1], [0], [0], [1], [0, 0, 1, 1], [], []>} : vector<8x8xbf16>, vector<8x896xbf16>, vector<8x896xf32> -> vector<8x896xf32>
    %34 = arith.addf %29, %33 : vector<8x896xf32>
    %35 = vector.extract_strided_slice %0 {offsets = [6, 0, 0], sizes = [1, 8, 8], strides = [1, 1, 1]} : vector<25x8x8xbf16> to vector<1x8x8xbf16>
    %36 = vector.shape_cast %35 : vector<1x8x8xbf16> to vector<8x8xbf16>
    %37 = vector.extract_strided_slice %3 {offsets = [0, 33], sizes = [8, 896], strides = [1, 1]} : vector<8x1028xbf16> to vector<8x896xbf16>
    %cst_13 = arith.constant dense<0.000000e+00> : vector<8x896xf32>
    %38 = tpu.matmul %36, %37, %cst_13 {dimension_numbers = #tpu.dot_dimension_numbers<[1], [0], [0], [1], [0, 0, 1, 1], [], []>} : vector<8x8xbf16>, vector<8x896xbf16>, vector<8x896xf32> -> vector<8x896xf32>
    %39 = arith.addf %34, %38 : vector<8x896xf32>
    %40 = vector.extract_strided_slice %0 {offsets = [7, 0, 0], sizes = [1, 8, 8], strides = [1, 1, 1]} : vector<25x8x8xbf16> to vector<1x8x8xbf16>
    %41 = vector.shape_cast %40 : vector<1x8x8xbf16> to vector<8x8xbf16>
    %42 = vector.extract_strided_slice %3 {offsets = [0, 34], sizes = [8, 896], strides = [1, 1]} : vector<8x1028xbf16> to vector<8x896xbf16>
    %cst_14 = arith.constant dense<0.000000e+00> : vector<8x896xf32>
    %43 = tpu.matmul %41, %42, %cst_14 {dimension_numbers = #tpu.dot_dimension_numbers<[1], [0], [0], [1], [0, 0, 1, 1], [], []>} : vector<8x8xbf16>, vector<8x896xbf16>, vector<8x896xf32> -> vector<8x896xf32>
    %44 = arith.addf %39, %43 : vector<8x896xf32>
    %45 = vector.extract_strided_slice %0 {offsets = [8, 0, 0], sizes = [1, 8, 8], strides = [1, 1, 1]} : vector<25x8x8xbf16> to vector<1x8x8xbf16>
    %46 = vector.shape_cast %45 : vector<1x8x8xbf16> to vector<8x8xbf16>
    %47 = vector.extract_strided_slice %3 {offsets = [0, 35], sizes = [8, 896], strides = [1, 1]} : vector<8x1028xbf16> to vector<8x896xbf16>
    %cst_15 = arith.constant dense<0.000000e+00> : vector<8x896xf32>
    %48 = tpu.matmul %46, %47, %cst_15 {dimension_numbers = #tpu.dot_dimension_numbers<[1], [0], [0], [1], [0, 0, 1, 1], [], []>} : vector<8x8xbf16>, vector<8x896xbf16>, vector<8x896xf32> -> vector<8x896xf32>
    %49 = arith.addf %44, %48 : vector<8x896xf32>
    %50 = vector.extract_strided_slice %0 {offsets = [9, 0, 0], sizes = [1, 8, 8], strides = [1, 1, 1]} : vector<25x8x8xbf16> to vector<1x8x8xbf16>
    %51 = vector.shape_cast %50 : vector<1x8x8xbf16> to vector<8x8xbf16>
    %52 = vector.extract_strided_slice %3 {offsets = [0, 36], sizes = [8, 896], strides = [1, 1]} : vector<8x1028xbf16> to vector<8x896xbf16>
    %cst_16 = arith.constant dense<0.000000e+00> : vector<8x896xf32>
    %53 = tpu.matmul %51, %52, %cst_16 {dimension_numbers = #tpu.dot_dimension_numbers<[1], [0], [0], [1], [0, 0, 1, 1], [], []>} : vector<8x8xbf16>, vector<8x896xbf16>, vector<8x896xf32> -> vector<8x896xf32>
    %54 = arith.addf %49, %53 : vector<8x896xf32>
    %55 = vector.extract_strided_slice %0 {offsets = [10, 0, 0], sizes = [1, 8, 8], strides = [1, 1, 1]} : vector<25x8x8xbf16> to vector<1x8x8xbf16>
    %56 = vector.shape_cast %55 : vector<1x8x8xbf16> to vector<8x8xbf16>
    %57 = vector.extract_strided_slice %3 {offsets = [0, 64], sizes = [8, 896], strides = [1, 1]} : vector<8x1028xbf16> to vector<8x896xbf16>
    %cst_17 = arith.constant dense<0.000000e+00> : vector<8x896xf32>
    %58 = tpu.matmul %56, %57, %cst_17 {dimension_numbers = #tpu.dot_dimension_numbers<[1], [0], [0], [1], [0, 0, 1, 1], [], []>} : vector<8x8xbf16>, vector<8x896xbf16>, vector<8x896xf32> -> vector<8x896xf32>
    %59 = arith.addf %54, %58 : vector<8x896xf32>
    %60 = vector.extract_strided_slice %0 {offsets = [11, 0, 0], sizes = [1, 8, 8], strides = [1, 1, 1]} : vector<25x8x8xbf16> to vector<1x8x8xbf16>
    %61 = vector.shape_cast %60 : vector<1x8x8xbf16> to vector<8x8xbf16>
    %62 = vector.extract_strided_slice %3 {offsets = [0, 65], sizes = [8, 896], strides = [1, 1]} : vector<8x1028xbf16> to vector<8x896xbf16>
    %cst_18 = arith.constant dense<0.000000e+00> : vector<8x896xf32>
    %63 = tpu.matmul %61, %62, %cst_18 {dimension_numbers = #tpu.dot_dimension_numbers<[1], [0], [0], [1], [0, 0, 1, 1], [], []>} : vector<8x8xbf16>, vector<8x896xbf16>, vector<8x896xf32> -> vector<8x896xf32>
    %64 = arith.addf %59, %63 : vector<8x896xf32>
    %65 = vector.extract_strided_slice %0 {offsets = [12, 0, 0], sizes = [1, 8, 8], strides = [1, 1, 1]} : vector<25x8x8xbf16> to vector<1x8x8xbf16>
    %66 = vector.shape_cast %65 : vector<1x8x8xbf16> to vector<8x8xbf16>
    %67 = vector.extract_strided_slice %3 {offsets = [0, 66], sizes = [8, 896], strides = [1, 1]} : vector<8x1028xbf16> to vector<8x896xbf16>
    %cst_19 = arith.constant dense<0.000000e+00> : vector<8x896xf32>
    %68 = tpu.matmul %66, %67, %cst_19 {dimension_numbers = #tpu.dot_dimension_numbers<[1], [0], [0], [1], [0, 0, 1, 1], [], []>} : vector<8x8xbf16>, vector<8x896xbf16>, vector<8x896xf32> -> vector<8x896xf32>
    %69 = arith.addf %64, %68 : vector<8x896xf32>
    %70 = vector.extract_strided_slice %0 {offsets = [13, 0, 0], sizes = [1, 8, 8], strides = [1, 1, 1]} : vector<25x8x8xbf16> to vector<1x8x8xbf16>
    %71 = vector.shape_cast %70 : vector<1x8x8xbf16> to vector<8x8xbf16>
    %72 = vector.extract_strided_slice %3 {offsets = [0, 67], sizes = [8, 896], strides = [1, 1]} : vector<8x1028xbf16> to vector<8x896xbf16>
    %cst_20 = arith.constant dense<0.000000e+00> : vector<8x896xf32>
    %73 = tpu.matmul %71, %72, %cst_20 {dimension_numbers = #tpu.dot_dimension_numbers<[1], [0], [0], [1], [0, 0, 1, 1], [], []>} : vector<8x8xbf16>, vector<8x896xbf16>, vector<8x896xf32> -> vector<8x896xf32>
    %74 = arith.addf %69, %73 : vector<8x896xf32>
    %75 = vector.extract_strided_slice %0 {offsets = [14, 0, 0], sizes = [1, 8, 8], strides = [1, 1, 1]} : vector<25x8x8xbf16> to vector<1x8x8xbf16>
    %76 = vector.shape_cast %75 : vector<1x8x8xbf16> to vector<8x8xbf16>
    %77 = vector.extract_strided_slice %3 {offsets = [0, 68], sizes = [8, 896], strides = [1, 1]} : vector<8x1028xbf16> to vector<8x896xbf16>
    %cst_21 = arith.constant dense<0.000000e+00> : vector<8x896xf32>
    %78 = tpu.matmul %76, %77, %cst_21 {dimension_numbers = #tpu.dot_dimension_numbers<[1], [0], [0], [1], [0, 0, 1, 1], [], []>} : vector<8x8xbf16>, vector<8x896xbf16>, vector<8x896xf32> -> vector<8x896xf32>
    %79 = arith.addf %74, %78 : vector<8x896xf32>
    %80 = vector.extract_strided_slice %0 {offsets = [15, 0, 0], sizes = [1, 8, 8], strides = [1, 1, 1]} : vector<25x8x8xbf16> to vector<1x8x8xbf16>
    %81 = vector.shape_cast %80 : vector<1x8x8xbf16> to vector<8x8xbf16>
    %82 = vector.extract_strided_slice %3 {offsets = [0, 96], sizes = [8, 896], strides = [1, 1]} : vector<8x1028xbf16> to vector<8x896xbf16>
    %cst_22 = arith.constant dense<0.000000e+00> : vector<8x896xf32>
    %83 = tpu.matmul %81, %82, %cst_22 {dimension_numbers = #tpu.dot_dimension_numbers<[1], [0], [0], [1], [0, 0, 1, 1], [], []>} : vector<8x8xbf16>, vector<8x896xbf16>, vector<8x896xf32> -> vector<8x896xf32>
    %84 = arith.addf %79, %83 : vector<8x896xf32>
    %85 = vector.extract_strided_slice %0 {offsets = [16, 0, 0], sizes = [1, 8, 8], strides = [1, 1, 1]} : vector<25x8x8xbf16> to vector<1x8x8xbf16>
    %86 = vector.shape_cast %85 : vector<1x8x8xbf16> to vector<8x8xbf16>
    %87 = vector.extract_strided_slice %3 {offsets = [0, 97], sizes = [8, 896], strides = [1, 1]} : vector<8x1028xbf16> to vector<8x896xbf16>
    %cst_23 = arith.constant dense<0.000000e+00> : vector<8x896xf32>
    %88 = tpu.matmul %86, %87, %cst_23 {dimension_numbers = #tpu.dot_dimension_numbers<[1], [0], [0], [1], [0, 0, 1, 1], [], []>} : vector<8x8xbf16>, vector<8x896xbf16>, vector<8x896xf32> -> vector<8x896xf32>
    %89 = arith.addf %84, %88 : vector<8x896xf32>
    %90 = vector.extract_strided_slice %0 {offsets = [17, 0, 0], sizes = [1, 8, 8], strides = [1, 1, 1]} : vector<25x8x8xbf16> to vector<1x8x8xbf16>
    %91 = vector.shape_cast %90 : vector<1x8x8xbf16> to vector<8x8xbf16>
    %92 = vector.extract_strided_slice %3 {offsets = [0, 98], sizes = [8, 896], strides = [1, 1]} : vector<8x1028xbf16> to vector<8x896xbf16>
    %cst_24 = arith.constant dense<0.000000e+00> : vector<8x896xf32>
    %93 = tpu.matmul %91, %92, %cst_24 {dimension_numbers = #tpu.dot_dimension_numbers<[1], [0], [0], [1], [0, 0, 1, 1], [], []>} : vector<8x8xbf16>, vector<8x896xbf16>, vector<8x896xf32> -> vector<8x896xf32>
    %94 = arith.addf %89, %93 : vector<8x896xf32>
    %95 = vector.extract_strided_slice %0 {offsets = [18, 0, 0], sizes = [1, 8, 8], strides = [1, 1, 1]} : vector<25x8x8xbf16> to vector<1x8x8xbf16>
    %96 = vector.shape_cast %95 : vector<1x8x8xbf16> to vector<8x8xbf16>
    %97 = vector.extract_strided_slice %3 {offsets = [0, 99], sizes = [8, 896], strides = [1, 1]} : vector<8x1028xbf16> to vector<8x896xbf16>
    %cst_25 = arith.constant dense<0.000000e+00> : vector<8x896xf32>
    %98 = tpu.matmul %96, %97, %cst_25 {dimension_numbers = #tpu.dot_dimension_numbers<[1], [0], [0], [1], [0, 0, 1, 1], [], []>} : vector<8x8xbf16>, vector<8x896xbf16>, vector<8x896xf32> -> vector<8x896xf32>
    %99 = arith.addf %94, %98 : vector<8x896xf32>
    %100 = vector.extract_strided_slice %0 {offsets = [19, 0, 0], sizes = [1, 8, 8], strides = [1, 1, 1]} : vector<25x8x8xbf16> to vector<1x8x8xbf16>
    %101 = vector.shape_cast %100 : vector<1x8x8xbf16> to vector<8x8xbf16>
    %102 = vector.extract_strided_slice %3 {offsets = [0, 100], sizes = [8, 896], strides = [1, 1]} : vector<8x1028xbf16> to vector<8x896xbf16>
    %cst_26 = arith.constant dense<0.000000e+00> : vector<8x896xf32>
    %103 = tpu.matmul %101, %102, %cst_26 {dimension_numbers = #tpu.dot_dimension_numbers<[1], [0], [0], [1], [0, 0, 1, 1], [], []>} : vector<8x8xbf16>, vector<8x896xbf16>, vector<8x896xf32> -> vector<8x896xf32>
    %104 = arith.addf %99, %103 : vector<8x896xf32>
    %105 = vector.extract_strided_slice %0 {offsets = [20, 0, 0], sizes = [1, 8, 8], strides = [1, 1, 1]} : vector<25x8x8xbf16> to vector<1x8x8xbf16>
    %106 = vector.shape_cast %105 : vector<1x8x8xbf16> to vector<8x8xbf16>
    %107 = vector.extract_strided_slice %3 {offsets = [0, 128], sizes = [8, 896], strides = [1, 1]} : vector<8x1028xbf16> to vector<8x896xbf16>
    %cst_27 = arith.constant dense<0.000000e+00> : vector<8x896xf32>
    %108 = tpu.matmul %106, %107, %cst_27 {dimension_numbers = #tpu.dot_dimension_numbers<[1], [0], [0], [1], [0, 0, 1, 1], [], []>} : vector<8x8xbf16>, vector<8x896xbf16>, vector<8x896xf32> -> vector<8x896xf32>
    %109 = arith.addf %104, %108 : vector<8x896xf32>
    %110 = vector.extract_strided_slice %0 {offsets = [21, 0, 0], sizes = [1, 8, 8], strides = [1, 1, 1]} : vector<25x8x8xbf16> to vector<1x8x8xbf16>
    %111 = vector.shape_cast %110 : vector<1x8x8xbf16> to vector<8x8xbf16>
    %112 = vector.extract_strided_slice %3 {offsets = [0, 129], sizes = [8, 896], strides = [1, 1]} : vector<8x1028xbf16> to vector<8x896xbf16>
    %cst_28 = arith.constant dense<0.000000e+00> : vector<8x896xf32>
    %113 = tpu.matmul %111, %112, %cst_28 {dimension_numbers = #tpu.dot_dimension_numbers<[1], [0], [0], [1], [0, 0, 1, 1], [], []>} : vector<8x8xbf16>, vector<8x896xbf16>, vector<8x896xf32> -> vector<8x896xf32>
    %114 = arith.addf %109, %113 : vector<8x896xf32>
    %115 = vector.extract_strided_slice %0 {offsets = [22, 0, 0], sizes = [1, 8, 8], strides = [1, 1, 1]} : vector<25x8x8xbf16> to vector<1x8x8xbf16>
    %116 = vector.shape_cast %115 : vector<1x8x8xbf16> to vector<8x8xbf16>
    %117 = vector.extract_strided_slice %3 {offsets = [0, 130], sizes = [8, 896], strides = [1, 1]} : vector<8x1028xbf16> to vector<8x896xbf16>
    %cst_29 = arith.constant dense<0.000000e+00> : vector<8x896xf32>
    %118 = tpu.matmul %116, %117, %cst_29 {dimension_numbers = #tpu.dot_dimension_numbers<[1], [0], [0], [1], [0, 0, 1, 1], [], []>} : vector<8x8xbf16>, vector<8x896xbf16>, vector<8x896xf32> -> vector<8x896xf32>
    %119 = arith.addf %114, %118 : vector<8x896xf32>
    %120 = vector.extract_strided_slice %0 {offsets = [23, 0, 0], sizes = [1, 8, 8], strides = [1, 1, 1]} : vector<25x8x8xbf16> to vector<1x8x8xbf16>
    %121 = vector.shape_cast %120 : vector<1x8x8xbf16> to vector<8x8xbf16>
    %122 = vector.extract_strided_slice %3 {offsets = [0, 131], sizes = [8, 896], strides = [1, 1]} : vector<8x1028xbf16> to vector<8x896xbf16>
    %cst_30 = arith.constant dense<0.000000e+00> : vector<8x896xf32>
    %123 = tpu.matmul %121, %122, %cst_30 {dimension_numbers = #tpu.dot_dimension_numbers<[1], [0], [0], [1], [0, 0, 1, 1], [], []>} : vector<8x8xbf16>, vector<8x896xbf16>, vector<8x896xf32> -> vector<8x896xf32>
    %124 = arith.addf %119, %123 : vector<8x896xf32>
    %125 = vector.extract_strided_slice %0 {offsets = [24, 0, 0], sizes = [1, 8, 8], strides = [1, 1, 1]} : vector<25x8x8xbf16> to vector<1x8x8xbf16>
    %126 = vector.shape_cast %125 : vector<1x8x8xbf16> to vector<8x8xbf16>
    %127 = vector.extract_strided_slice %3 {offsets = [0, 132], sizes = [8, 896], strides = [1, 1]} : vector<8x1028xbf16> to vector<8x896xbf16>
    %cst_31 = arith.constant dense<0.000000e+00> : vector<8x896xf32>
    %128 = tpu.matmul %126, %127, %cst_31 {dimension_numbers = #tpu.dot_dimension_numbers<[1], [0], [0], [1], [0, 0, 1, 1], [], []>} : vector<8x8xbf16>, vector<8x896xbf16>, vector<8x896xf32> -> vector<8x896xf32>
    %129 = arith.addf %124, %128 : vector<8x896xf32>
    %130 = vector.broadcast %1 : vector<8x1xf32> to vector<8x896xf32>
    %131 = arith.addf %129, %130 : vector<8x896xf32>
    %cst_32 = arith.constant 0.000000e+00 : f32
    %132 = vector.broadcast %cst_32 : f32 to vector<8x896xf32>
    %133 = arith.maximumf %131, %132 : vector<8x896xf32>
    %c0_33 = arith.constant 0 : index
    %c0_34 = arith.constant 0 : index
    %c0_35 = arith.constant 0 : index
    %134 = vector.load %arg4[%c0_33, %c0_34, %c0_35] : memref<1x8x896xf32, #tpu.memory_space<vmem>>, vector<1x8x896xf32>
    %135 = vector.shape_cast %134 : vector<1x8x896xf32> to vector<8x896xf32>
    %136 = vector.shape_cast %133 : vector<8x896xf32> to vector<1x8x896xf32>
    tpu.vector_store %arg4[%c0_33, %c0_34, %c0_35], %136 {strides = array<i32>} : memref<1x8x896xf32, #tpu.memory_space<vmem>>, vector<1x8x896xf32>,
    return
  }
  func.func @transform_0(%arg0: i32) -> (i32, i32, i32) {
    %c0_i32 = arith.constant 0 : i32
    %c0_i32_0 = arith.constant 0 : i32
    %c0_i32_1 = arith.constant 0 : i32
    return %arg0, %c0_i32, %c0_i32_0 : i32, i32, i32
  }
  func.func @transform_1(%arg0: i32) -> (i32, i32, i32) {
    %c0_i32 = arith.constant 0 : i32
    %c0_i32_0 = arith.constant 0 : i32
    %c0_i32_1 = arith.constant 0 : i32
    %c0_i32_2 = arith.constant 0 : i32
    return %c0_i32, %c0_i32_0, %c0_i32_1 : i32, i32, i32
  }
  func.func @transform_2(%arg0: i32) -> (i32, i32) {
    %c0_i32 = arith.constant 0 : i32
    %c0_i32_0 = arith.constant 0 : i32
    %c0_i32_1 = arith.constant 0 : i32
    return %c0_i32, %c0_i32_0 : i32, i32
  }
  func.func @transform_3(%arg0: i32) -> (i32, i32, i32) {
    %c0_i32 = arith.constant 0 : i32
    %c0_i32_0 = arith.constant 0 : i32
    %c0_i32_1 = arith.constant 0 : i32
    return %arg0, %c0_i32, %c0_i32_0 : i32, i32, i32
  }
}

module attributes {stable_mosaic.version = 11 : i64} {
  func.func @kernel(%arg0: i32, %arg1: memref<1x8x200xbf16, #tpu.memory_space<vmem>>, %arg2: memref<25x16x8xbf16, #tpu.memory_space<vmem>>, %arg3: memref<16x1xf32, #tpu.memory_space<vmem>>, %arg4: memref<1x16x140xf32, #tpu.memory_space<vmem>>) attributes {dimension_semantics = [#tpu.dimension_semantics<parallel>], iteration_bounds = array<i64: 2>, scalar_prefetch = 0 : i64, scratch_operands = 0 : i64, tpu.core_type = #tpu.core_type<tc>, window_params = [{transform_indices = @transform_0, window_bounds = array<i64: 1, 8, 200>}, {pipeline_mode = #tpu.pipeline_mode<synchronous>, transform_indices = @transform_1, window_bounds = array<i64: 25, 16, 8>}, {pipeline_mode = #tpu.pipeline_mode<synchronous>, transform_indices = @transform_2, window_bounds = array<i64: 16, 1>}, {transform_indices = @transform_3, window_bounds = array<i64: 1, 16, 140>}]} {
    %c0 = arith.constant 0 : index
    %c0_0 = arith.constant 0 : index
    %c0_1 = arith.constant 0 : index
    %0 = vector.load %arg2[%c0, %c0_0, %c0_1] : memref<25x16x8xbf16, #tpu.memory_space<vmem>>, vector<25x16x8xbf16>
    %c0_2 = arith.constant 0 : index
    %c0_3 = arith.constant 0 : index
    %1 = vector.load %arg3[%c0_2, %c0_3] : memref<16x1xf32, #tpu.memory_space<vmem>>, vector<16x1xf32>
    %c0_4 = arith.constant 0 : index
    %c0_5 = arith.constant 0 : index
    %c0_6 = arith.constant 0 : index
    %2 = vector.load %arg1[%c0_4, %c0_5, %c0_6] : memref<1x8x200xbf16, #tpu.memory_space<vmem>>, vector<1x8x200xbf16>
    %3 = vector.shape_cast %2 : vector<1x8x200xbf16> to vector<8x200xbf16>
    %cst = arith.constant 0.000000e+00 : f32
    %4 = vector.broadcast %cst : f32 to vector<16x140xf32>
    %5 = vector.extract_strided_slice %0 {offsets = [0, 0, 0], sizes = [1, 16, 8], strides = [1, 1, 1]} : vector<25x16x8xbf16> to vector<1x16x8xbf16>
    %6 = vector.shape_cast %5 : vector<1x16x8xbf16> to vector<16x8xbf16>
    %7 = vector.extract_strided_slice %3 {offsets = [0, 0], sizes = [8, 140], strides = [1, 1]} : vector<8x200xbf16> to vector<8x140xbf16>
    %cst_7 = arith.constant dense<0.000000e+00> : vector<16x140xf32>
    %8 = tpu.matmul %6, %7, %cst_7 {dimension_numbers = #tpu.dot_dimension_numbers<[1], [0], [0], [1], [0, 0, 1, 1], [], []>} : vector<16x8xbf16>, vector<8x140xbf16>, vector<16x140xf32> -> vector<16x140xf32>
    %9 = arith.addf %4, %8 : vector<16x140xf32>
    %10 = vector.extract_strided_slice %0 {offsets = [1, 0, 0], sizes = [1, 16, 8], strides = [1, 1, 1]} : vector<25x16x8xbf16> to vector<1x16x8xbf16>
    %11 = vector.shape_cast %10 : vector<1x16x8xbf16> to vector<16x8xbf16>
    %12 = vector.extract_strided_slice %3 {offsets = [0, 1], sizes = [8, 140], strides = [1, 1]} : vector<8x200xbf16> to vector<8x140xbf16>
    %cst_8 = arith.constant dense<0.000000e+00> : vector<16x140xf32>
    %13 = tpu.matmul %11, %12, %cst_8 {dimension_numbers = #tpu.dot_dimension_numbers<[1], [0], [0], [1], [0, 0, 1, 1], [], []>} : vector<16x8xbf16>, vector<8x140xbf16>, vector<16x140xf32> -> vector<16x140xf32>
    %14 = arith.addf %9, %13 : vector<16x140xf32>
    %15 = vector.extract_strided_slice %0 {offsets = [2, 0, 0], sizes = [1, 16, 8], strides = [1, 1, 1]} : vector<25x16x8xbf16> to vector<1x16x8xbf16>
    %16 = vector.shape_cast %15 : vector<1x16x8xbf16> to vector<16x8xbf16>
    %17 = vector.extract_strided_slice %3 {offsets = [0, 2], sizes = [8, 140], strides = [1, 1]} : vector<8x200xbf16> to vector<8x140xbf16>
    %cst_9 = arith.constant dense<0.000000e+00> : vector<16x140xf32>
    %18 = tpu.matmul %16, %17, %cst_9 {dimension_numbers = #tpu.dot_dimension_numbers<[1], [0], [0], [1], [0, 0, 1, 1], [], []>} : vector<16x8xbf16>, vector<8x140xbf16>, vector<16x140xf32> -> vector<16x140xf32>
    %19 = arith.addf %14, %18 : vector<16x140xf32>
    %20 = vector.extract_strided_slice %0 {offsets = [3, 0, 0], sizes = [1, 16, 8], strides = [1, 1, 1]} : vector<25x16x8xbf16> to vector<1x16x8xbf16>
    %21 = vector.shape_cast %20 : vector<1x16x8xbf16> to vector<16x8xbf16>
    %22 = vector.extract_strided_slice %3 {offsets = [0, 3], sizes = [8, 140], strides = [1, 1]} : vector<8x200xbf16> to vector<8x140xbf16>
    %cst_10 = arith.constant dense<0.000000e+00> : vector<16x140xf32>
    %23 = tpu.matmul %21, %22, %cst_10 {dimension_numbers = #tpu.dot_dimension_numbers<[1], [0], [0], [1], [0, 0, 1, 1], [], []>} : vector<16x8xbf16>, vector<8x140xbf16>, vector<16x140xf32> -> vector<16x140xf32>
    %24 = arith.addf %19, %23 : vector<16x140xf32>
    %25 = vector.extract_strided_slice %0 {offsets = [4, 0, 0], sizes = [1, 16, 8], strides = [1, 1, 1]} : vector<25x16x8xbf16> to vector<1x16x8xbf16>
    %26 = vector.shape_cast %25 : vector<1x16x8xbf16> to vector<16x8xbf16>
    %27 = vector.extract_strided_slice %3 {offsets = [0, 4], sizes = [8, 140], strides = [1, 1]} : vector<8x200xbf16> to vector<8x140xbf16>
    %cst_11 = arith.constant dense<0.000000e+00> : vector<16x140xf32>
    %28 = tpu.matmul %26, %27, %cst_11 {dimension_numbers = #tpu.dot_dimension_numbers<[1], [0], [0], [1], [0, 0, 1, 1], [], []>} : vector<16x8xbf16>, vector<8x140xbf16>, vector<16x140xf32> -> vector<16x140xf32>
    %29 = arith.addf %24, %28 : vector<16x140xf32>
    %30 = vector.extract_strided_slice %0 {offsets = [5, 0, 0], sizes = [1, 16, 8], strides = [1, 1, 1]} : vector<25x16x8xbf16> to vector<1x16x8xbf16>
    %31 = vector.shape_cast %30 : vector<1x16x8xbf16> to vector<16x8xbf16>
    %32 = vector.extract_strided_slice %3 {offsets = [0, 14], sizes = [8, 140], strides = [1, 1]} : vector<8x200xbf16> to vector<8x140xbf16>
    %cst_12 = arith.constant dense<0.000000e+00> : vector<16x140xf32>
    %33 = tpu.matmul %31, %32, %cst_12 {dimension_numbers = #tpu.dot_dimension_numbers<[1], [0], [0], [1], [0, 0, 1, 1], [], []>} : vector<16x8xbf16>, vector<8x140xbf16>, vector<16x140xf32> -> vector<16x140xf32>
    %34 = arith.addf %29, %33 : vector<16x140xf32>
    %35 = vector.extract_strided_slice %0 {offsets = [6, 0, 0], sizes = [1, 16, 8], strides = [1, 1, 1]} : vector<25x16x8xbf16> to vector<1x16x8xbf16>
    %36 = vector.shape_cast %35 : vector<1x16x8xbf16> to vector<16x8xbf16>
    %37 = vector.extract_strided_slice %3 {offsets = [0, 15], sizes = [8, 140], strides = [1, 1]} : vector<8x200xbf16> to vector<8x140xbf16>
    %cst_13 = arith.constant dense<0.000000e+00> : vector<16x140xf32>
    %38 = tpu.matmul %36, %37, %cst_13 {dimension_numbers = #tpu.dot_dimension_numbers<[1], [0], [0], [1], [0, 0, 1, 1], [], []>} : vector<16x8xbf16>, vector<8x140xbf16>, vector<16x140xf32> -> vector<16x140xf32>
    %39 = arith.addf %34, %38 : vector<16x140xf32>
    %40 = vector.extract_strided_slice %0 {offsets = [7, 0, 0], sizes = [1, 16, 8], strides = [1, 1, 1]} : vector<25x16x8xbf16> to vector<1x16x8xbf16>
    %41 = vector.shape_cast %40 : vector<1x16x8xbf16> to vector<16x8xbf16>
    %42 = vector.extract_strided_slice %3 {offsets = [0, 16], sizes = [8, 140], strides = [1, 1]} : vector<8x200xbf16> to vector<8x140xbf16>
    %cst_14 = arith.constant dense<0.000000e+00> : vector<16x140xf32>
    %43 = tpu.matmul %41, %42, %cst_14 {dimension_numbers = #tpu.dot_dimension_numbers<[1], [0], [0], [1], [0, 0, 1, 1], [], []>} : vector<16x8xbf16>, vector<8x140xbf16>, vector<16x140xf32> -> vector<16x140xf32>
    %44 = arith.addf %39, %43 : vector<16x140xf32>
    %45 = vector.extract_strided_slice %0 {offsets = [8, 0, 0], sizes = [1, 16, 8], strides = [1, 1, 1]} : vector<25x16x8xbf16> to vector<1x16x8xbf16>
    %46 = vector.shape_cast %45 : vector<1x16x8xbf16> to vector<16x8xbf16>
    %47 = vector.extract_strided_slice %3 {offsets = [0, 17], sizes = [8, 140], strides = [1, 1]} : vector<8x200xbf16> to vector<8x140xbf16>
    %cst_15 = arith.constant dense<0.000000e+00> : vector<16x140xf32>
    %48 = tpu.matmul %46, %47, %cst_15 {dimension_numbers = #tpu.dot_dimension_numbers<[1], [0], [0], [1], [0, 0, 1, 1], [], []>} : vector<16x8xbf16>, vector<8x140xbf16>, vector<16x140xf32> -> vector<16x140xf32>
    %49 = arith.addf %44, %48 : vector<16x140xf32>
    %50 = vector.extract_strided_slice %0 {offsets = [9, 0, 0], sizes = [1, 16, 8], strides = [1, 1, 1]} : vector<25x16x8xbf16> to vector<1x16x8xbf16>
    %51 = vector.shape_cast %50 : vector<1x16x8xbf16> to vector<16x8xbf16>
    %52 = vector.extract_strided_slice %3 {offsets = [0, 18], sizes = [8, 140], strides = [1, 1]} : vector<8x200xbf16> to vector<8x140xbf16>
    %cst_16 = arith.constant dense<0.000000e+00> : vector<16x140xf32>
    %53 = tpu.matmul %51, %52, %cst_16 {dimension_numbers = #tpu.dot_dimension_numbers<[1], [0], [0], [1], [0, 0, 1, 1], [], []>} : vector<16x8xbf16>, vector<8x140xbf16>, vector<16x140xf32> -> vector<16x140xf32>
    %54 = arith.addf %49, %53 : vector<16x140xf32>
    %55 = vector.extract_strided_slice %0 {offsets = [10, 0, 0], sizes = [1, 16, 8], strides = [1, 1, 1]} : vector<25x16x8xbf16> to vector<1x16x8xbf16>
    %56 = vector.shape_cast %55 : vector<1x16x8xbf16> to vector<16x8xbf16>
    %57 = vector.extract_strided_slice %3 {offsets = [0, 28], sizes = [8, 140], strides = [1, 1]} : vector<8x200xbf16> to vector<8x140xbf16>
    %cst_17 = arith.constant dense<0.000000e+00> : vector<16x140xf32>
    %58 = tpu.matmul %56, %57, %cst_17 {dimension_numbers = #tpu.dot_dimension_numbers<[1], [0], [0], [1], [0, 0, 1, 1], [], []>} : vector<16x8xbf16>, vector<8x140xbf16>, vector<16x140xf32> -> vector<16x140xf32>
    %59 = arith.addf %54, %58 : vector<16x140xf32>
    %60 = vector.extract_strided_slice %0 {offsets = [11, 0, 0], sizes = [1, 16, 8], strides = [1, 1, 1]} : vector<25x16x8xbf16> to vector<1x16x8xbf16>
    %61 = vector.shape_cast %60 : vector<1x16x8xbf16> to vector<16x8xbf16>
    %62 = vector.extract_strided_slice %3 {offsets = [0, 29], sizes = [8, 140], strides = [1, 1]} : vector<8x200xbf16> to vector<8x140xbf16>
    %cst_18 = arith.constant dense<0.000000e+00> : vector<16x140xf32>
    %63 = tpu.matmul %61, %62, %cst_18 {dimension_numbers = #tpu.dot_dimension_numbers<[1], [0], [0], [1], [0, 0, 1, 1], [], []>} : vector<16x8xbf16>, vector<8x140xbf16>, vector<16x140xf32> -> vector<16x140xf32>
    %64 = arith.addf %59, %63 : vector<16x140xf32>
    %65 = vector.extract_strided_slice %0 {offsets = [12, 0, 0], sizes = [1, 16, 8], strides = [1, 1, 1]} : vector<25x16x8xbf16> to vector<1x16x8xbf16>
    %66 = vector.shape_cast %65 : vector<1x16x8xbf16> to vector<16x8xbf16>
    %67 = vector.extract_strided_slice %3 {offsets = [0, 30], sizes = [8, 140], strides = [1, 1]} : vector<8x200xbf16> to vector<8x140xbf16>
    %cst_19 = arith.constant dense<0.000000e+00> : vector<16x140xf32>
    %68 = tpu.matmul %66, %67, %cst_19 {dimension_numbers = #tpu.dot_dimension_numbers<[1], [0], [0], [1], [0, 0, 1, 1], [], []>} : vector<16x8xbf16>, vector<8x140xbf16>, vector<16x140xf32> -> vector<16x140xf32>
    %69 = arith.addf %64, %68 : vector<16x140xf32>
    %70 = vector.extract_strided_slice %0 {offsets = [13, 0, 0], sizes = [1, 16, 8], strides = [1, 1, 1]} : vector<25x16x8xbf16> to vector<1x16x8xbf16>
    %71 = vector.shape_cast %70 : vector<1x16x8xbf16> to vector<16x8xbf16>
    %72 = vector.extract_strided_slice %3 {offsets = [0, 31], sizes = [8, 140], strides = [1, 1]} : vector<8x200xbf16> to vector<8x140xbf16>
    %cst_20 = arith.constant dense<0.000000e+00> : vector<16x140xf32>
    %73 = tpu.matmul %71, %72, %cst_20 {dimension_numbers = #tpu.dot_dimension_numbers<[1], [0], [0], [1], [0, 0, 1, 1], [], []>} : vector<16x8xbf16>, vector<8x140xbf16>, vector<16x140xf32> -> vector<16x140xf32>
    %74 = arith.addf %69, %73 : vector<16x140xf32>
    %75 = vector.extract_strided_slice %0 {offsets = [14, 0, 0], sizes = [1, 16, 8], strides = [1, 1, 1]} : vector<25x16x8xbf16> to vector<1x16x8xbf16>
    %76 = vector.shape_cast %75 : vector<1x16x8xbf16> to vector<16x8xbf16>
    %77 = vector.extract_strided_slice %3 {offsets = [0, 32], sizes = [8, 140], strides = [1, 1]} : vector<8x200xbf16> to vector<8x140xbf16>
    %cst_21 = arith.constant dense<0.000000e+00> : vector<16x140xf32>
    %78 = tpu.matmul %76, %77, %cst_21 {dimension_numbers = #tpu.dot_dimension_numbers<[1], [0], [0], [1], [0, 0, 1, 1], [], []>} : vector<16x8xbf16>, vector<8x140xbf16>, vector<16x140xf32> -> vector<16x140xf32>
    %79 = arith.addf %74, %78 : vector<16x140xf32>
    %80 = vector.extract_strided_slice %0 {offsets = [15, 0, 0], sizes = [1, 16, 8], strides = [1, 1, 1]} : vector<25x16x8xbf16> to vector<1x16x8xbf16>
    %81 = vector.shape_cast %80 : vector<1x16x8xbf16> to vector<16x8xbf16>
    %82 = vector.extract_strided_slice %3 {offsets = [0, 42], sizes = [8, 140], strides = [1, 1]} : vector<8x200xbf16> to vector<8x140xbf16>
    %cst_22 = arith.constant dense<0.000000e+00> : vector<16x140xf32>
    %83 = tpu.matmul %81, %82, %cst_22 {dimension_numbers = #tpu.dot_dimension_numbers<[1], [0], [0], [1], [0, 0, 1, 1], [], []>} : vector<16x8xbf16>, vector<8x140xbf16>, vector<16x140xf32> -> vector<16x140xf32>
    %84 = arith.addf %79, %83 : vector<16x140xf32>
    %85 = vector.extract_strided_slice %0 {offsets = [16, 0, 0], sizes = [1, 16, 8], strides = [1, 1, 1]} : vector<25x16x8xbf16> to vector<1x16x8xbf16>
    %86 = vector.shape_cast %85 : vector<1x16x8xbf16> to vector<16x8xbf16>
    %87 = vector.extract_strided_slice %3 {offsets = [0, 43], sizes = [8, 140], strides = [1, 1]} : vector<8x200xbf16> to vector<8x140xbf16>
    %cst_23 = arith.constant dense<0.000000e+00> : vector<16x140xf32>
    %88 = tpu.matmul %86, %87, %cst_23 {dimension_numbers = #tpu.dot_dimension_numbers<[1], [0], [0], [1], [0, 0, 1, 1], [], []>} : vector<16x8xbf16>, vector<8x140xbf16>, vector<16x140xf32> -> vector<16x140xf32>
    %89 = arith.addf %84, %88 : vector<16x140xf32>
    %90 = vector.extract_strided_slice %0 {offsets = [17, 0, 0], sizes = [1, 16, 8], strides = [1, 1, 1]} : vector<25x16x8xbf16> to vector<1x16x8xbf16>
    %91 = vector.shape_cast %90 : vector<1x16x8xbf16> to vector<16x8xbf16>
    %92 = vector.extract_strided_slice %3 {offsets = [0, 44], sizes = [8, 140], strides = [1, 1]} : vector<8x200xbf16> to vector<8x140xbf16>
    %cst_24 = arith.constant dense<0.000000e+00> : vector<16x140xf32>
    %93 = tpu.matmul %91, %92, %cst_24 {dimension_numbers = #tpu.dot_dimension_numbers<[1], [0], [0], [1], [0, 0, 1, 1], [], []>} : vector<16x8xbf16>, vector<8x140xbf16>, vector<16x140xf32> -> vector<16x140xf32>
    %94 = arith.addf %89, %93 : vector<16x140xf32>
    %95 = vector.extract_strided_slice %0 {offsets = [18, 0, 0], sizes = [1, 16, 8], strides = [1, 1, 1]} : vector<25x16x8xbf16> to vector<1x16x8xbf16>
    %96 = vector.shape_cast %95 : vector<1x16x8xbf16> to vector<16x8xbf16>
    %97 = vector.extract_strided_slice %3 {offsets = [0, 45], sizes = [8, 140], strides = [1, 1]} : vector<8x200xbf16> to vector<8x140xbf16>
    %cst_25 = arith.constant dense<0.000000e+00> : vector<16x140xf32>
    %98 = tpu.matmul %96, %97, %cst_25 {dimension_numbers = #tpu.dot_dimension_numbers<[1], [0], [0], [1], [0, 0, 1, 1], [], []>} : vector<16x8xbf16>, vector<8x140xbf16>, vector<16x140xf32> -> vector<16x140xf32>
    %99 = arith.addf %94, %98 : vector<16x140xf32>
    %100 = vector.extract_strided_slice %0 {offsets = [19, 0, 0], sizes = [1, 16, 8], strides = [1, 1, 1]} : vector<25x16x8xbf16> to vector<1x16x8xbf16>
    %101 = vector.shape_cast %100 : vector<1x16x8xbf16> to vector<16x8xbf16>
    %102 = vector.extract_strided_slice %3 {offsets = [0, 46], sizes = [8, 140], strides = [1, 1]} : vector<8x200xbf16> to vector<8x140xbf16>
    %cst_26 = arith.constant dense<0.000000e+00> : vector<16x140xf32>
    %103 = tpu.matmul %101, %102, %cst_26 {dimension_numbers = #tpu.dot_dimension_numbers<[1], [0], [0], [1], [0, 0, 1, 1], [], []>} : vector<16x8xbf16>, vector<8x140xbf16>, vector<16x140xf32> -> vector<16x140xf32>
    %104 = arith.addf %99, %103 : vector<16x140xf32>
    %105 = vector.extract_strided_slice %0 {offsets = [20, 0, 0], sizes = [1, 16, 8], strides = [1, 1, 1]} : vector<25x16x8xbf16> to vector<1x16x8xbf16>
    %106 = vector.shape_cast %105 : vector<1x16x8xbf16> to vector<16x8xbf16>
    %107 = vector.extract_strided_slice %3 {offsets = [0, 56], sizes = [8, 140], strides = [1, 1]} : vector<8x200xbf16> to vector<8x140xbf16>
    %cst_27 = arith.constant dense<0.000000e+00> : vector<16x140xf32>
    %108 = tpu.matmul %106, %107, %cst_27 {dimension_numbers = #tpu.dot_dimension_numbers<[1], [0], [0], [1], [0, 0, 1, 1], [], []>} : vector<16x8xbf16>, vector<8x140xbf16>, vector<16x140xf32> -> vector<16x140xf32>
    %109 = arith.addf %104, %108 : vector<16x140xf32>
    %110 = vector.extract_strided_slice %0 {offsets = [21, 0, 0], sizes = [1, 16, 8], strides = [1, 1, 1]} : vector<25x16x8xbf16> to vector<1x16x8xbf16>
    %111 = vector.shape_cast %110 : vector<1x16x8xbf16> to vector<16x8xbf16>
    %112 = vector.extract_strided_slice %3 {offsets = [0, 57], sizes = [8, 140], strides = [1, 1]} : vector<8x200xbf16> to vector<8x140xbf16>
    %cst_28 = arith.constant dense<0.000000e+00> : vector<16x140xf32>
    %113 = tpu.matmul %111, %112, %cst_28 {dimension_numbers = #tpu.dot_dimension_numbers<[1], [0], [0], [1], [0, 0, 1, 1], [], []>} : vector<16x8xbf16>, vector<8x140xbf16>, vector<16x140xf32> -> vector<16x140xf32>
    %114 = arith.addf %109, %113 : vector<16x140xf32>
    %115 = vector.extract_strided_slice %0 {offsets = [22, 0, 0], sizes = [1, 16, 8], strides = [1, 1, 1]} : vector<25x16x8xbf16> to vector<1x16x8xbf16>
    %116 = vector.shape_cast %115 : vector<1x16x8xbf16> to vector<16x8xbf16>
    %117 = vector.extract_strided_slice %3 {offsets = [0, 58], sizes = [8, 140], strides = [1, 1]} : vector<8x200xbf16> to vector<8x140xbf16>
    %cst_29 = arith.constant dense<0.000000e+00> : vector<16x140xf32>
    %118 = tpu.matmul %116, %117, %cst_29 {dimension_numbers = #tpu.dot_dimension_numbers<[1], [0], [0], [1], [0, 0, 1, 1], [], []>} : vector<16x8xbf16>, vector<8x140xbf16>, vector<16x140xf32> -> vector<16x140xf32>
    %119 = arith.addf %114, %118 : vector<16x140xf32>
    %120 = vector.extract_strided_slice %0 {offsets = [23, 0, 0], sizes = [1, 16, 8], strides = [1, 1, 1]} : vector<25x16x8xbf16> to vector<1x16x8xbf16>
    %121 = vector.shape_cast %120 : vector<1x16x8xbf16> to vector<16x8xbf16>
    %122 = vector.extract_strided_slice %3 {offsets = [0, 59], sizes = [8, 140], strides = [1, 1]} : vector<8x200xbf16> to vector<8x140xbf16>
    %cst_30 = arith.constant dense<0.000000e+00> : vector<16x140xf32>
    %123 = tpu.matmul %121, %122, %cst_30 {dimension_numbers = #tpu.dot_dimension_numbers<[1], [0], [0], [1], [0, 0, 1, 1], [], []>} : vector<16x8xbf16>, vector<8x140xbf16>, vector<16x140xf32> -> vector<16x140xf32>
    %124 = arith.addf %119, %123 : vector<16x140xf32>
    %125 = vector.extract_strided_slice %0 {offsets = [24, 0, 0], sizes = [1, 16, 8], strides = [1, 1, 1]} : vector<25x16x8xbf16> to vector<1x16x8xbf16>
    %126 = vector.shape_cast %125 : vector<1x16x8xbf16> to vector<16x8xbf16>
    %127 = vector.extract_strided_slice %3 {offsets = [0, 60], sizes = [8, 140], strides = [1, 1]} : vector<8x200xbf16> to vector<8x140xbf16>
    %cst_31 = arith.constant dense<0.000000e+00> : vector<16x140xf32>
    %128 = tpu.matmul %126, %127, %cst_31 {dimension_numbers = #tpu.dot_dimension_numbers<[1], [0], [0], [1], [0, 0, 1, 1], [], []>} : vector<16x8xbf16>, vector<8x140xbf16>, vector<16x140xf32> -> vector<16x140xf32>
    %129 = arith.addf %124, %128 : vector<16x140xf32>
    %130 = vector.broadcast %1 : vector<16x1xf32> to vector<16x140xf32>
    %131 = arith.addf %129, %130 : vector<16x140xf32>
    %cst_32 = arith.constant 0.000000e+00 : f32
    %132 = vector.broadcast %cst_32 : f32 to vector<16x140xf32>
    %133 = arith.maximumf %131, %132 : vector<16x140xf32>
    %c0_33 = arith.constant 0 : index
    %c0_34 = arith.constant 0 : index
    %c0_35 = arith.constant 0 : index
    %134 = vector.load %arg4[%c0_33, %c0_34, %c0_35] : memref<1x16x140xf32, #tpu.memory_space<vmem>>, vector<1x16x140xf32>
    %135 = vector.shape_cast %134 : vector<1x16x140xf32> to vector<16x140xf32>
    %136 = vector.shape_cast %133 : vector<16x140xf32> to vector<1x16x140xf32>
    tpu.vector_store %arg4[%c0_33, %c0_34, %c0_35], %136 {strides = array<i32>} : memref<1x16x140xf32, #tpu.memory_space<vmem>>, vector<1x16x140xf32>,
    return
  }
  func.func @transform_0(%arg0: i32) -> (i32, i32, i32) {
    %c0_i32 = arith.constant 0 : i32
    %c0_i32_0 = arith.constant 0 : i32
    %c0_i32_1 = arith.constant 0 : i32
    return %arg0, %c0_i32, %c0_i32_0 : i32, i32, i32
  }
  func.func @transform_1(%arg0: i32) -> (i32, i32, i32) {
    %c0_i32 = arith.constant 0 : i32
    %c0_i32_0 = arith.constant 0 : i32
    %c0_i32_1 = arith.constant 0 : i32
    %c0_i32_2 = arith.constant 0 : i32
    return %c0_i32, %c0_i32_0, %c0_i32_1 : i32, i32, i32
  }
  func.func @transform_2(%arg0: i32) -> (i32, i32) {
    %c0_i32 = arith.constant 0 : i32
    %c0_i32_0 = arith.constant 0 : i32
    %c0_i32_1 = arith.constant 0 : i32
    return %c0_i32, %c0_i32_0 : i32, i32
  }
  func.func @transform_3(%arg0: i32) -> (i32, i32, i32) {
    %c0_i32 = arith.constant 0 : i32
    %c0_i32_0 = arith.constant 0 : i32
    %c0_i32_1 = arith.constant 0 : i32
    return %arg0, %c0_i32, %c0_i32_0 : i32, i32, i32
  }
}

module attributes {stable_mosaic.version = 11 : i64} {
  func.func @_mlp_kernel(%arg0: i32, %arg1: memref<8x400xf32, #tpu.memory_space<vmem>>, %arg2: memref<400x128xf32, #tpu.memory_space<vmem>>, %arg3: memref<1x128xf32, #tpu.memory_space<vmem>>, %arg4: memref<128x128xf32, #tpu.memory_space<vmem>>, %arg5: memref<1x128xf32, #tpu.memory_space<vmem>>, %arg6: memref<128x128xf32, #tpu.memory_space<vmem>>, %arg7: memref<1x128xf32, #tpu.memory_space<vmem>>, %arg8: memref<8x128xf32, #tpu.memory_space<vmem>>) attributes {dimension_semantics = [#tpu.dimension_semantics<parallel>], iteration_bounds = array<i64: 1>, scalar_prefetch = 0 : i64, scratch_operands = 0 : i64, tpu.core_type = #tpu.core_type<tc>, window_params = [{transform_indices = @transform_0, window_bounds = array<i64: 8, 400>}, {pipeline_mode = #tpu.pipeline_mode<synchronous>, transform_indices = @transform_1, window_bounds = array<i64: 400, 128>}, {pipeline_mode = #tpu.pipeline_mode<synchronous>, transform_indices = @transform_2, window_bounds = array<i64: 1, 128>}, {pipeline_mode = #tpu.pipeline_mode<synchronous>, transform_indices = @transform_3, window_bounds = array<i64: 128, 128>}, {pipeline_mode = #tpu.pipeline_mode<synchronous>, transform_indices = @transform_4, window_bounds = array<i64: 1, 128>}, {pipeline_mode = #tpu.pipeline_mode<synchronous>, transform_indices = @transform_5, window_bounds = array<i64: 128, 128>}, {pipeline_mode = #tpu.pipeline_mode<synchronous>, transform_indices = @transform_6, window_bounds = array<i64: 1, 128>}, {transform_indices = @transform_7, window_bounds = array<i64: 8, 128>}]} {
    %c0 = arith.constant 0 : index
    %c0_0 = arith.constant 0 : index
    %0 = vector.load %arg1[%c0, %c0_0] : memref<8x400xf32, #tpu.memory_space<vmem>>, vector<8x400xf32>
    %c0_1 = arith.constant 0 : index
    %c0_2 = arith.constant 0 : index
    %1 = vector.load %arg2[%c0_1, %c0_2] : memref<400x128xf32, #tpu.memory_space<vmem>>, vector<400x128xf32>
    %cst = arith.constant dense<0.000000e+00> : vector<8x128xf32>
    %2 = tpu.matmul %0, %1, %cst {dimension_numbers = #tpu.dot_dimension_numbers<[1], [0], [0], [1], [0, 0, 1, 1], [], []>} : vector<8x400xf32>, vector<400x128xf32>, vector<8x128xf32> -> vector<8x128xf32>
    %c0_3 = arith.constant 0 : index
    %c0_4 = arith.constant 0 : index
    %3 = vector.load %arg3[%c0_3, %c0_4] : memref<1x128xf32, #tpu.memory_space<vmem>>, vector<1x128xf32>
    %4 = vector.broadcast %3 : vector<1x128xf32> to vector<8x128xf32>
    %5 = arith.addf %2, %4 : vector<8x128xf32>
    %cst_5 = arith.constant 0.000000e+00 : f32
    %6 = vector.broadcast %cst_5 : f32 to vector<8x128xf32>
    %7 = arith.maximumf %5, %6 : vector<8x128xf32>
    %c0_6 = arith.constant 0 : index
    %c0_7 = arith.constant 0 : index
    %8 = vector.load %arg4[%c0_6, %c0_7] : memref<128x128xf32, #tpu.memory_space<vmem>>, vector<128x128xf32>
    %cst_8 = arith.constant dense<0.000000e+00> : vector<8x128xf32>
    %9 = tpu.matmul %7, %8, %cst_8 {dimension_numbers = #tpu.dot_dimension_numbers<[1], [0], [0], [1], [0, 0, 1, 1], [], []>} : vector<8x128xf32>, vector<128x128xf32>, vector<8x128xf32> -> vector<8x128xf32>
    %c0_9 = arith.constant 0 : index
    %c0_10 = arith.constant 0 : index
    %10 = vector.load %arg5[%c0_9, %c0_10] : memref<1x128xf32, #tpu.memory_space<vmem>>, vector<1x128xf32>
    %11 = vector.broadcast %10 : vector<1x128xf32> to vector<8x128xf32>
    %12 = arith.addf %9, %11 : vector<8x128xf32>
    %cst_11 = arith.constant 0.000000e+00 : f32
    %13 = vector.broadcast %cst_11 : f32 to vector<8x128xf32>
    %14 = arith.maximumf %12, %13 : vector<8x128xf32>
    %c0_12 = arith.constant 0 : index
    %c0_13 = arith.constant 0 : index
    %15 = vector.load %arg6[%c0_12, %c0_13] : memref<128x128xf32, #tpu.memory_space<vmem>>, vector<128x128xf32>
    %cst_14 = arith.constant dense<0.000000e+00> : vector<8x128xf32>
    %16 = tpu.matmul %14, %15, %cst_14 {dimension_numbers = #tpu.dot_dimension_numbers<[1], [0], [0], [1], [0, 0, 1, 1], [], []>} : vector<8x128xf32>, vector<128x128xf32>, vector<8x128xf32> -> vector<8x128xf32>
    %c0_15 = arith.constant 0 : index
    %c0_16 = arith.constant 0 : index
    %17 = vector.load %arg7[%c0_15, %c0_16] : memref<1x128xf32, #tpu.memory_space<vmem>>, vector<1x128xf32>
    %18 = vector.broadcast %17 : vector<1x128xf32> to vector<8x128xf32>
    %19 = arith.addf %16, %18 : vector<8x128xf32>
    %c0_17 = arith.constant 0 : index
    %c0_18 = arith.constant 0 : index
    %20 = vector.load %arg8[%c0_17, %c0_18] : memref<8x128xf32, #tpu.memory_space<vmem>>, vector<8x128xf32>
    tpu.vector_store %arg8[%c0_17, %c0_18], %19 {strides = array<i32>} : memref<8x128xf32, #tpu.memory_space<vmem>>, vector<8x128xf32>,
    return
  }
  func.func @transform_0(%arg0: i32) -> (i32, i32) {
    %c0_i32 = arith.constant 0 : i32
    %c0_i32_0 = arith.constant 0 : i32
    return %arg0, %c0_i32 : i32, i32
  }
  func.func @transform_1(%arg0: i32) -> (i32, i32) {
    %c0_i32 = arith.constant 0 : i32
    %c0_i32_0 = arith.constant 0 : i32
    %c0_i32_1 = arith.constant 0 : i32
    return %c0_i32, %c0_i32_0 : i32, i32
  }
  func.func @transform_2(%arg0: i32) -> (i32, i32) {
    %c0_i32 = arith.constant 0 : i32
    %c0_i32_0 = arith.constant 0 : i32
    %c0_i32_1 = arith.constant 0 : i32
    return %c0_i32, %c0_i32_0 : i32, i32
  }
  func.func @transform_3(%arg0: i32) -> (i32, i32) {
    %c0_i32 = arith.constant 0 : i32
    %c0_i32_0 = arith.constant 0 : i32
    %c0_i32_1 = arith.constant 0 : i32
    return %c0_i32, %c0_i32_0 : i32, i32
  }
  func.func @transform_4(%arg0: i32) -> (i32, i32) {
    %c0_i32 = arith.constant 0 : i32
    %c0_i32_0 = arith.constant 0 : i32
    %c0_i32_1 = arith.constant 0 : i32
    return %c0_i32, %c0_i32_0 : i32, i32
  }
  func.func @transform_5(%arg0: i32) -> (i32, i32) {
    %c0_i32 = arith.constant 0 : i32
    %c0_i32_0 = arith.constant 0 : i32
    %c0_i32_1 = arith.constant 0 : i32
    return %c0_i32, %c0_i32_0 : i32, i32
  }
  func.func @transform_6(%arg0: i32) -> (i32, i32) {
    %c0_i32 = arith.constant 0 : i32
    %c0_i32_0 = arith.constant 0 : i32
    %c0_i32_1 = arith.constant 0 : i32
    return %c0_i32, %c0_i32_0 : i32, i32
  }
  func.func @transform_7(%arg0: i32) -> (i32, i32) {
    %c0_i32 = arith.constant 0 : i32
    %c0_i32_0 = arith.constant 0 : i32
    return %arg0, %c0_i32 : i32, i32
  }
}

</mosaic_0001>

<bundles_post_ra>
// kernel: net_forward.3
= control target key start
LH: loop header
LB: loop body
LE: loop exit
PB: predicated region body
PF: predicated region fallthrough
CT: control target
= control target key end

     0   :  { %s6008_s12 = smov 0   ;;  %s7146_s0 = inlined_call_operand.vmem [shape: bf16[2,8,1028], index: 0, kind: input, shape index: {}]   ;;  %s7147_s1 = inlined_call_operand.vmem [shape: bf16[25,8,8], index: 1, kind: input, shape index: {}]   ;;  %s7148_s2 = inlined_call_operand.vmem [shape: f32[8,1], index: 2, kind: input, shape index: {}]   ;;  %s7149_s3 = inlined_call_operand.vmem [shape: f32[2,8,896], index: 3, kind: output, shape index: {}]  }
   0x1 LB: > { %s5523_s13 = sadd.s32 4294967295, %s5964_s12   ;;  %p5527_p0 = scmp.ge.s32.totalorder %s5964_s12, 1  ;;  %s5964_s12 = sphi %s6008_s12, %s13_s12  }
   0x2   : > { %p137_p1 = scmp.lt.s32.totalorder %s5964_s12, 3 }
   0x4   : > { %p138_p2 = pnand %p5527_p0, %p137_p1 }
   0x6   : > { %141 = sbr.rel (%p138_p2) target bundleno = 741 (0x2e5), region = 32 }
   0xb   : > { %p161_p3 = scmp.lt.s32.totalorder %s5523_s13, 1  ;;  %v7153_v0 = vmov 0   ;;  %s5967_s18 = smov 127   ;;  %vm239_vm0 = vcmask 1039360   ;;  %vm251_vm1 = vcmask 1043456   ;;  %vm247_vm2 = vcmask 64512  }
   0xc   : > { %305 = vmatprep.mubr.bf16.mxu0 %v7153_v0  ;;  %346 = vmatprep.mubr.bf16.mxu1 %v7153_v0  ;;  %s5968_s19 = smov 126   ;;  %s5969_s20 = smov 125   ;;  %v173_v22 = vld [vmem:[%s7147_s1 + $0x4] sm:$0xf]  ;;  %v7150_v31 = vmov 0.0   ;;  %vm5977_vm3 = vmmov 0  }
   0xd   : > { %s7166_s13 = smov (!%p161_p3, %s5523_s13), 1  ;;  %5948 = vset.pattern.permute.xlu0 %v7153_v0  ;;  %s5970_s21 = smov 124   ;;  %vm639_vm4 = vcmask 1031168   ;;  %v172_v42 = vld [vmem:[%s7147_s1] sm:$0xf]  ;;  %vm857_vm5 = vcmask 1022976  }
   0xe   : > { %s5916_s14 = smul.u32 36, %s7166_s13  ;;  %s5971_s22 = smov 96   ;;  %v174_v61 = vld [vmem:[%s7147_s1 + $0x8] sm:$0xf]  ;;  %vm1075_vm6 = vcmask 1014784   ;;  %vm1293_vm7 = vcmask 785408  }
   0xf   : > { %s5972_s23 = smov 95   ;;  %s5973_s24 = smov 94   ;;  %vm1511_vm8 = vcmask 777216   ;;  %vm1729_vm9 = vcmask 769024   ;;  %vm1947_vm10 = vcmask 760832   ;;  %vm2165_vm11 = vcmask 752640  }
  0x10   : > { %s6022_s17 = scalar_lea.vmem %s7146_s0, %s5916_s14  ;;  %s5974_s25 = smov 93   ;;  %vm2383_vm12 = vcmask 523264   ;;  %vm2601_vm13 = vcmask 515072   ;;  %vm2819_vm14 = vcmask 506880   ;;  %vm3037_vm15 = vcmask 498688  }
  0x11   : > { %v199_v1 = vld [vmem:[%s6022_s17 + $0x8] sm:$0xff]  ;;  %v198_v2 = vld [vmem:[%s6022_s17] sm:$0xff]  ;;  %v200_v7 = vld [vmem:[%s6022_s17 + $0x10] sm:$0xff]  ;;  %s5976_s28 = smov 92   ;;  %s5978_s4 = smov 64  }
  0x12   : > { %v6029_v3 = vcombine.low %v199_v1, %v199_v1  ;;  %v6031_v4 = vcombine.low %v198_v2, %v198_v2  ;;  %v6035_v5 = vcombine.high %v198_v2, %v198_v2  ;;  %v6039_v6 = vcombine.high %v199_v1, %v199_v1  ;;  %v201_v10 = vld [vmem:[%s6022_s17 + $0x18] sm:$0xff]  ;;  %s5979_s7 = smov 63   ;;  %s5980_s10 = smov 62  }
  0x13   : > { %v6046_v8 = vcombine.high %v200_v7, %v200_v7  ;;  %v6048_v9 = vcombine.low %v200_v7, %v200_v7  ;;  %v6055_v11 = vcombine.low %v201_v10, %v201_v10  ;;  %v6057_v12 = vcombine.high %v201_v10, %v201_v10  ;;  %s5981_s15 = smov 61   ;;  %s5983_s26 = smov 32  }
  0x14   : > { %227 = vrot.lane.b32.xlu1 %v6029_v3, %s5967_s18  ;;  %223 = vrot.lane.b32.xlu0 %v6031_v4, %s5967_s18  ;;  %v440_v36 = vsel %vm251_vm1, %v6031_v4, 0  ;;  %v446_v39 = vsel %vm251_vm1, %v6029_v3, 0  ;;  %s5984_s29 = smov 31   ;;  %s5985_s5 = smov 30  }
  0x15   : > { %v452_v43 = vsel %vm251_vm1, %v6048_v9, 0  ;;  %v458_v47 = vsel %vm251_vm1, %v6055_v11, 0  ;;  %s5986_s8 = smov 29   ;;  %s5987_s11 = smov 28  }
  0x18   : > { %229 = vrot.lane.b32.xlu1 %v6039_v6, %s5967_s18  ;;  %225 = vrot.lane.b32.xlu0 %v6035_v5, %s5967_s18 }
  0x1c   : > { %233 = vrot.lane.b32.xlu1 %v6046_v8, %s5967_s18  ;;  %231 = vrot.lane.b32.xlu0 %v6048_v9, %s5967_s18 }
  0x20   : > { %237 = vrot.lane.b32.xlu1 %v6057_v12, %s5967_s18  ;;  %235 = vrot.lane.b32.xlu0 %v6055_v11, %s5967_s18 }
  0x24   : > { %625 = vrot.lane.b32.xlu1 %v6035_v5, %s5968_s19  ;;  %623 = vrot.lane.b32.xlu0 %v6031_v4, %s5968_s19 }
  0x28   : > { %629 = vrot.lane.b32.xlu1 %v6039_v6, %s5968_s19  ;;  %627 = vrot.lane.b32.xlu0 %v6029_v3, %s5968_s19 }
  0x2c   : > { %633 = vrot.lane.b32.xlu1 %v6046_v8, %s5968_s19  ;;  %631 = vrot.lane.b32.xlu0 %v6048_v9, %s5968_s19 }
  0x30   : > { %637 = vrot.lane.b32.xlu1 %v6057_v12, %s5968_s19  ;;  %635 = vrot.lane.b32.xlu0 %v6055_v11, %s5968_s19 }
  0x34   : > { %843 = vrot.lane.b32.xlu1 %v6035_v5, %s5969_s20  ;;  %841 = vrot.lane.b32.xlu0 %v6031_v4, %s5969_s20 }
  0x38   : > { %847 = vrot.lane.b32.xlu1 %v6039_v6, %s5969_s20  ;;  %845 = vrot.lane.b32.xlu0 %v6029_v3, %s5969_s20 }
  0x3c   : > { %851 = vrot.lane.b32.xlu1 %v6046_v8, %s5969_s20  ;;  %849 = vrot.lane.b32.xlu0 %v6048_v9, %s5969_s20 }
  0x40   : > { %855 = vrot.lane.b32.xlu1 %v6057_v12, %s5969_s20  ;;  %853 = vrot.lane.b32.xlu0 %v6055_v11, %s5969_s20 }
  0x44   : > { %1061 = vrot.lane.b32.xlu1 %v6035_v5, %s5970_s21  ;;  %1059 = vrot.lane.b32.xlu0 %v6031_v4, %s5970_s21 }
  0x48   : > { %1065 = vrot.lane.b32.xlu1 %v6039_v6, %s5970_s21  ;;  %1063 = vrot.lane.b32.xlu0 %v6029_v3, %s5970_s21 }
  0x4c   : > { %1069 = vrot.lane.b32.xlu1 %v6046_v8, %s5970_s21  ;;  %1067 = vrot.lane.b32.xlu0 %v6048_v9, %s5970_s21 }
  0x50   : > { %1073 = vrot.lane.b32.xlu1 %v6057_v12, %s5970_s21  ;;  %1071 = vrot.lane.b32.xlu0 %v6055_v11, %s5970_s21 }
  0x54   : > { %1279 = vrot.lane.b32.xlu1 %v6035_v5, %s5971_s22  ;;  %1277 = vrot.lane.b32.xlu0 %v6031_v4, %s5971_s22 }
  0x58   : > { %1283 = vrot.lane.b32.xlu1 %v6039_v6, %s5971_s22  ;;  %1281 = vrot.lane.b32.xlu0 %v6029_v3, %s5971_s22 }
  0x5c   : > { %1287 = vrot.lane.b32.xlu1 %v6046_v8, %s5971_s22  ;;  %1285 = vrot.lane.b32.xlu0 %v6048_v9, %s5971_s22 }
  0x60   : > { %1291 = vrot.lane.b32.xlu1 %v6057_v12, %s5971_s22  ;;  %1289 = vrot.lane.b32.xlu0 %v6055_v11, %s5971_s22 }
  0x64   : > { %1497 = vrot.lane.b32.xlu1 %v6035_v5, %s5972_s23  ;;  %1495 = vrot.lane.b32.xlu0 %v6031_v4, %s5972_s23 }
  0x68   : > { %1501 = vrot.lane.b32.xlu1 %v6039_v6, %s5972_s23  ;;  %1499 = vrot.lane.b32.xlu0 %v6029_v3, %s5972_s23 }
  0x6c   : > { %1505 = vrot.lane.b32.xlu1 %v6046_v8, %s5972_s23  ;;  %1503 = vrot.lane.b32.xlu0 %v6048_v9, %s5972_s23 }
  0x70   : > { %1509 = vrot.lane.b32.xlu1 %v6057_v12, %s5972_s23  ;;  %1507 = vrot.lane.b32.xlu0 %v6055_v11, %s5972_s23  ;;  %s5982_s23 = smov 60  }
  0x74   : > { %1715 = vrot.lane.b32.xlu1 %v6035_v5, %s5973_s24  ;;  %1713 = vrot.lane.b32.xlu0 %v6031_v4, %s5973_s24 }
  0x78   : > { %1719 = vrot.lane.b32.xlu1 %v6039_v6, %s5973_s24  ;;  %1717 = vrot.lane.b32.xlu0 %v6029_v3, %s5973_s24 }
  0x7c   : > { %1723 = vrot.lane.b32.xlu1 %v6046_v8, %s5973_s24  ;;  %1721 = vrot.lane.b32.xlu0 %v6048_v9, %s5973_s24 }
  0x80   : > { %1727 = vrot.lane.b32.xlu1 %v6057_v12, %s5973_s24  ;;  %1725 = vrot.lane.b32.xlu0 %v6055_v11, %s5973_s24 }
  0x84   : > { %1933 = vrot.lane.b32.xlu1 %v6035_v5, %s5974_s25  ;;  %1931 = vrot.lane.b32.xlu0 %v6031_v4, %s5974_s25 }
  0x86   : > { %v228_v13 = vpop.permute.xlu1 %227  ;;  %v224_v14 = vpop.permute.xlu0 %223 }
  0x88   : > { %1937 = vrot.lane.b32.xlu1 %v6039_v6, %s5974_s25  ;;  %1935 = vrot.lane.b32.xlu0 %v6029_v3, %s5974_s25 }
  0x8a   : > { %v230_v15 = vpop.permute.xlu1 %229  ;;  %v226_v16 = vpop.permute.xlu0 %225 }
  0x8b   : > { %v6140_v17 = vsel %vm239_vm0, %v226_v16, %v228_v13  ;;  %v240_v18 = vsel %vm239_vm0, %v224_v14, %v226_v16  ;;  %v6152_v23 = vsel %vm239_vm0, %v228_v13, %v230_v15 }
  0x8c   : > { %1941 = vrot.lane.b32.xlu1 %v6046_v8, %s5974_s25  ;;  %1939 = vrot.lane.b32.xlu0 %v6048_v9, %s5974_s25  ;;  %v253_v19 = vsel %vm251_vm1, %v240_v18, 0  ;;  %v259_v25 = vsel %vm251_vm1, %v6152_v23, 0 }
  0x8d   : > { %5538 = vmatprep.subr.msk.bf16.mxu0 %vm251_vm1, %v6140_v17 }
  0x8e   : > { %288 = vmatpush1.bf16.msra.mxu0 %v253_v19  ;;  %v234_v20 = vpop.permute.xlu1 %233  ;;  %v232_v21 = vpop.permute.xlu0 %231 }
  0x8f   : > { %v6155_v24 = vsel %vm239_vm0, %v230_v15, %v232_v21  ;;  %v6165_v26 = vsel %vm239_vm0, %v232_v21, %v234_v20 }
  0x90   : > { %1945 = vrot.lane.b32.xlu1 %v6057_v12, %s5974_s25  ;;  %1943 = vrot.lane.b32.xlu0 %v6055_v11, %s5974_s25  ;;  %v265_v33 = vsel %vm251_vm1, %v6165_v26, 0 }
  0x91   : > { %5539 = vmatmul.mubr.msk.bf16.vlgmr.msra.gmra.mxu0 %vm247_vm2, %v173_v22  ;;  %5540 = vmatprep.subr.msk.bf16.mxu1 %vm251_vm1, %v6155_v24 }
  0x92   : > { %329 = vmatpush1.bf16.msra.mxu1 %v259_v25  ;;  %v6167_v27 = vpop.permute.xlu1 %237  ;;  %v236_v28 = vpop.permute.xlu0 %235  ;;  %387 = vmatprep.mubr.bf16.mxu0 %v7153_v0 }
  0x93   : > { %v6172_v29 = vsel %vm239_vm0, %v236_v28, %v6167_v27  ;;  %v6175_v30 = vsel %vm239_vm0, %v234_v20, %v236_v28  ;;  %5766 = vmatprep.subr.bf16.mxu1 %v7150_v31 }
  0x94   : > { %2151 = vrot.lane.b32.xlu1 %v6035_v5, %s5976_s28  ;;  %2149 = vrot.lane.b32.xlu0 %v6031_v4, %s5976_s28  ;;  %v271_v32 = vsel %vm251_vm1, %v6172_v29, 0 }
  0x95   : > { %5541 = vmatmul.mubr.msk.bf16.vlgmr.msra.gmra.mxu1 %vm247_vm2, %v173_v22  ;;  %5542 = vmatprep.subr.msk.bf16.mxu0 %vm251_vm1, %v6175_v30 }
  0x96   : > { %370 = vmatpush1.bf16.msra.mxu0 %v265_v33  ;;  %5767 = vmatpush3.bf16.msra.mxu1 %v271_v32  ;;  %v626_v34 = vpop.permute.xlu1 %625  ;;  %v624_v35 = vpop.permute.xlu0 %623 }
  0x97   : > { %5768 = vmatprep.mubr.msk.bf16.mxu1 %vm5977_vm3, %v7150_v31  ;;  %5545 = vmatprep.subr.msk.bf16.mxu0 %vm251_vm1, %v6035_v5  ;;  %v640_v48 = vsel %vm639_vm4, %v624_v35, %v626_v34 }
  0x98   : > { %2155 = vrot.lane.b32.xlu1 %v6039_v6, %s5976_s28  ;;  %2153 = vrot.lane.b32.xlu0 %v6029_v3, %s5976_s28  ;;  %v651_v52 = vsel %vm251_vm1, %v640_v48, 0 }
  0x99   : > { %5543 = vmatmul.mubr.msk.bf16.vlgmr.msra.gmra.mxu0 %vm247_vm2, %v173_v22  ;;  %5547 = vmatprep.subr.msk.bf16.mxu1 %vm251_vm1, %v6039_v6 }
  0x9a   : > { %v630_v37 = vpop.permute.xlu1 %629  ;;  %v628_v38 = vpop.permute.xlu0 %627  ;;  %475 = vmatpush1.bf16.msra.mxu0 %v440_v36  ;;  %492 = vmatprep.mubr.bf16.mxu0 %v7153_v0 }
  0x9b   : > { %5549 = vmatprep.subr.msk.bf16.mxu0 %vm251_vm1, %v6046_v8  ;;  %v6224_v44 = vsel %vm639_vm4, %v626_v34, %v628_v38  ;;  %v6249_v53 = vsel %vm639_vm4, %v628_v38, %v630_v37  ;;  %v175_v34 = vld [vmem:[%s7147_s1 + $0xc] sm:$0xf] }
  0x9c   : > { %2159 = vrot.lane.b32.xlu1 %v6046_v8, %s5976_s28  ;;  %2157 = vrot.lane.b32.xlu0 %v6048_v9, %s5976_s28  ;;  %v657_v57 = vsel %vm251_vm1, %v6249_v53, 0 }
  0x9d   : > { %5769 = vmatmul.mubr.msk.bf16.vlgmr.msra.gmra.mxu1 %vm247_vm2, %v173_v22 }
  0x9e   : > { %v634_v40 = vpop.permute.xlu1 %633  ;;  %v632_v41 = vpop.permute.xlu0 %631  ;;  %516 = vmatpush1.bf16.msra.mxu1 %v446_v39  ;;  %533 = vmatprep.mubr.bf16.mxu1 %v7153_v0 }
  0x9f   : > { %5772 = vmatprep.subr.bf16.mxu1 %v7150_v31  ;;  %v6240_v49 = vsel %vm639_vm4, %v630_v37, %v632_v41  ;;  %v6265_v58 = vsel %vm639_vm4, %v632_v41, %v634_v40 }
  0xa0   : > { %2163 = vrot.lane.b32.xlu1 %v6057_v12, %s5976_s28  ;;  %2161 = vrot.lane.b32.xlu0 %v6055_v11, %s5976_s28  ;;  %v663_v62 = vsel %vm251_vm1, %v6265_v58, 0 }
  0xa1   : > { %5546 = vmatmul.mubr.msk.bf16.vlgmr.msra.gmra.mxu0 %vm247_vm2, %v172_v42 }
  0xa2   : > { %v6227_v45 = vpop.permute.xlu1 %637  ;;  %v636_v46 = vpop.permute.xlu0 %635  ;;  %557 = vmatpush1.bf16.msra.mxu0 %v452_v43  ;;  %574 = vmatprep.mubr.bf16.mxu0 %v7153_v0 }
  0xa3   : > { %5552 = vmatprep.subr.msk.bf16.mxu0 %vm251_vm1, %v6224_v44  ;;  %v6256_v54 = vsel %vm639_vm4, %v634_v40, %v636_v46  ;;  %v6281_v63 = vsel %vm639_vm4, %v636_v46, %v6227_v45 }
  0xa4   : > { %2369 = vrot.lane.b32.xlu1 %v6035_v5, %s5978_s4  ;;  %2367 = vrot.lane.b32.xlu0 %v6031_v4, %s5978_s4  ;;  %v669_v10 = vsel %vm251_vm1, %v6281_v63, 0 }
  0xa5   : > { %5548 = vmatmul.mubr.msk.bf16.vlgmr.msra.gmra.mxu1 %vm247_vm2, %v172_v42 }
  0xa6   : > { %v844_v50 = vpop.permute.xlu1 %843  ;;  %v842_v51 = vpop.permute.xlu0 %841  ;;  %5773 = vmatpush3.bf16.msra.mxu1 %v458_v47  ;;  %5774 = vmatprep.mubr.msk.bf16.mxu1 %vm5977_vm3, %v7150_v31 }
  0xa7   : > { %5554 = vmatprep.subr.msk.bf16.mxu1 %vm251_vm1, %v6240_v49  ;;  %v858_v13 = vsel %vm857_vm5, %v842_v51, %v844_v50 }
  0xa8   : > { %2373 = vrot.lane.b32.xlu1 %v6039_v6, %s5978_s4  ;;  %2371 = vrot.lane.b32.xlu0 %v6029_v3, %s5978_s4  ;;  %v869_v18 = vsel %vm251_vm1, %v858_v13, 0 }
  0xa9   : > { %5550 = vmatmul.mubr.msk.bf16.vlgmr.msra.gmra.mxu0 %vm247_vm2, %v172_v42 }
  0xaa   : > { %686 = vmatpush1.bf16.msra.mxu0 %v651_v52  ;;  %v848_v55 = vpop.permute.xlu1 %847  ;;  %v846_v56 = vpop.permute.xlu0 %845  ;;  %703 = vmatprep.mubr.bf16.mxu0 %v7153_v0 }
  0xab   : > { %5556 = vmatprep.subr.msk.bf16.mxu0 %vm251_vm1, %v6256_v54  ;;  %v6288_v1 = vsel %vm857_vm5, %v844_v50, %v846_v56  ;;  %v6313_v19 = vsel %vm857_vm5, %v846_v56, %v848_v55 }
  0xac   : > { %2377 = vrot.lane.b32.xlu1 %v6046_v8, %s5978_s4  ;;  %2375 = vrot.lane.b32.xlu0 %v6048_v9, %s5978_s4  ;;  %v875_v25 = vsel %vm251_vm1, %v6313_v19, 0 }
  0xad   : > { %5775 = vmatmul.mubr.msk.bf16.vlgmr.msra.gmra.mxu1 %vm247_vm2, %v172_v42 }
  0xae   : > { %727 = vmatpush1.bf16.msra.mxu1 %v657_v57  ;;  %v852_v59 = vpop.permute.xlu1 %851  ;;  %v850_v60 = vpop.permute.xlu0 %849  ;;  %744 = vmatprep.mubr.bf16.mxu1 %v7153_v0 }
  0xaf   : > { %5778 = vmatprep.subr.bf16.mxu1 %v7150_v31  ;;  %v6304_v14 = vsel %vm857_vm5, %v848_v55, %v850_v60  ;;  %v6329_v28 = vsel %vm857_vm5, %v850_v60, %v852_v59  ;;  %v176_v60 = vld [vmem:[%s7147_s1 + $0x10] sm:$0xf] }
  0xb0   : > { %2381 = vrot.lane.b32.xlu1 %v6057_v12, %s5978_s4  ;;  %2379 = vrot.lane.b32.xlu0 %v6055_v11, %s5978_s4  ;;  %v881_v35 = vsel %vm251_vm1, %v6329_v28, 0 }
  0xb1   : > { %5553 = vmatmul.mubr.msk.bf16.vlgmr.msra.gmra.mxu0 %vm247_vm2, %v174_v61 }
  0xb2   : > { %768 = vmatpush1.bf16.msra.mxu0 %v663_v62  ;;  %v6291_v2 = vpop.permute.xlu1 %855  ;;  %v854_v7 = vpop.permute.xlu0 %853  ;;  %785 = vmatprep.mubr.bf16.mxu0 %v7153_v0 }
  0xb3   : > { %5559 = vmatprep.subr.msk.bf16.mxu0 %vm251_vm1, %v6288_v1  ;;  %v6320_v20 = vsel %vm857_vm5, %v852_v59, %v854_v7  ;;  %v6345_v36 = vsel %vm857_vm5, %v854_v7, %v6291_v2 }
  0xb4   : > { %2587 = vrot.lane.b32.xlu1 %v6035_v5, %s5979_s7  ;;  %2585 = vrot.lane.b32.xlu0 %v6031_v4, %s5979_s7  ;;  %v887_v40 = vsel %vm251_vm1, %v6345_v36, 0 }
  0xb5   : > { %5555 = vmatmul.mubr.msk.bf16.vlgmr.msra.gmra.mxu1 %vm247_vm2, %v174_v61 }
  0xb6   : > { %5779 = vmatpush3.bf16.msra.mxu1 %v669_v10  ;;  %v1062_v15 = vpop.permute.xlu1 %1061  ;;  %v1060_v16 = vpop.permute.xlu0 %1059  ;;  %5780 = vmatprep.mubr.msk.bf16.mxu1 %vm5977_vm3, %v7150_v31 }
  0xb7   : > { %5561 = vmatprep.subr.msk.bf16.mxu1 %vm251_vm1, %v6304_v14  ;;  %v1076_v41 = vsel %vm1075_vm6, %v1060_v16, %v1062_v15 }
  0xb8   : > { %2591 = vrot.lane.b32.xlu1 %v6039_v6, %s5979_s7  ;;  %2589 = vrot.lane.b32.xlu0 %v6029_v3, %s5979_s7  ;;  %v1087_v47 = vsel %vm251_vm1, %v1076_v41, 0 }
  0xb9   : > { %5557 = vmatmul.mubr.msk.bf16.vlgmr.msra.gmra.mxu0 %vm247_vm2, %v174_v61 }
  0xba   : > { %904 = vmatpush1.bf16.msra.mxu0 %v869_v18  ;;  %v1066_v21 = vpop.permute.xlu1 %1065  ;;  %v1064_v22 = vpop.permute.xlu0 %1063  ;;  %921 = vmatprep.mubr.bf16.mxu0 %v7153_v0 }
  0xbb   : > { %5563 = vmatprep.subr.msk.bf16.mxu0 %vm251_vm1, %v6320_v20  ;;  %v6352_v37 = vsel %vm1075_vm6, %v1062_v15, %v1064_v22  ;;  %v6377_v48 = vsel %vm1075_vm6, %v1064_v22, %v1066_v21 }
  0xbc   : > { %2595 = vrot.lane.b32.xlu1 %v6046_v8, %s5979_s7  ;;  %2593 = vrot.lane.b32.xlu0 %v6048_v9, %s5979_s7  ;;  %v1093_v55 = vsel %vm251_vm1, %v6377_v48, 0 }
  0xbd   : > { %5781 = vmatmul.mubr.msk.bf16.vlgmr.msra.gmra.mxu1 %vm247_vm2, %v174_v61 }
  0xbe   : > { %945 = vmatpush1.bf16.msra.mxu1 %v875_v25  ;;  %v1070_v32 = vpop.permute.xlu1 %1069  ;;  %v1068_v33 = vpop.permute.xlu0 %1067  ;;  %962 = vmatprep.mubr.bf16.mxu1 %v7153_v0 }
  0xbf   : > { %5784 = vmatprep.subr.bf16.mxu1 %v7150_v31  ;;  %v6368_v42 = vsel %vm1075_vm6, %v1066_v21, %v1068_v33  ;;  %v6393_v56 = vsel %vm1075_vm6, %v1068_v33, %v1070_v32 }
  0xc0   : > { %2599 = vrot.lane.b32.xlu1 %v6057_v12, %s5979_s7  ;;  %2597 = vrot.lane.b32.xlu0 %v6055_v11, %s5979_s7  ;;  %7158 = vst [vmem:[#allocation3_spill] sm:$0xff] %v6368_v42  ;;  %v1099_v61 = vsel %vm251_vm1, %v6393_v56, 0 }
  0xc1   : > { %5560 = vmatmul.mubr.msk.bf16.vlgmr.msra.gmra.mxu0 %vm247_vm2, %v175_v34 }
  0xc2   : > { %986 = vmatpush1.bf16.msra.mxu0 %v881_v35  ;;  %v6355_v38 = vpop.permute.xlu1 %1073  ;;  %v1072_v39 = vpop.permute.xlu0 %1071  ;;  %1003 = vmatprep.mubr.bf16.mxu0 %v7153_v0 }
  0xc3   : > { %7157 = vst [vmem:[#allocation2_spill] sm:$0xff] %v6355_v38  ;;  %5566 = vmatprep.subr.msk.bf16.mxu0 %vm251_vm1, %v6352_v37  ;;  %v6384_v50 = vsel %vm1075_vm6, %v1070_v32, %v1072_v39  ;;  %v6409_v62 = vsel %vm1075_vm6, %v1072_v39, %v6355_v38 }
  0xc4   : > { %2805 = vrot.lane.b32.xlu1 %v6035_v5, %s5980_s10  ;;  %2803 = vrot.lane.b32.xlu0 %v6031_v4, %s5980_s10  ;;  %7159 = vst [vmem:[#allocation4_spill] sm:$0xff] %v6384_v50  ;;  %v1105_v15 = vsel %vm251_vm1, %v6409_v62, 0 }
  0xc5   : > { %5562 = vmatmul.mubr.msk.bf16.vlgmr.msra.gmra.mxu1 %vm247_vm2, %v175_v34 }
  0xc6   : > { %5785 = vmatpush3.bf16.msra.mxu1 %v887_v40  ;;  %v1280_v43 = vpop.permute.xlu1 %1279  ;;  %v1278_v46 = vpop.permute.xlu0 %1277  ;;  %5786 = vmatprep.mubr.msk.bf16.mxu1 %vm5977_vm3, %v7150_v31 }
  0xc7   : > { %5568 = vmatprep.subr.msk.bf16.mxu1 %vm251_vm1, %v6368_v42  ;;  %v1294_v16 = vsel %vm1293_vm7, %v1278_v46, %v1280_v43  ;;  %v177_v46 = vld [vmem:[%s7147_s1 + $0x14] sm:$0xf] }
  0xc8   : > { %2809 = vrot.lane.b32.xlu1 %v6039_v6, %s5980_s10  ;;  %2807 = vrot.lane.b32.xlu0 %v6029_v3, %s5980_s10  ;;  %v1305_v25 = vsel %vm251_vm1, %v1294_v16, 0 }
  0xc9   : > { %5564 = vmatmul.mubr.msk.bf16.vlgmr.msra.gmra.mxu0 %vm247_vm2, %v175_v34 }
  0xca   : > { %1122 = vmatpush1.bf16.msra.mxu0 %v1087_v47  ;;  %v1284_v51 = vpop.permute.xlu1 %1283  ;;  %v1282_v52 = vpop.permute.xlu0 %1281  ;;  %1139 = vmatprep.mubr.bf16.mxu0 %v7153_v0 }
  0xcb   : > { %5570 = vmatprep.subr.msk.bf16.mxu0 %vm251_vm1, %v6384_v50  ;;  %v1295_v7 = vsel %vm1293_vm7, %v1280_v43, %v1282_v52  ;;  %v1296_v32 = vsel %vm1293_vm7, %v1282_v52, %v1284_v51  ;;  %v7161_v50 = vmov 0  }
  0xcc   : > { %2813 = vrot.lane.b32.xlu1 %v6046_v8, %s5980_s10  ;;  %2811 = vrot.lane.b32.xlu0 %v6048_v9, %s5980_s10  ;;  %v1311_v39 = vsel %vm251_vm1, %v1296_v32, 0 }
  0xcd   : > { %5787 = vmatmul.mubr.msk.bf16.vlgmr.msra.gmra.mxu1 %vm247_vm2, %v175_v34 }
  0xce   : > { %1163 = vmatpush1.bf16.msra.mxu1 %v1093_v55  ;;  %v1288_v57 = vpop.permute.xlu1 %1287  ;;  %v1286_v59 = vpop.permute.xlu0 %1285  ;;  %1180 = vmatprep.mubr.bf16.mxu1 %v7153_v0 }
  0xcf   : > { %5790 = vmatprep.subr.bf16.mxu1 %v7150_v31  ;;  %v1297_v18 = vsel %vm1293_vm7, %v1284_v51, %v1286_v59  ;;  %v1298_v40 = vsel %vm1293_vm7, %v1286_v59, %v1288_v57 }
  0xd0   : > { %2817 = vrot.lane.b32.xlu1 %v6057_v12, %s5980_s10  ;;  %2815 = vrot.lane.b32.xlu0 %v6055_v11, %s5980_s10  ;;  %v1317_v47 = vsel %vm251_vm1, %v1298_v40, 0 }
  0xd1   : > { %5567 = vmatmul.mubr.msk.bf16.vlgmr.msra.gmra.mxu0 %vm247_vm2, %v176_v60 }
  0xd2   : > { %1204 = vmatpush1.bf16.msra.mxu0 %v1099_v61  ;;  %v1292_v10 = vpop.permute.xlu1 %1291  ;;  %v1290_v13 = vpop.permute.xlu0 %1289  ;;  %1221 = vmatprep.mubr.bf16.mxu0 %v7153_v0 }
  0xd3   : > { %5573 = vmatprep.subr.msk.bf16.mxu0 %vm251_vm1, %v1295_v7  ;;  %v1299_v33 = vsel %vm1293_vm7, %v1288_v57, %v1290_v13  ;;  %v1300_v51 = vsel %vm1293_vm7, %v1290_v13, %v1292_v10  ;;  %vm3255_vm7 = vcmask 490496  }
  0xd4   : > { %3023 = vrot.lane.b32.xlu1 %v6035_v5, %s5981_s15  ;;  %3021 = vrot.lane.b32.xlu0 %v6031_v4, %s5981_s15  ;;  %v1323_v59 = vsel %vm251_vm1, %v1300_v51, 0 }
  0xd5   : > { %5569 = vmatmul.mubr.msk.bf16.vlgmr.msra.gmra.mxu1 %vm247_vm2, %v176_v60 }
  0xd6   : > { %5791 = vmatpush3.bf16.msra.mxu1 %v1105_v15  ;;  %v1498_v21 = vpop.permute.xlu1 %1497  ;;  %v1496_v22 = vpop.permute.xlu0 %1495  ;;  %5792 = vmatprep.mubr.msk.bf16.mxu1 %vm5977_vm3, %v7150_v31 }
  0xd7   : > { %5575 = vmatprep.subr.msk.bf16.mxu1 %vm251_vm1, %v1297_v18 }
  0xd8   : > { %3027 = vrot.lane.b32.xlu1 %v6039_v6, %s5981_s15  ;;  %3025 = vrot.lane.b32.xlu0 %v6029_v3, %s5981_s15 }
  0xd9   : > { %5571 = vmatmul.mubr.msk.bf16.vlgmr.msra.gmra.mxu0 %vm247_vm2, %v176_v60 }
  0xda   : > { %1340 = vmatpush1.bf16.msra.mxu0 %v1305_v25  ;;  %v1502_v34 = vpop.permute.xlu1 %1501  ;;  %v1500_v35 = vpop.permute.xlu0 %1499  ;;  %1357 = vmatprep.mubr.bf16.mxu0 %v7153_v0 }
  0xdb   : > { %5577 = vmatprep.subr.msk.bf16.mxu0 %vm251_vm1, %v1299_v33  ;;  %v1513_v52 = vsel %vm1511_vm8, %v1498_v21, %v1500_v35  ;;  %v1514_v15 = vsel %vm1511_vm8, %v1500_v35, %v1502_v34 }
  0xdc   : > { %3031 = vrot.lane.b32.xlu1 %v6046_v8, %s5981_s15  ;;  %3029 = vrot.lane.b32.xlu0 %v6048_v9, %s5981_s15 }
  0xdd   : > { %5793 = vmatmul.mubr.msk.bf16.vlgmr.msra.gmra.mxu1 %vm247_vm2, %v176_v60  ;;  %v1512_v60 = vsel %vm1511_vm8, %v1496_v22, %v1498_v21  ;;  %v1529_v22 = vsel %vm251_vm1, %v1514_v15, 0 }
  0xde   : > { %1381 = vmatpush1.bf16.msra.mxu1 %v1311_v39  ;;  %v1506_v41 = vpop.permute.xlu1 %1505  ;;  %v1504_v43 = vpop.permute.xlu0 %1503  ;;  %1398 = vmatprep.mubr.bf16.mxu1 %v7153_v0  ;;  %v1523_v13 = vsel %vm251_vm1, %v1512_v60, 0 }
  0xdf   : > { %5796 = vmatprep.subr.bf16.mxu1 %v7150_v31  ;;  %v1515_v61 = vsel %vm1511_vm8, %v1502_v34, %v1504_v43  ;;  %v1516_v25 = vsel %vm1511_vm8, %v1504_v43, %v1506_v41  ;;  %v178_v34 = vld [vmem:[%s7147_s1 + $0x18] sm:$0xf] }
  0xe0   : > { %3035 = vrot.lane.b32.xlu1 %v6057_v12, %s5981_s15  ;;  %3033 = vrot.lane.b32.xlu0 %v6055_v11, %s5981_s15  ;;  %v1535_v35 = vsel %vm251_vm1, %v1516_v25, 0 }
  0xe1   : > { %5574 = vmatmul.mubr.msk.bf16.vlgmr.msra.gmra.mxu0 %vm247_vm2, %v177_v46 }
  0xe2   : > { %1422 = vmatpush1.bf16.msra.mxu0 %v1317_v47  ;;  %v1510_v55 = vpop.permute.xlu1 %1509  ;;  %v1508_v57 = vpop.permute.xlu0 %1507  ;;  %1439 = vmatprep.mubr.bf16.mxu0 %v7153_v0 }
  0xe3   : > { %5580 = vmatprep.subr.msk.bf16.mxu0 %vm251_vm1, %v1513_v52  ;;  %v1517_v16 = vsel %vm1511_vm8, %v1506_v41, %v1508_v57  ;;  %v1518_v39 = vsel %vm1511_vm8, %v1508_v57, %v1510_v55  ;;  %vm3473_vm8 = vcmask 261120  }
  0xe4   : > { %3241 = vrot.lane.b32.xlu1 %v6035_v5, %s5982_s23  ;;  %3239 = vrot.lane.b32.xlu0 %v6031_v4, %s5982_s23 }
  0xe5   : > { %5576 = vmatmul.mubr.msk.bf16.vlgmr.msra.gmra.mxu1 %vm247_vm2, %v177_v46 }
  0xe6   : > { %5797 = vmatpush3.bf16.msra.mxu1 %v1323_v59  ;;  %v1716_v7 = vpop.permute.xlu1 %1715  ;;  %v1714_v10 = vpop.permute.xlu0 %1713  ;;  %5798 = vmatprep.mubr.msk.bf16.mxu1 %vm5977_vm3, %v7150_v31 }
  0xe7   : > { %5582 = vmatprep.subr.msk.bf16.mxu1 %vm251_vm1, %v1515_v61  ;;  %v1730_v47 = vsel %vm1729_vm9, %v1714_v10, %v1716_v7 }
  0xe8   : > { %3245 = vrot.lane.b32.xlu1 %v6039_v6, %s5982_s23  ;;  %3243 = vrot.lane.b32.xlu0 %v6029_v3, %s5982_s23  ;;  %v1741_v57 = vsel %vm251_vm1, %v1730_v47, 0 }
  0xe9   : > { %5578 = vmatmul.mubr.msk.bf16.vlgmr.msra.gmra.mxu0 %vm247_vm2, %v177_v46 }
  0xea   : > { %1558 = vmatpush1.bf16.msra.mxu0 %v1523_v13  ;;  %v1720_v18 = vpop.permute.xlu1 %1719  ;;  %v1718_v21 = vpop.permute.xlu0 %1717  ;;  %1575 = vmatprep.mubr.bf16.mxu0 %v7153_v0 }
  0xeb   : > { %5584 = vmatprep.subr.msk.bf16.mxu0 %vm251_vm1, %v1517_v16  ;;  %v1731_v40 = vsel %vm1729_vm9, %v1716_v7, %v1718_v21  ;;  %v1732_v59 = vsel %vm1729_vm9, %v1718_v21, %v1720_v18 }
  0xec   : > { %3249 = vrot.lane.b32.xlu1 %v6046_v8, %s5982_s23  ;;  %3247 = vrot.lane.b32.xlu0 %v6048_v9, %s5982_s23  ;;  %v1747_v10 = vsel %vm251_vm1, %v1732_v59, 0 }
  0xed   : > { %5799 = vmatmul.mubr.msk.bf16.vlgmr.msra.gmra.mxu1 %vm247_vm2, %v177_v46  ;;  %v1541_v46 = vsel %vm251_vm1, %v1518_v39, 0 }
  0xee   : > { %1599 = vmatpush1.bf16.msra.mxu1 %v1529_v22  ;;  %v1724_v32 = vpop.permute.xlu1 %1723  ;;  %v1722_v33 = vpop.permute.xlu0 %1721  ;;  %1616 = vmatprep.mubr.bf16.mxu1 %v7153_v0 }
  0xef   : > { %5802 = vmatprep.subr.bf16.mxu1 %v7150_v31  ;;  %v1733_v51 = vsel %vm1729_vm9, %v1720_v18, %v1722_v33  ;;  %v1734_v13 = vsel %vm1729_vm9, %v1722_v33, %v1724_v32  ;;  %v179_v18 = vld [vmem:[%s7147_s1 + $0x1c] sm:$0xf] }
  0xf0   : > { %3253 = vrot.lane.b32.xlu1 %v6057_v12, %s5982_s23  ;;  %3251 = vrot.lane.b32.xlu0 %v6055_v11, %s5982_s23  ;;  %v1753_v21 = vsel %vm251_vm1, %v1734_v13, 0 }
  0xf1   : > { %5581 = vmatmul.mubr.msk.bf16.vlgmr.msra.gmra.mxu0 %vm247_vm2, %v178_v34 }
  0xf2   : > { %1640 = vmatpush1.bf16.msra.mxu0 %v1535_v35  ;;  %v1728_v41 = vpop.permute.xlu1 %1727  ;;  %v1726_v43 = vpop.permute.xlu0 %1725  ;;  %1657 = vmatprep.mubr.bf16.mxu0 %v7153_v0 }
  0xf3   : > { %5587 = vmatprep.subr.msk.bf16.mxu0 %vm251_vm1, %v1731_v40  ;;  %v1735_v60 = vsel %vm1729_vm9, %v1724_v32, %v1726_v43  ;;  %v1736_v22 = vsel %vm1729_vm9, %v1726_v43, %v1728_v41  ;;  %vm3691_vm9 = vcmask 252928  }
  0xf4   : > { %3459 = vrot.lane.b32.xlu1 %v6035_v5, %s5983_s26  ;;  %3457 = vrot.lane.b32.xlu0 %v6031_v4, %s5983_s26 }
  0xf5   : > { %5583 = vmatmul.mubr.msk.bf16.vlgmr.msra.gmra.mxu1 %vm247_vm2, %v178_v34 }
  0xf6   : > { %5803 = vmatpush3.bf16.msra.mxu1 %v1541_v46  ;;  %v1934_v52 = vpop.permute.xlu1 %1933  ;;  %v1932_v55 = vpop.permute.xlu0 %1931  ;;  %5804 = vmatprep.mubr.msk.bf16.mxu1 %vm5977_vm3, %v7150_v31 }
  0xf7   : > { %5589 = vmatprep.subr.msk.bf16.mxu1 %vm251_vm1, %v1733_v51  ;;  %v1948_v35 = vsel %vm1947_vm10, %v1932_v55, %v1934_v52 }
  0xf8   : > { %3463 = vrot.lane.b32.xlu1 %v6039_v6, %s5983_s26  ;;  %3461 = vrot.lane.b32.xlu0 %v6029_v3, %s5983_s26  ;;  %v1959_v43 = vsel %vm251_vm1, %v1948_v35, 0 }
  0xf9   : > { %5585 = vmatmul.mubr.msk.bf16.vlgmr.msra.gmra.mxu0 %vm247_vm2, %v178_v34 }
  0xfa   : > { %1776 = vmatpush1.bf16.msra.mxu0 %v1741_v57  ;;  %v1938_v61 = vpop.permute.xlu1 %1937  ;;  %v1936_v7 = vpop.permute.xlu0 %1935  ;;  %1793 = vmatprep.mubr.bf16.mxu0 %v7153_v0 }
  0xfb   : > { %5591 = vmatprep.subr.msk.bf16.mxu0 %vm251_vm1, %v1735_v60  ;;  %v1949_v25 = vsel %vm1947_vm10, %v1934_v52, %v1936_v7  ;;  %v1950_v46 = vsel %vm1947_vm10, %v1936_v7, %v1938_v61 }
  0xfc   : > { %3467 = vrot.lane.b32.xlu1 %v6046_v8, %s5983_s26  ;;  %3465 = vrot.lane.b32.xlu0 %v6048_v9, %s5983_s26  ;;  %v1965_v55 = vsel %vm251_vm1, %v1950_v46, 0 }
  0xfd   : > { %5805 = vmatmul.mubr.msk.bf16.vlgmr.msra.gmra.mxu1 %vm247_vm2, %v178_v34  ;;  %v1759_v34 = vsel %vm251_vm1, %v1736_v22, 0 }
  0xfe   : > { %1817 = vmatpush1.bf16.msra.mxu1 %v1747_v10  ;;  %v1942_v15 = vpop.permute.xlu1 %1941  ;;  %v1940_v16 = vpop.permute.xlu0 %1939  ;;  %1834 = vmatprep.mubr.bf16.mxu1 %v7153_v0 }
  0xff   : > { %5808 = vmatprep.subr.bf16.mxu1 %v7150_v31  ;;  %v1951_v39 = vsel %vm1947_vm10, %v1938_v61, %v1940_v16  ;;  %v1952_v57 = vsel %vm1947_vm10, %v1940_v16, %v1942_v15  ;;  %v180_v61 = vld [vmem:[%s7147_s1 + $0x20] sm:$0xf] }
 0x100   : > { %3471 = vrot.lane.b32.xlu1 %v6057_v12, %s5983_s26  ;;  %3469 = vrot.lane.b32.xlu0 %v6055_v11, %s5983_s26  ;;  %v1971_v7 = vsel %vm251_vm1, %v1952_v57, 0 }
 0x101   : > { %5588 = vmatmul.mubr.msk.bf16.vlgmr.msra.gmra.mxu0 %vm247_vm2, %v179_v18 }
 0x102   : > { %1858 = vmatpush1.bf16.msra.mxu0 %v1753_v21  ;;  %v1946_v32 = vpop.permute.xlu1 %1945  ;;  %v1944_v33 = vpop.permute.xlu0 %1943  ;;  %1875 = vmatprep.mubr.bf16.mxu0 %v7153_v0 }
 0x103   : > { %5594 = vmatprep.subr.msk.bf16.mxu0 %vm251_vm1, %v1949_v25  ;;  %v1953_v47 = vsel %vm1947_vm10, %v1942_v15, %v1944_v33  ;;  %v1954_v10 = vsel %vm1947_vm10, %v1944_v33, %v1946_v32  ;;  %vm3909_vm10 = vcmask 244736  }
 0x104   : > { %3677 = vrot.lane.b32.xlu1 %v6035_v5, %s5984_s29  ;;  %3675 = vrot.lane.b32.xlu0 %v6031_v4, %s5984_s29 }
 0x105   : > { %5590 = vmatmul.mubr.msk.bf16.vlgmr.msra.gmra.mxu1 %vm247_vm2, %v179_v18 }
 0x106   : > { %5809 = vmatpush3.bf16.msra.mxu1 %v1759_v34  ;;  %v2152_v40 = vpop.permute.xlu1 %2151  ;;  %v2150_v41 = vpop.permute.xlu0 %2149  ;;  %5810 = vmatprep.mubr.msk.bf16.mxu1 %vm5977_vm3, %v7150_v31 }
 0x107   : > { %5596 = vmatprep.subr.msk.bf16.mxu1 %vm251_vm1, %v1951_v39  ;;  %v2166_v21 = vsel %vm2165_vm11, %v2150_v41, %v2152_v40 }
 0x108   : > { %3681 = vrot.lane.b32.xlu1 %v6039_v6, %s5984_s29  ;;  %3679 = vrot.lane.b32.xlu0 %v6029_v3, %s5984_s29  ;;  %v2177_v33 = vsel %vm251_vm1, %v2166_v21, 0 }
 0x109   : > { %5592 = vmatmul.mubr.msk.bf16.vlgmr.msra.gmra.mxu0 %vm247_vm2, %v179_v18 }
 0x10a   : > { %1994 = vmatpush1.bf16.msra.mxu0 %v1959_v43  ;;  %v2156_v51 = vpop.permute.xlu1 %2155  ;;  %v2154_v52 = vpop.permute.xlu0 %2153  ;;  %2011 = vmatprep.mubr.bf16.mxu0 %v7153_v0 }
 0x10b   : > { %5598 = vmatprep.subr.msk.bf16.mxu0 %vm251_vm1, %v1953_v47  ;;  %v2167_v13 = vsel %vm2165_vm11, %v2152_v40, %v2154_v52  ;;  %v2168_v34 = vsel %vm2165_vm11, %v2154_v52, %v2156_v51 }
 0x10c   : > { %3685 = vrot.lane.b32.xlu1 %v6046_v8, %s5984_s29  ;;  %3683 = vrot.lane.b32.xlu0 %v6048_v9, %s5984_s29  ;;  %v2183_v41 = vsel %vm251_vm1, %v2168_v34, 0 }
 0x10d   : > { %5811 = vmatmul.mubr.msk.bf16.vlgmr.msra.gmra.mxu1 %vm247_vm2, %v179_v18  ;;  %v1977_v18 = vsel %vm251_vm1, %v1954_v10, 0 }
 0x10e   : > { %2035 = vmatpush1.bf16.msra.mxu1 %v1965_v55  ;;  %v2160_v59 = vpop.permute.xlu1 %2159  ;;  %v2158_v60 = vpop.permute.xlu0 %2157  ;;  %2052 = vmatprep.mubr.bf16.mxu1 %v7153_v0 }
 0x10f   : > { %5814 = vmatprep.subr.bf16.mxu1 %v7150_v31  ;;  %v2169_v22 = vsel %vm2165_vm11, %v2156_v51, %v2158_v60  ;;  %v2170_v43 = vsel %vm2165_vm11, %v2158_v60, %v2160_v59  ;;  %v181_v51 = vld [vmem:[%s7147_s1 + $0x24] sm:$0xf] }
 0x110   : > { %3689 = vrot.lane.b32.xlu1 %v6057_v12, %s5984_s29  ;;  %3687 = vrot.lane.b32.xlu0 %v6055_v11, %s5984_s29  ;;  %v2189_v52 = vsel %vm251_vm1, %v2170_v43, 0 }
 0x111   : > { %5595 = vmatmul.mubr.msk.bf16.vlgmr.msra.gmra.mxu0 %vm247_vm2, %v180_v61 }
 0x112   : > { %2076 = vmatpush1.bf16.msra.mxu0 %v1971_v7  ;;  %v2164_v15 = vpop.permute.xlu1 %2163  ;;  %v2162_v16 = vpop.permute.xlu0 %2161  ;;  %2093 = vmatprep.mubr.bf16.mxu0 %v7153_v0 }
 0x113   : > { %5601 = vmatprep.subr.msk.bf16.mxu0 %vm251_vm1, %v2167_v13  ;;  %v2171_v35 = vsel %vm2165_vm11, %v2160_v59, %v2162_v16  ;;  %v2172_v55 = vsel %vm2165_vm11, %v2162_v16, %v2164_v15  ;;  %vm4127_vm11 = vcmask 236544  }
 0x114   : > { %3895 = vrot.lane.b32.xlu1 %v6035_v5, %s5985_s5  ;;  %3893 = vrot.lane.b32.xlu0 %v6031_v4, %s5985_s5 }
 0x115   : > { %5597 = vmatmul.mubr.msk.bf16.vlgmr.msra.gmra.mxu1 %vm247_vm2, %v180_v61 }
 0x116   : > { %5815 = vmatpush3.bf16.msra.mxu1 %v1977_v18  ;;  %v2370_v25 = vpop.permute.xlu1 %2369  ;;  %v2368_v32 = vpop.permute.xlu0 %2367  ;;  %5816 = vmatprep.mubr.msk.bf16.mxu1 %vm5977_vm3, %v7150_v31 }
 0x117   : > { %5603 = vmatprep.subr.msk.bf16.mxu1 %vm251_vm1, %v2169_v22  ;;  %v2384_v7 = vsel %vm2383_vm12, %v2368_v32, %v2370_v25 }
 0x118   : > { %3899 = vrot.lane.b32.xlu1 %v6039_v6, %s5985_s5  ;;  %3897 = vrot.lane.b32.xlu0 %v6029_v3, %s5985_s5  ;;  %v2395_v16 = vsel %vm251_vm1, %v2384_v7, 0 }
 0x119   : > { %5599 = vmatmul.mubr.msk.bf16.vlgmr.msra.gmra.mxu0 %vm247_vm2, %v180_v61 }
 0x11a   : > { %2212 = vmatpush1.bf16.msra.mxu0 %v2177_v33  ;;  %v2374_v39 = vpop.permute.xlu1 %2373  ;;  %v2372_v40 = vpop.permute.xlu0 %2371  ;;  %2229 = vmatprep.mubr.bf16.mxu0 %v7153_v0 }
 0x11b   : > { %5605 = vmatprep.subr.msk.bf16.mxu0 %vm251_vm1, %v2171_v35  ;;  %v2385_v57 = vsel %vm2383_vm12, %v2370_v25, %v2372_v40  ;;  %v2386_v18 = vsel %vm2383_vm12, %v2372_v40, %v2374_v39 }
 0x11c   : > { %3903 = vrot.lane.b32.xlu1 %v6046_v8, %s5985_s5  ;;  %3901 = vrot.lane.b32.xlu0 %v6048_v9, %s5985_s5  ;;  %v2401_v32 = vsel %vm251_vm1, %v2386_v18, 0 }
 0x11d   : > { %5817 = vmatmul.mubr.msk.bf16.vlgmr.msra.gmra.mxu1 %vm247_vm2, %v180_v61  ;;  %v2195_v61 = vsel %vm251_vm1, %v2172_v55, 0 }
 0x11e   : > { %2253 = vmatpush1.bf16.msra.mxu1 %v2183_v41  ;;  %v2378_v46 = vpop.permute.xlu1 %2377  ;;  %v2376_v47 = vpop.permute.xlu0 %2375  ;;  %2270 = vmatprep.mubr.bf16.mxu1 %v7153_v0 }
 0x11f   : > { %5820 = vmatprep.subr.bf16.mxu1 %v7150_v31  ;;  %v2387_v10 = vsel %vm2383_vm12, %v2374_v39, %v2376_v47  ;;  %v2388_v33 = vsel %vm2383_vm12, %v2376_v47, %v2378_v46  ;;  %v182_v39 = vld [vmem:[%s7147_s1 + $0x28] sm:$0xf] }
 0x120   : > { %3907 = vrot.lane.b32.xlu1 %v6057_v12, %s5985_s5  ;;  %3905 = vrot.lane.b32.xlu0 %v6055_v11, %s5985_s5  ;;  %v2407_v40 = vsel %vm251_vm1, %v2388_v33, 0  ;;  %v5957_v33 = vld [vmem:[%s6022_s17 + $0x20] ss:$0 sps:$4 sm:$0xff]  }
 0x121   : > { %5602 = vmatmul.mubr.msk.bf16.vlgmr.msra.gmra.mxu0 %vm247_vm2, %v181_v51 }
 0x122   : > { %2294 = vmatpush1.bf16.msra.mxu0 %v2189_v52  ;;  %v2382_v59 = vpop.permute.xlu1 %2381  ;;  %v2380_v60 = vpop.permute.xlu0 %2379  ;;  %2311 = vmatprep.mubr.bf16.mxu0 %v7153_v0 }
 0x123   : > { %5608 = vmatprep.subr.msk.bf16.mxu0 %vm251_vm1, %v2385_v57  ;;  %v2389_v21 = vsel %vm2383_vm12, %v2378_v46, %v2380_v60  ;;  %v2390_v41 = vsel %vm2383_vm12, %v2380_v60, %v2382_v59  ;;  %vm4345_vm12 = vcmask 228352  }
 0x124   : > { %4113 = vrot.lane.b32.xlu1 %v6035_v5, %s5986_s8  ;;  %4111 = vrot.lane.b32.xlu0 %v6031_v4, %s5986_s8 }
 0x125   : > { %5604 = vmatmul.mubr.msk.bf16.vlgmr.msra.gmra.mxu1 %vm247_vm2, %v181_v51 }
 0x126   : > { %5821 = vmatpush3.bf16.msra.mxu1 %v2195_v61  ;;  %v2588_v13 = vpop.permute.xlu1 %2587  ;;  %v2586_v15 = vpop.permute.xlu0 %2585  ;;  %5822 = vmatprep.mubr.msk.bf16.mxu1 %vm5977_vm3, %v7150_v31 }
 0x127   : > { %5610 = vmatprep.subr.msk.bf16.mxu1 %vm251_vm1, %v2387_v10  ;;  %v2602_v52 = vsel %vm2601_vm13, %v2586_v15, %v2588_v13 }
 0x128   : > { %4117 = vrot.lane.b32.xlu1 %v6039_v6, %s5986_s8  ;;  %4115 = vrot.lane.b32.xlu0 %v6029_v3, %s5986_s8  ;;  %v2613_v60 = vsel %vm251_vm1, %v2602_v52, 0 }
 0x129   : > { %5606 = vmatmul.mubr.msk.bf16.vlgmr.msra.gmra.mxu0 %vm247_vm2, %v181_v51 }
 0x12a   : > { %2430 = vmatpush1.bf16.msra.mxu0 %v2395_v16  ;;  %v2592_v22 = vpop.permute.xlu1 %2591  ;;  %v2590_v25 = vpop.permute.xlu0 %2589  ;;  %2447 = vmatprep.mubr.bf16.mxu0 %v7153_v0 }
 0x12b   : > { %5612 = vmatprep.subr.msk.bf16.mxu0 %vm251_vm1, %v2389_v21  ;;  %v2603_v43 = vsel %vm2601_vm13, %v2588_v13, %v2590_v25  ;;  %v2604_v61 = vsel %vm2601_vm13, %v2590_v25, %v2592_v22  ;;  %v183_v21 = vld [vmem:[%s7147_s1 + $0x2c] sm:$0xf] }
 0x12c   : > { %4121 = vrot.lane.b32.xlu1 %v6046_v8, %s5986_s8  ;;  %4119 = vrot.lane.b32.xlu0 %v6048_v9, %s5986_s8  ;;  %v2619_v13 = vsel %vm251_vm1, %v2604_v61, 0 }
 0x12d   : > { %5823 = vmatmul.mubr.msk.bf16.vlgmr.msra.gmra.mxu1 %vm247_vm2, %v181_v51  ;;  %v2413_v51 = vsel %vm251_vm1, %v2390_v41, 0 }
 0x12e   : > { %2471 = vmatpush1.bf16.msra.mxu1 %v2401_v32  ;;  %v2596_v34 = vpop.permute.xlu1 %2595  ;;  %v2594_v35 = vpop.permute.xlu0 %2593  ;;  %2488 = vmatprep.mubr.bf16.mxu1 %v7153_v0 }
 0x12f   : > { %5826 = vmatprep.subr.bf16.mxu1 %v7150_v31  ;;  %v2605_v55 = vsel %vm2601_vm13, %v2592_v22, %v2594_v35  ;;  %v2606_v15 = vsel %vm2601_vm13, %v2594_v35, %v2596_v34 }
 0x130   : > { %4125 = vrot.lane.b32.xlu1 %v6057_v12, %s5986_s8  ;;  %4123 = vrot.lane.b32.xlu0 %v6055_v11, %s5986_s8  ;;  %v2625_v22 = vsel %vm251_vm1, %v2606_v15, 0 }
 0x131   : > { %5609 = vmatmul.mubr.msk.bf16.vlgmr.msra.gmra.mxu0 %vm247_vm2, %v182_v39 }
 0x132   : > { %2512 = vmatpush1.bf16.msra.mxu0 %v2407_v40  ;;  %v2600_v46 = vpop.permute.xlu1 %2599  ;;  %v2598_v47 = vpop.permute.xlu0 %2597  ;;  %2529 = vmatprep.mubr.bf16.mxu0 %v7153_v0 }
 0x133   : > { %5615 = vmatprep.subr.msk.bf16.mxu0 %vm251_vm1, %v2603_v43  ;;  %v2607_v7 = vsel %vm2601_vm13, %v2596_v34, %v2598_v47  ;;  %v2608_v25 = vsel %vm2601_vm13, %v2598_v47, %v2600_v46 }
 0x134   : > { %4331 = vrot.lane.b32.xlu1 %v6035_v5, %s5987_s11  ;;  %4329 = vrot.lane.b32.xlu0 %v6031_v4, %s5987_s11 }
 0x135   : > { %5611 = vmatmul.mubr.msk.bf16.vlgmr.msra.gmra.mxu1 %vm247_vm2, %v182_v39 }
 0x136   : > { %5827 = vmatpush3.bf16.msra.mxu1 %v2413_v51  ;;  %v2806_v57 = vpop.permute.xlu1 %2805  ;;  %v2804_v59 = vpop.permute.xlu0 %2803  ;;  %5828 = vmatprep.mubr.msk.bf16.mxu1 %vm5977_vm3, %v7150_v31 }
 0x137   : > { %5617 = vmatprep.subr.msk.bf16.mxu1 %vm251_vm1, %v2605_v55  ;;  %v2820_v40 = vsel %vm2819_vm14, %v2804_v59, %v2806_v57 }
 0x138   : > { %4335 = vrot.lane.b32.xlu1 %v6039_v6, %s5987_s11  ;;  %4333 = vrot.lane.b32.xlu0 %v6029_v3, %s5987_s11  ;;  %v2831_v47 = vsel %vm251_vm1, %v2820_v40, 0 }
 0x139   : > { %5613 = vmatmul.mubr.msk.bf16.vlgmr.msra.gmra.mxu0 %vm247_vm2, %v182_v39 }
 0x13a   : > { %2648 = vmatpush1.bf16.msra.mxu0 %v2613_v60  ;;  %v2810_v4 = vpop.permute.xlu1 %2809  ;;  %v2808_v10 = vpop.permute.xlu0 %2807  ;;  %2665 = vmatprep.mubr.bf16.mxu0 %v7153_v0 }
 0x13b   : > { %5619 = vmatprep.subr.msk.bf16.mxu0 %vm251_vm1, %v2607_v7  ;;  %v2821_v32 = vsel %vm2819_vm14, %v2806_v57, %v2808_v10  ;;  %v2822_v51 = vsel %vm2819_vm14, %v2808_v10, %v2810_v4 }
 0x13c   : > { %4339 = vrot.lane.b32.xlu1 %v6046_v8, %s5987_s11  ;;  %4337 = vrot.lane.b32.xlu0 %v6048_v9, %s5987_s11  ;;  %v2837_v59 = vsel %vm251_vm1, %v2822_v51, 0 }
 0x13d   : > { %5829 = vmatmul.mubr.msk.bf16.vlgmr.msra.gmra.mxu1 %vm247_vm2, %v182_v39  ;;  %v2631_v39 = vsel %vm251_vm1, %v2608_v25, 0 }
 0x13e   : > { %2689 = vmatpush1.bf16.msra.mxu1 %v2619_v13  ;;  %v2814_v16 = vpop.permute.xlu1 %2813  ;;  %v2812_v18 = vpop.permute.xlu0 %2811  ;;  %2706 = vmatprep.mubr.bf16.mxu1 %v7153_v0 }
 0x13f   : > { %5832 = vmatprep.subr.bf16.mxu1 %v7150_v31  ;;  %v2823_v41 = vsel %vm2819_vm14, %v2810_v4, %v2812_v18  ;;  %v2824_v60 = vsel %vm2819_vm14, %v2812_v18, %v2814_v16  ;;  %v184_v4 = vld [vmem:[%s7147_s1 + $0x30] sm:$0xf] }
 0x140   : > { %4343 = vrot.lane.b32.xlu1 %v6057_v12, %s5987_s11  ;;  %4341 = vrot.lane.b32.xlu0 %v6055_v11, %s5987_s11  ;;  %v2843_v10 = vsel %vm251_vm1, %v2824_v60, 0 }
 0x141   : > { %5616 = vmatmul.mubr.msk.bf16.vlgmr.msra.gmra.mxu0 %vm247_vm2, %v183_v21 }
 0x142   : > { %2730 = vmatpush1.bf16.msra.mxu0 %v2625_v22  ;;  %v2818_v34 = vpop.permute.xlu1 %2817  ;;  %v2816_v35 = vpop.permute.xlu0 %2815  ;;  %2747 = vmatprep.mubr.bf16.mxu0 %v7153_v0 }
 0x143   : > { %5622 = vmatprep.subr.msk.bf16.mxu0 %vm251_vm1, %v2821_v32  ;;  %v2825_v52 = vsel %vm2819_vm14, %v2814_v16, %v2816_v35  ;;  %v2826_v13 = vsel %vm2819_vm14, %v2816_v35, %v2818_v34 }
 0x144   : > { %4905 = vrot.lane.b32.xlu1 %v5957_v33, %s5968_s19  ;;  %4726 = vrot.lane.b32.xlu0 %v5957_v33, %s5967_s18  ;;  %v2849_v22 = vsel %vm251_vm1, %v2826_v13, 0 }
 0x145   : > { %5618 = vmatmul.mubr.msk.bf16.vlgmr.msra.gmra.mxu1 %vm247_vm2, %v183_v21 }
 0x146   : > { %5833 = vmatpush3.bf16.msra.mxu1 %v2631_v39  ;;  %v3024_v43 = vpop.permute.xlu1 %3023  ;;  %v3022_v46 = vpop.permute.xlu0 %3021  ;;  %5834 = vmatprep.mubr.msk.bf16.mxu1 %vm5977_vm3, %v7150_v31 }
 0x147   : > { %5624 = vmatprep.subr.msk.bf16.mxu1 %vm251_vm1, %v2823_v41  ;;  %v3038_v32 = vsel %vm3037_vm15, %v3022_v46, %v3024_v43 }
 0x148   : > { %5263 = vrot.lane.b32.xlu1 %v5957_v33, %s5970_s21  ;;  %5084 = vrot.lane.b32.xlu0 %v5957_v33, %s5969_s20  ;;  %v3049_v41 = vsel %vm251_vm1, %v3038_v32, 0  ;;  %s5917_s20 = smul.u32 56, %s7166_s13 }
 0x149   : > { %5620 = vmatmul.mubr.msk.bf16.vlgmr.msra.gmra.mxu0 %vm247_vm2, %v183_v21 }
 0x14a   : > { %2866 = vmatpush1.bf16.msra.mxu0 %v2831_v47  ;;  %v3028_v55 = vpop.permute.xlu1 %3027  ;;  %v3026_v57 = vpop.permute.xlu0 %3025  ;;  %2883 = vmatprep.mubr.bf16.mxu0 %v7153_v0  ;;  %s7132_s16 = scalar_lea.vmem %s7149_s3, %s5917_s20 }
 0x14b   : > { %5626 = vmatprep.subr.msk.bf16.mxu0 %vm251_vm1, %v2825_v52  ;;  %v3039_v15 = vsel %vm3037_vm15, %v3024_v43, %v3026_v57  ;;  %v3040_v43 = vsel %vm3037_vm15, %v3026_v57, %v3028_v55 }
 0x14c   : > { %v3055_v13 = vsel %vm251_vm1, %v3040_v43, 0 }
 0x14d   : > { %5835 = vmatmul.mubr.msk.bf16.vlgmr.msra.gmra.mxu1 %vm247_vm2, %v183_v21 }
 0x14e   : > { %2907 = vmatpush1.bf16.msra.mxu1 %v2837_v59  ;;  %v3032_v61 = vpop.permute.xlu1 %3031  ;;  %v3030_v7 = vpop.permute.xlu0 %3029  ;;  %2924 = vmatprep.mubr.bf16.mxu1 %v7153_v0 }
 0x14f   : > { %5838 = vmatprep.subr.bf16.mxu1 %v7150_v31  ;;  %v3041_v33 = vsel %vm3037_vm15, %v3028_v55, %v3030_v7  ;;  %v3042_v32 = vsel %vm3037_vm15, %v3030_v7, %v3032_v61 }
 0x151   : > { %v307_v16 = vpop.f32.mrf.mxu0  ;;  %5623 = vmatmul.mubr.msk.bf16.vlgmr.msra.gmra.mxu0 %vm247_vm2, %v184_v4 }
 0x152   : > { %2948 = vmatpush1.bf16.msra.mxu0 %v2843_v10  ;;  %v3036_v18 = vpop.permute.xlu1 %3035  ;;  %v3034_v21 = vpop.permute.xlu0 %3033  ;;  %2965 = vmatprep.mubr.bf16.mxu0 %v7153_v0 }
 0x153   : > { %v309_v25 = vpop.f32.mrf.mxu0  ;;  %5629 = vmatprep.subr.msk.bf16.mxu0 %vm251_vm1, %v3039_v15  ;;  %v3043_v46 = vsel %vm3037_vm15, %v3032_v61, %v3034_v21  ;;  %v3044_v61 = vsel %vm3037_vm15, %v3034_v21, %v3036_v18 }
 0x155   : > { %v311_v34 = vpop.f32.mrf.mxu0  ;;  %v348_v35 = vpop.f32.mrf.mxu1  ;;  %5625 = vmatmul.mubr.msk.bf16.vlgmr.msra.gmra.mxu1 %vm247_vm2, %v184_v4 }
 0x156   : > { %5839 = vmatpush3.bf16.msra.mxu1 %v2849_v22  ;;  %v3242_v39 = vpop.permute.xlu1 %3241  ;;  %v3240_v40 = vpop.permute.xlu0 %3239  ;;  %5840 = vmatprep.mubr.msk.bf16.mxu1 %vm5977_vm3, %v7150_v31 }
 0x157   : > { %v312_v47 = vpop.f32.mrf.mxu0  ;;  %v350_v51 = vpop.f32.mrf.mxu1  ;;  %5631 = vmatprep.subr.msk.bf16.mxu1 %vm251_vm1, %v3041_v33  ;;  %v3256_v18 = vsel %vm3255_vm7, %v3240_v40, %v3242_v39 }
 0x158   : > { %v3061_v47 = vsel %vm251_vm1, %v3042_v32, 0  ;;  %v3067_v32 = vsel %vm251_vm1, %v3044_v61, 0  ;;  %v3267_v61 = vsel %vm251_vm1, %v3256_v18, 0 }
 0x159   : > { %v352_v52 = vpop.f32.mrf.mxu1  ;;  %v389_v59 = vpop.f32.mrf.mxu0  ;;  %5627 = vmatmul.mubr.msk.bf16.vlgmr.msra.gmra.mxu0 %vm247_vm2, %v184_v4 }
 0x15a   : > { %3084 = vmatpush1.bf16.msra.mxu0 %v3049_v41  ;;  %v3246_v60 = vpop.permute.xlu1 %3245  ;;  %v3244_v10 = vpop.permute.xlu0 %3243  ;;  %3101 = vmatprep.mubr.bf16.mxu0 %v7153_v0  ;;  %v185_v41 = vld [vmem:[%s7147_s1 + $0x34] sm:$0xf] }
 0x15b   : > { %v353_v15 = vpop.f32.mrf.mxu1  ;;  %v391_v22 = vpop.f32.mrf.mxu0  ;;  %5633 = vmatprep.subr.msk.bf16.mxu0 %vm251_vm1, %v3043_v46  ;;  %v3257_v7 = vsel %vm3255_vm7, %v3242_v39, %v3244_v10  ;;  %v3258_v39 = vsel %vm3255_vm7, %v3244_v10, %v3246_v60 }
 0x15c   : > { %v3273_v18 = vsel %vm251_vm1, %v3258_v39, 0  ;;  %v186_v39 = vld [vmem:[%s7147_s1 + $0x38] sm:$0xf] }
 0x15d   : > { %v393_v55 = vpop.f32.mrf.mxu0  ;;  %v430_v57 = vpop.f32.mrf.mxu1  ;;  %5841 = vmatmul.mubr.msk.bf16.vlgmr.msra.gmra.mxu1 %vm247_vm2, %v184_v4 }
 0x15e   : > { %3125 = vmatpush1.bf16.msra.mxu1 %v3055_v13  ;;  %v3250_v33 = vpop.permute.xlu1 %3249  ;;  %v3248_v34 = vpop.permute.xlu0 %3247  ;;  %3142 = vmatprep.mubr.bf16.mxu1 %v7153_v0 }
 0x15f   : > { %v394_v43 = vpop.f32.mrf.mxu0  ;;  %v5770_v46 = vpop.f32.mrf.mxu1  ;;  %5844 = vmatprep.subr.bf16.mxu1 %v7150_v31  ;;  %v3259_v21 = vsel %vm3255_vm7, %v3246_v60, %v3248_v34  ;;  %v3260_v60 = vsel %vm3255_vm7, %v3248_v34, %v3250_v33 }
 0x161   : > { %v433_v4 = vpop.f32.mrf.mxu1  ;;  %v494_v52 = vpop.f32.mrf.mxu0  ;;  %5630 = vmatmul.mubr.msk.bf16.vlgmr.msra.gmra.mxu0 %vm247_vm2, %v185_v41 }
 0x162   : > { %v495_v13 = vadd.f32 %v494_v52, %v307_v16  ;;  %3166 = vmatpush1.bf16.msra.mxu0 %v3061_v47  ;;  %v3254_v15 = vpop.permute.xlu1 %3253  ;;  %v3252_v55 = vpop.permute.xlu0 %3251  ;;  %3183 = vmatprep.mubr.bf16.mxu0 %v7153_v0  ;;  %v7160_v0 = vmov 0.0  }
 0x163   : > { %v5771_v43 = vpop.f32.mrf.mxu1  ;;  %v496_v46 = vpop.f32.mrf.mxu0  ;;  %5636 = vmatprep.subr.msk.bf16.mxu0 %vm251_vm1, %v3257_v7 }
 0x164   : > { %v497_v4 = vadd.f32 %v496_v46, %v309_v25 }
 0x165   : > { %v498_v31 = vpop.f32.mrf.mxu0  ;;  %v535_v38 = vpop.f32.mrf.mxu1  ;;  %5632 = vmatmul.mubr.msk.bf16.vlgmr.msra.gmra.mxu1 %vm247_vm2, %v185_v41 }
 0x166   : > { %v536_v16 = vadd.f32 %v535_v38, %v348_v35  ;;  %5845 = vmatpush3.bf16.msra.mxu1 %v3067_v32  ;;  %v3460_v47 = vpop.permute.xlu1 %3459  ;;  %v3458_v52 = vpop.permute.xlu0 %3457  ;;  %5846 = vmatprep.mubr.msk.bf16.mxu1 %vm5977_vm3, %v7160_v0  ;;  %v3261_v31 = vsel %vm3255_vm7, %v3250_v33, %v3252_v55 }
 0x167   : > { %v537_v43 = vpop.f32.mrf.mxu1  ;;  %v499_v7 = vpop.f32.mrf.mxu0  ;;  %5638 = vmatprep.subr.msk.bf16.mxu1 %vm251_vm1, %v3259_v21 }
 0x168   : > { %v538_v25 = vadd.f32 %v537_v43, %v350_v51 }
 0x169   : > { %v539_v40 = vpop.f32.mrf.mxu1  ;;  %v576_v46 = vpop.f32.mrf.mxu0  ;;  %5634 = vmatmul.mubr.msk.bf16.vlgmr.msra.gmra.mxu0 %vm247_vm2, %v185_v41 }
 0x16a   : > { %v577_v38 = vadd.f32 %v576_v46, %v389_v59  ;;  %3302 = vmatpush1.bf16.msra.mxu0 %v3267_v61  ;;  %v3464_v35 = vpop.permute.xlu1 %3463  ;;  %v3462_v32 = vpop.permute.xlu0 %3461  ;;  %3319 = vmatprep.mubr.bf16.mxu0 %v7161_v50 }
 0x16b   : > { %v540_v7 = vpop.f32.mrf.mxu1  ;;  %v578_v42 = vpop.f32.mrf.mxu0  ;;  %5640 = vmatprep.subr.msk.bf16.mxu0 %vm251_vm1, %v3261_v31  ;;  %v3279_v31 = vsel %vm251_vm1, %v3260_v60, 0 }
 0x16c   : > { %v579_v10 = vadd.f32 %v578_v42, %v391_v22  ;;  %v3262_v42 = vsel %vm3255_vm7, %v3252_v55, %v3254_v15  ;;  %v3475_v22 = vsel %vm3473_vm8, %v3460_v47, %v3462_v32  ;;  %v3474_v15 = vsel %vm3473_vm8, %v3458_v52, %v3460_v47 }
 0x16d   : > { %v580_v51 = vpop.f32.mrf.mxu0  ;;  %v617_v21 = vpop.f32.mrf.mxu1  ;;  %5847 = vmatmul.mubr.msk.bf16.vlgmr.msra.gmra.mxu1 %vm247_vm2, %v185_v41  ;;  %v3285_v7 = vsel %vm251_vm1, %v3262_v42, 0  ;;  %v3485_v42 = vsel %vm251_vm1, %v3474_v15, 0  ;;  %v3476_v47 = vsel %vm3473_vm8, %v3462_v32, %v3464_v35 }
 0x16e   : > { %v618_v59 = vadd.f32 %v617_v21, %v430_v57  ;;  %3343 = vmatpush1.bf16.msra.mxu1 %v3273_v18  ;;  %v3468_v61 = vpop.permute.xlu1 %3467  ;;  %v3466_v43 = vpop.permute.xlu0 %3465  ;;  %3360 = vmatprep.mubr.bf16.mxu1 %v7161_v50  ;;  %v3491_v15 = vsel %vm251_vm1, %v3476_v47, 0  ;;  %v187_v47 = vld [vmem:[%s7147_s1 + $0x3c] sm:$0xf] }
 0x16f   : > { %v5776_v40 = vpop.f32.mrf.mxu1  ;;  %v581_v33 = vpop.f32.mrf.mxu0  ;;  %5850 = vmatprep.subr.bf16.mxu1 %v7160_v0  ;;  %v3477_v55 = vsel %vm3473_vm8, %v3464_v35, %v3466_v43  ;;  %v3478_v35 = vsel %vm3473_vm8, %v3466_v43, %v3468_v61 }
 0x171   : > { %v620_v57 = vpop.f32.mrf.mxu1  ;;  %v705_v34 = vpop.f32.mrf.mxu0  ;;  %5637 = vmatmul.mubr.msk.bf16.vlgmr.msra.gmra.mxu0 %vm247_vm2, %v186_v39 }
 0x172   : > { %v834_v41 = vadd.f32 %v705_v34, %v495_v13  ;;  %3384 = vmatpush1.bf16.msra.mxu0 %v3279_v31  ;;  %v3472_v46 = vpop.permute.xlu1 %3471  ;;  %v3470_v18 = vpop.permute.xlu0 %3469  ;;  %3401 = vmatprep.mubr.bf16.mxu0 %v7161_v50 }
 0x173   : > { %v5777_v60 = vpop.f32.mrf.mxu1  ;;  %v707_v51 = vpop.f32.mrf.mxu0  ;;  %5643 = vmatprep.subr.msk.bf16.mxu0 %vm251_vm1, %v3475_v22 }
 0x174   : > { %v835_v21 = vadd.f32 %v707_v51, %v497_v4  ;;  %v3479_v4 = vsel %vm3473_vm8, %v3468_v61, %v3470_v18 }
 0x175   : > { %v709_v40 = vpop.f32.mrf.mxu0  ;;  %v746_v33 = vpop.f32.mrf.mxu1  ;;  %5639 = vmatmul.mubr.msk.bf16.vlgmr.msra.gmra.mxu1 %vm247_vm2, %v186_v39 }
 0x176   : > { %v836_v13 = vadd.f32 %v746_v33, %v536_v16  ;;  %5851 = vmatpush3.bf16.msra.mxu1 %v3285_v7  ;;  %v3678_v31 = vpop.permute.xlu1 %3677  ;;  %v3676_v57 = vpop.permute.xlu0 %3675  ;;  %5852 = vmatprep.mubr.msk.bf16.mxu1 %vm5977_vm3, %v7160_v0 }
 0x177   : > { %v748_v34 = vpop.f32.mrf.mxu1  ;;  %v710_v22 = vpop.f32.mrf.mxu0  ;;  %5645 = vmatprep.subr.msk.bf16.mxu1 %vm251_vm1, %v3477_v55 }
 0x178   : > { %v837_v52 = vadd.f32 %v748_v34, %v538_v25 }
 0x179   : > { %v750_v60 = vpop.f32.mrf.mxu1  ;;  %v787_v51 = vpop.f32.mrf.mxu0  ;;  %5641 = vmatmul.mubr.msk.bf16.vlgmr.msra.gmra.mxu0 %vm247_vm2, %v186_v39 }
 0x17a   : > { %v838_v16 = vadd.f32 %v787_v51, %v577_v38  ;;  %3520 = vmatpush1.bf16.msra.mxu0 %v3485_v42  ;;  %v3682_v7 = vpop.permute.xlu1 %3681  ;;  %v3680_v40 = vpop.permute.xlu0 %3679  ;;  %3537 = vmatprep.mubr.bf16.mxu0 %v7161_v50 }
 0x17b   : > { %v751_v33 = vpop.f32.mrf.mxu1  ;;  %v789_v22 = vpop.f32.mrf.mxu0  ;;  %5647 = vmatprep.subr.msk.bf16.mxu0 %vm251_vm1, %v3479_v4  ;;  %v3497_v4 = vsel %vm251_vm1, %v3478_v35, 0  ;;  %v3693_v43 = vsel %vm3691_vm9, %v3678_v31, %v3680_v40 }
 0x17c   : > { %v839_v32 = vadd.f32 %v789_v22, %v579_v10  ;;  %v3480_v10 = vsel %vm3473_vm8, %v3470_v18, %v3472_v46  ;;  %v3692_v46 = vsel %vm3691_vm9, %v3676_v57, %v3678_v31  ;;  %v3694_v31 = vsel %vm3691_vm9, %v3680_v40, %v3682_v7 }
 0x17d   : > { %v791_v25 = vpop.f32.mrf.mxu0  ;;  %v828_v55 = vpop.f32.mrf.mxu1  ;;  %5853 = vmatmul.mubr.msk.bf16.vlgmr.msra.gmra.mxu1 %vm247_vm2, %v186_v39  ;;  %v3503_v22 = vsel %vm251_vm1, %v3480_v10, 0  ;;  %v3703_v10 = vsel %vm251_vm1, %v3692_v46, 0  ;;  %v3709_v46 = vsel %vm251_vm1, %v3694_v31, 0  ;;  %v188_v31 = vld [vmem:[%s7147_s1 + $0x40] sm:$0xf] }
 0x17e   : > { %v840_v38 = vadd.f32 %v828_v55, %v618_v59  ;;  %3561 = vmatpush1.bf16.msra.mxu1 %v3491_v15  ;;  %v3686_v42 = vpop.permute.xlu1 %3685  ;;  %v3684_v34 = vpop.permute.xlu0 %3683  ;;  %3578 = vmatprep.mubr.bf16.mxu1 %v7161_v50 }
 0x17f   : > { %v5782_v60 = vpop.f32.mrf.mxu1  ;;  %v792_v61 = vpop.f32.mrf.mxu0  ;;  %5856 = vmatprep.subr.bf16.mxu1 %v7160_v0  ;;  %v3695_v18 = vsel %vm3691_vm9, %v3682_v7, %v3684_v34  ;;  %v3696_v7 = vsel %vm3691_vm9, %v3684_v34, %v3686_v42 }
 0x181   : > { %v831_v59 = vpop.f32.mrf.mxu1  ;;  %v923_v39 = vpop.f32.mrf.mxu0  ;;  %5644 = vmatmul.mubr.msk.bf16.vlgmr.msra.gmra.mxu0 %vm247_vm2, %v187_v47 }
 0x182   : > { %v1052_v51 = vadd.f32 %v923_v39, %v834_v41  ;;  %3602 = vmatpush1.bf16.msra.mxu0 %v3497_v4  ;;  %v3690_v15 = vpop.permute.xlu1 %3689  ;;  %v3688_v33 = vpop.permute.xlu0 %3687  ;;  %3619 = vmatprep.mubr.bf16.mxu0 %v7161_v50 }
 0x183   : > { %v5783_v35 = vpop.f32.mrf.mxu1  ;;  %v925_v25 = vpop.f32.mrf.mxu0  ;;  %5650 = vmatprep.subr.msk.bf16.mxu0 %vm251_vm1, %v3693_v43 }
 0x184   : > { %v1053_v55 = vadd.f32 %v925_v25, %v835_v21  ;;  %v3697_v21 = vsel %vm3691_vm9, %v3686_v42, %v3688_v33 }
 0x185   : > { %v927_v60 = vpop.f32.mrf.mxu0  ;;  %v964_v61 = vpop.f32.mrf.mxu1  ;;  %5646 = vmatmul.mubr.msk.bf16.vlgmr.msra.gmra.mxu1 %vm247_vm2, %v187_v47 }
 0x186   : > { %v1054_v41 = vadd.f32 %v964_v61, %v836_v13  ;;  %5857 = vmatpush3.bf16.msra.mxu1 %v3503_v22  ;;  %v3896_v4 = vpop.permute.xlu1 %3895  ;;  %v3894_v59 = vpop.permute.xlu0 %3893  ;;  %5858 = vmatprep.mubr.msk.bf16.mxu1 %vm5977_vm3, %v7160_v0 }
 0x187   : > { %v966_v39 = vpop.f32.mrf.mxu1  ;;  %v928_v43 = vpop.f32.mrf.mxu0  ;;  %5652 = vmatprep.subr.msk.bf16.mxu1 %vm251_vm1, %v3695_v18 }
 0x188   : > { %v1055_v57 = vadd.f32 %v966_v39, %v837_v52 }
 0x189   : > { %v968_v35 = vpop.f32.mrf.mxu1  ;;  %v1005_v25 = vpop.f32.mrf.mxu0  ;;  %5648 = vmatmul.mubr.msk.bf16.vlgmr.msra.gmra.mxu0 %vm247_vm2, %v187_v47 }
 0x18a   : > { %v1056_v13 = vadd.f32 %v1005_v25, %v838_v16  ;;  %3738 = vmatpush1.bf16.msra.mxu0 %v3703_v10  ;;  %v3900_v22 = vpop.permute.xlu1 %3899  ;;  %v3898_v60 = vpop.permute.xlu0 %3897  ;;  %3755 = vmatprep.mubr.bf16.mxu0 %v7161_v50 }
 0x18b   : > { %v969_v61 = vpop.f32.mrf.mxu1  ;;  %v1007_v43 = vpop.f32.mrf.mxu0  ;;  %5654 = vmatprep.subr.msk.bf16.mxu0 %vm251_vm1, %v3697_v21  ;;  %v3715_v21 = vsel %vm251_vm1, %v3696_v7, 0  ;;  %v3911_v34 = vsel %vm3909_vm10, %v3896_v4, %v3898_v60 }
 0x18c   : > { %v1057_v40 = vadd.f32 %v1007_v43, %v839_v32  ;;  %v3698_v32 = vsel %vm3691_vm9, %v3688_v33, %v3690_v15  ;;  %v3910_v15 = vsel %vm3909_vm10, %v3894_v59, %v3896_v4  ;;  %v3912_v4 = vsel %vm3909_vm10, %v3898_v60, %v3900_v22 }
 0x18d   : > { %v1009_v52 = vpop.f32.mrf.mxu0  ;;  %v1046_v18 = vpop.f32.mrf.mxu1  ;;  %5859 = vmatmul.mubr.msk.bf16.vlgmr.msra.gmra.mxu1 %vm247_vm2, %v187_v47  ;;  %v3721_v43 = vsel %vm251_vm1, %v3698_v32, 0  ;;  %v3921_v32 = vsel %vm251_vm1, %v3910_v15, 0  ;;  %v3927_v15 = vsel %vm251_vm1, %v3912_v4, 0  ;;  %v189_v4 = vld [vmem:[%s7147_s1 + $0x44] sm:$0xf] }
 0x18e   : > { %v1058_v16 = vadd.f32 %v1046_v18, %v840_v38  ;;  %3779 = vmatpush1.bf16.msra.mxu1 %v3709_v46  ;;  %v3904_v10 = vpop.permute.xlu1 %3903  ;;  %v3902_v39 = vpop.permute.xlu0 %3901  ;;  %3796 = vmatprep.mubr.bf16.mxu1 %v7161_v50 }
 0x18f   : > { %v5788_v35 = vpop.f32.mrf.mxu1  ;;  %v1010_v42 = vpop.f32.mrf.mxu0  ;;  %5862 = vmatprep.subr.bf16.mxu1 %v7160_v0  ;;  %v3913_v33 = vsel %vm3909_vm10, %v3900_v22, %v3902_v39  ;;  %v3914_v22 = vsel %vm3909_vm10, %v3902_v39, %v3904_v10 }
 0x191   : > { %v1049_v38 = vpop.f32.mrf.mxu1  ;;  %v1141_v47 = vpop.f32.mrf.mxu0  ;;  %5651 = vmatmul.mubr.msk.bf16.vlgmr.msra.gmra.mxu0 %vm247_vm2, %v188_v31 }
 0x192   : > { %v1270_v25 = vadd.f32 %v1141_v47, %v1052_v51  ;;  %3820 = vmatpush1.bf16.msra.mxu0 %v3715_v21  ;;  %v3908_v46 = vpop.permute.xlu1 %3907  ;;  %v3906_v61 = vpop.permute.xlu0 %3905  ;;  %3837 = vmatprep.mubr.bf16.mxu0 %v7161_v50 }
 0x193   : > { %v5789_v7 = vpop.f32.mrf.mxu1  ;;  %v1143_v52 = vpop.f32.mrf.mxu0  ;;  %5657 = vmatprep.subr.msk.bf16.mxu0 %vm251_vm1, %v3911_v34 }
 0x194   : > { %v1271_v18 = vadd.f32 %v1143_v52, %v1053_v55  ;;  %v3915_v55 = vsel %vm3909_vm10, %v3904_v10, %v3906_v61 }
 0x195   : > { %v1145_v35 = vpop.f32.mrf.mxu0  ;;  %v1182_v42 = vpop.f32.mrf.mxu1  ;;  %5653 = vmatmul.mubr.msk.bf16.vlgmr.msra.gmra.mxu1 %vm247_vm2, %v188_v31 }
 0x196   : > { %v1272_v51 = vadd.f32 %v1182_v42, %v1054_v41  ;;  %5863 = vmatpush3.bf16.msra.mxu1 %v3721_v43  ;;  %v4114_v21 = vpop.permute.xlu1 %4113  ;;  %v4112_v38 = vpop.permute.xlu0 %4111  ;;  %5864 = vmatprep.mubr.msk.bf16.mxu1 %vm5977_vm3, %v7160_v0 }
 0x197   : > { %v1184_v47 = vpop.f32.mrf.mxu1  ;;  %v1146_v34 = vpop.f32.mrf.mxu0  ;;  %5659 = vmatprep.subr.msk.bf16.mxu1 %vm251_vm1, %v3913_v33 }
 0x198   : > { %v1273_v59 = vadd.f32 %v1184_v47, %v1055_v57 }
 0x199   : > { %v1186_v7 = vpop.f32.mrf.mxu1  ;;  %v1223_v52 = vpop.f32.mrf.mxu0  ;;  %5655 = vmatmul.mubr.msk.bf16.vlgmr.msra.gmra.mxu0 %vm247_vm2, %v188_v31 }
 0x19a   : > { %v1274_v41 = vadd.f32 %v1223_v52, %v1056_v13  ;;  %3956 = vmatpush1.bf16.msra.mxu0 %v3921_v32  ;;  %v4118_v43 = vpop.permute.xlu1 %4117  ;;  %v4116_v35 = vpop.permute.xlu0 %4115  ;;  %3973 = vmatprep.mubr.bf16.mxu0 %v7161_v50 }
 0x19b   : > { %v1187_v42 = vpop.f32.mrf.mxu1  ;;  %v1225_v34 = vpop.f32.mrf.mxu0  ;;  %5661 = vmatprep.subr.msk.bf16.mxu0 %vm251_vm1, %v3915_v55  ;;  %v3933_v55 = vsel %vm251_vm1, %v3914_v22, 0  ;;  %v4129_v39 = vsel %vm4127_vm11, %v4114_v21, %v4116_v35 }
 0x19c   : > { %v1275_v60 = vadd.f32 %v1225_v34, %v1057_v40  ;;  %v3916_v40 = vsel %vm3909_vm10, %v3906_v61, %v3908_v46 }
 0x19d   : > { %v1227_v57 = vpop.f32.mrf.mxu0  ;;  %v1264_v33 = vpop.f32.mrf.mxu1  ;;  %5865 = vmatmul.mubr.msk.bf16.vlgmr.msra.gmra.mxu1 %vm247_vm2, %v188_v31  ;;  %v3939_v42 = vsel %vm251_vm1, %v3916_v40, 0 }
 0x19e   : > { %v1276_v13 = vadd.f32 %v1264_v33, %v1058_v16  ;;  %3997 = vmatpush1.bf16.msra.mxu1 %v3927_v15  ;;  %v4122_v32 = vpop.permute.xlu1 %4121  ;;  %v4120_v47 = vpop.permute.xlu0 %4119  ;;  %4014 = vmatprep.mubr.bf16.mxu1 %v7161_v50  ;;  %v4128_v57 = vsel %vm4127_vm11, %v4112_v38, %v4114_v21  ;;  %v4130_v21 = vsel %vm4127_vm11, %v4116_v35, %v4118_v43 }
 0x19f   : > { %v5794_v7 = vpop.f32.mrf.mxu1  ;;  %v1228_v10 = vpop.f32.mrf.mxu0  ;;  %5868 = vmatprep.subr.bf16.mxu1 %v7160_v0  ;;  %v4131_v46 = vsel %vm4127_vm11, %v4118_v43, %v4120_v47  ;;  %v4139_v40 = vsel %vm251_vm1, %v4128_v57, 0  ;;  %v4145_v57 = vsel %vm251_vm1, %v4130_v21, 0  ;;  %v4132_v43 = vsel %vm4127_vm11, %v4120_v47, %v4122_v32 }
 0x1a1   : > { %v1267_v16 = vpop.f32.mrf.mxu1  ;;  %v1359_v31 = vpop.f32.mrf.mxu0  ;;  %5658 = vmatmul.mubr.msk.bf16.vlgmr.msra.gmra.mxu0 %vm247_vm2, %v189_v4 }
 0x1a2   : > { %v1488_v52 = vadd.f32 %v1359_v31, %v1270_v25  ;;  %4038 = vmatpush1.bf16.msra.mxu0 %v3933_v55  ;;  %v4124_v15 = vpop.permute.xlu0 %4123  ;;  %4055 = vmatprep.mubr.bf16.mxu0 %v7161_v50  ;;  %v4126_v61 = vpop.permute.xlu1 %4125 }
 0x1a3   : > { %v5795_v34 = vpop.f32.mrf.mxu1  ;;  %v1361_v22 = vpop.f32.mrf.mxu0  ;;  %5664 = vmatprep.subr.msk.bf16.mxu0 %vm251_vm1, %v4129_v39 }
 0x1a4   : > { %v1489_v33 = vadd.f32 %v1361_v22, %v1271_v18  ;;  %v4133_v18 = vsel %vm4127_vm11, %v4122_v32, %v4124_v15 }
 0x1a5   : > { %v1363_v7 = vpop.f32.mrf.mxu0  ;;  %v1400_v10 = vpop.f32.mrf.mxu1  ;;  %5660 = vmatmul.mubr.msk.bf16.vlgmr.msra.gmra.mxu1 %vm247_vm2, %v189_v4 }
 0x1a6   : > { %v1490_v25 = vadd.f32 %v1400_v10, %v1272_v51  ;;  %5869 = vmatpush3.bf16.msra.mxu1 %v3939_v42  ;;  %v4330_v55 = vpop.permute.xlu0 %4329  ;;  %5870 = vmatprep.mubr.msk.bf16.mxu1 %vm5977_vm3, %v7160_v0  ;;  %v4332_v51 = vpop.permute.xlu1 %4331 }
 0x1a7   : > { %v1402_v16 = vpop.f32.mrf.mxu1  ;;  %v1364_v39 = vpop.f32.mrf.mxu0  ;;  %5666 = vmatprep.subr.msk.bf16.mxu1 %vm251_vm1, %v4131_v46 }
 0x1a8   : > { %v1491_v38 = vadd.f32 %v1402_v16, %v1273_v59 }
 0x1a9   : > { %v1404_v31 = vpop.f32.mrf.mxu1  ;;  %v1441_v34 = vpop.f32.mrf.mxu0  ;;  %5662 = vmatmul.mubr.msk.bf16.vlgmr.msra.gmra.mxu0 %vm247_vm2, %v189_v4 }
 0x1aa   : > { %v1492_v42 = vadd.f32 %v1441_v34, %v1274_v41  ;;  %4174 = vmatpush1.bf16.msra.mxu0 %v4139_v40  ;;  %v4334_v22 = vpop.permute.xlu0 %4333  ;;  %4191 = vmatprep.mubr.bf16.mxu0 %v7161_v50  ;;  %v190_v41 = vld [vmem:[%s7147_s1 + $0x48] sm:$0xf]  ;;  %v4151_v40 = vsel %vm251_vm1, %v4132_v43, 0  ;;  %v4336_v32 = vpop.permute.xlu1 %4335 }
 0x1ab   : > { %v1405_v7 = vpop.f32.mrf.mxu1  ;;  %v1443_v10 = vpop.f32.mrf.mxu0  ;;  %5668 = vmatprep.subr.msk.bf16.mxu0 %vm251_vm1, %v4133_v18  ;;  %v4347_v47 = vsel %vm4345_vm12, %v4332_v51, %v4334_v22 }
 0x1ac   : > { %v1493_v35 = vadd.f32 %v1443_v10, %v1275_v60  ;;  %v4134_v60 = vsel %vm4127_vm11, %v4124_v15, %v4126_v61  ;;  %v4346_v15 = vsel %vm4345_vm12, %v4330_v55, %v4332_v51  ;;  %v4348_v55 = vsel %vm4345_vm12, %v4334_v22, %v4336_v32 }
 0x1ad   : > { %v1445_v59 = vpop.f32.mrf.mxu0  ;;  %v1482_v46 = vpop.f32.mrf.mxu1  ;;  %5871 = vmatmul.mubr.msk.bf16.vlgmr.msra.gmra.mxu1 %vm247_vm2, %v189_v4  ;;  %v4157_v34 = vsel %vm251_vm1, %v4134_v60, 0 }
 0x1ae   : > { %v1494_v16 = vadd.f32 %v1482_v46, %v1276_v13  ;;  %4215 = vmatpush1.bf16.msra.mxu1 %v4145_v57  ;;  %4232 = vmatprep.mubr.bf16.mxu1 %v7161_v50  ;;  %v4338_v4 = vpop.permute.xlu0 %4337  ;;  %v4340_v46 = vpop.permute.xlu1 %4339 }
 0x1af   : > { %v5800_v39 = vpop.f32.mrf.mxu1  ;;  %v1446_v21 = vpop.f32.mrf.mxu0  ;;  %5874 = vmatprep.subr.bf16.mxu1 %v7160_v0  ;;  %v4349_v61 = vsel %vm4345_vm12, %v4336_v32, %v4338_v4 }
 0x1b0   : > { %v4357_v39 = vsel %vm251_vm1, %v4346_v15, 0 }
 0x1b1   : > { %v1485_v13 = vpop.f32.mrf.mxu1  ;;  %v1577_v18 = vpop.f32.mrf.mxu0  ;;  %5665 = vmatmul.mubr.msk.bf16.vlgmr.msra.gmra.mxu0 %vm247_vm2, %v190_v41 }
 0x1b2   : > { %v1706_v31 = vadd.f32 %v1577_v18, %v1488_v52  ;;  %4256 = vmatpush1.bf16.msra.mxu0 %v4151_v40  ;;  %4273 = vmatprep.mubr.bf16.mxu0 %v7161_v50  ;;  %v4342_v52 = vpop.permute.xlu0 %4341  ;;  %v4363_v18 = vsel %vm251_vm1, %v4348_v55, 0 }
 0x1b3   : > { %v5801_v57 = vpop.f32.mrf.mxu1  ;;  %v1579_v7 = vpop.f32.mrf.mxu0  ;;  %5671 = vmatprep.subr.msk.bf16.mxu0 %vm251_vm1, %v4347_v47 }
 0x1b4   : > { %v1707_v10 = vadd.f32 %v1579_v7, %v1489_v33  ;;  %v4351_v33 = vsel %vm4345_vm12, %v4340_v46, %v4342_v52  ;;  %v4350_v7 = vsel %vm4345_vm12, %v4338_v4, %v4340_v46 }
 0x1b5   : > { %v1581_v43 = vpop.f32.mrf.mxu0  ;;  %v1618_v59 = vpop.f32.mrf.mxu1  ;;  %5667 = vmatmul.mubr.msk.bf16.vlgmr.msra.gmra.mxu1 %vm247_vm2, %v190_v41 }
 0x1b6   : > { %v1708_v40 = vadd.f32 %v1618_v59, %v1490_v25  ;;  %5875 = vmatpush3.bf16.msra.mxu1 %v4157_v34  ;;  %5876 = vmatprep.mubr.msk.bf16.mxu1 %vm5977_vm3, %v7160_v0  ;;  %v4369_v43 = vsel %vm251_vm1, %v4350_v7, 0 }
 0x1b7   : > { %v1620_v21 = vpop.f32.mrf.mxu1  ;;  %v1582_v60 = vpop.f32.mrf.mxu0  ;;  %5673 = vmatprep.subr.msk.bf16.mxu1 %vm251_vm1, %v4349_v61 }
 0x1b8   : > { %v1709_v51 = vadd.f32 %v1620_v21, %v1491_v38  ;;  %v4344_v38 = vpop.permute.xlu1 %4343 }
 0x1b9   : > { %v1622_v47 = vpop.f32.mrf.mxu1  ;;  %v1659_v13 = vpop.f32.mrf.mxu0  ;;  %5669 = vmatmul.mubr.msk.bf16.vlgmr.msra.gmra.mxu0 %vm247_vm2, %v190_v41 }
 0x1ba   : > { %v1710_v25 = vadd.f32 %v1659_v13, %v1492_v42  ;;  %4392 = vmatpush1.bf16.msra.mxu0 %v4357_v39  ;;  %4409 = vmatprep.mubr.bf16.mxu0 %v7161_v50  ;;  %v191_v42 = vld [vmem:[%s7147_s1 + $0x4c] sm:$0xf] }
 0x1bb   : > { %v1623_v34 = vpop.f32.mrf.mxu1  ;;  %v1661_v57 = vpop.f32.mrf.mxu0  ;;  %5675 = vmatprep.subr.msk.bf16.mxu0 %vm251_vm1, %v4351_v33 }
 0x1bc   : > { %v1711_v22 = vadd.f32 %v1661_v57, %v1493_v35  ;;  %v4352_v35 = vsel %vm4345_vm12, %v4342_v52, %v4344_v38 }
 0x1bd   : > { %v1663_v32 = vpop.f32.mrf.mxu0  ;;  %v1700_v15 = vpop.f32.mrf.mxu1  ;;  %5877 = vmatmul.mubr.msk.bf16.vlgmr.msra.gmra.mxu1 %vm247_vm2, %v190_v41  ;;  %v4375_v41 = vsel %vm251_vm1, %v4352_v35, 0 }
 0x1be   : > { %v1712_v61 = vadd.f32 %v1700_v15, %v1494_v16  ;;  %4433 = vmatpush1.bf16.msra.mxu1 %v4363_v18  ;;  %4450 = vmatprep.mubr.bf16.mxu1 %v7161_v50  ;;  %v443_v18 = vsel %vm251_vm1, %v6035_v5, 0  ;;  %v449_v32 = vsel %vm251_vm1, %v6039_v6, 0  ;;  %v455_v6 = vsel %vm251_vm1, %v6046_v8, 0 }
 0x1bf   : > { %v1664_v59 = vpop.f32.mrf.mxu0  ;;  %v5806_v39 = vpop.f32.mrf.mxu1  ;;  %5880 = vmatprep.subr.bf16.mxu1 %v7160_v0 }
 0x1c0   : > { %v4551_v39 = vsel %vm251_vm1, %v6057_v12, 0  ;;  %v197_v12 = vld [vmem:[%s7148_s2] sm:$0xff] }
 0x1c1   : > { %v1703_v4 = vpop.f32.mrf.mxu1  ;;  %v1795_v46 = vpop.f32.mrf.mxu0  ;;  %5672 = vmatmul.mubr.msk.bf16.vlgmr.msra.gmra.mxu0 %vm247_vm2, %v191_v42  ;;  %5444 = vperm.xlu0 %5948, %v197_v12  }
 0x1c2   : > { %v1924_v16 = vadd.f32 %v1795_v46, %v1706_v31  ;;  %4474 = vmatpush1.bf16.msra.mxu0 %v4369_v43  ;;  %4491 = vmatprep.mubr.bf16.mxu0 %v7161_v50 }
 0x1c3   : > { %v5807_v21 = vpop.f32.mrf.mxu1  ;;  %v1797_v60 = vpop.f32.mrf.mxu0  ;;  %5678 = vmatprep.subr.msk.bf16.mxu0 %vm251_vm1, %v6029_v3 }
 0x1c4   : > { %v1925_v55 = vadd.f32 %v1797_v60, %v1707_v10  ;;  %v256_v21 = vsel %vm251_vm1, %v6140_v17, 0 }
 0x1c5   : > { %v1799_v33 = vpop.f32.mrf.mxu0  ;;  %v1836_v47 = vpop.f32.mrf.mxu1  ;;  %5674 = vmatmul.mubr.msk.bf16.vlgmr.msra.gmra.mxu1 %vm247_vm2, %v191_v42 }
 0x1c6   : > { %v1926_v52 = vadd.f32 %v1836_v47, %v1708_v40  ;;  %5881 = vmatpush3.bf16.msra.mxu1 %v4375_v41  ;;  %5882 = vmatprep.mubr.msk.bf16.mxu1 %vm5977_vm3, %v7160_v0 }
 0x1c7   : > { %v1800_v31 = vpop.f32.mrf.mxu0  ;;  %v1838_v13 = vpop.f32.mrf.mxu1  ;;  %5680 = vmatprep.subr.msk.bf16.mxu1 %vm251_vm1, %v6048_v9 }
 0x1c8   : > { %v1927_v34 = vadd.f32 %v1838_v13, %v1709_v51  ;;  %v262_v31 = vsel %vm251_vm1, %v6155_v24, 0  ;;  %v268_v24 = vsel %vm251_vm1, %v6175_v30, 0 }
 0x1c9   : > { %v1840_v3 = vpop.f32.mrf.mxu1  ;;  %v1877_v10 = vpop.f32.mrf.mxu0  ;;  %5676 = vmatmul.mubr.msk.bf16.vlgmr.msra.gmra.mxu0 %vm247_vm2, %v191_v42 }
 0x1ca   : > { %v1928_v57 = vadd.f32 %v1877_v10, %v1710_v25  ;;  %4568 = vmatpush1.bf16.msra.mxu0 %v443_v18  ;;  %4585 = vmatprep.mubr.bf16.mxu0 %v7161_v50  ;;  %v192_v25 = vld [vmem:[%s7147_s1 + $0x50] sm:$0xf]  ;;  %v4727_v18 = vpop.permute.xlu0 %4726  ;;  %v193_v3 = vld [vmem:[%s7147_s1 + $0x54] sm:$0xf] }
 0x1cb   : > { %v1841_v40 = vpop.f32.mrf.mxu1  ;;  %v1879_v7 = vpop.f32.mrf.mxu0  ;;  %5682 = vmatprep.subr.msk.bf16.mxu0 %vm251_vm1, %v6055_v11 }
 0x1cc   : > { %v1929_v5 = vadd.f32 %v1879_v7, %v1711_v22  ;;  %v4728_v7 = vsel %vm239_vm0, %v6167_v27, %v4727_v18  ;;  %v872_v18 = vsel %vm251_vm1, %v6288_v1, 0  ;;  %v195_v1 = vld [vmem:[%s7147_s1 + $0x5c] sm:$0xf] }
 0x1cd   : > { %v1881_v15 = vpop.f32.mrf.mxu0  ;;  %v1918_v9 = vpop.f32.mrf.mxu1  ;;  %5883 = vmatmul.mubr.msk.bf16.vlgmr.msra.gmra.mxu1 %vm247_vm2, %v191_v42 }
 0x1ce   : > { %v1930_v51 = vadd.f32 %v1918_v9, %v1712_v61  ;;  %4609 = vmatpush1.bf16.msra.mxu1 %v449_v32  ;;  %4626 = vmatprep.mubr.bf16.mxu1 %v7161_v50 }
 0x1cf   : > { %v1882_v38 = vpop.f32.mrf.mxu0  ;;  %v5812_v43 = vpop.f32.mrf.mxu1  ;;  %5886 = vmatprep.subr.bf16.mxu1 %v7160_v0 }
 0x1d1   : > { %v1921_v11 = vpop.f32.mrf.mxu1  ;;  %v2013_v22 = vpop.f32.mrf.mxu0  ;;  %5679 = vmatmul.mubr.msk.bf16.vlgmr.msra.gmra.mxu0 %vm247_vm2, %v192_v25 }
 0x1d2   : > { %v2142_v42 = vadd.f32 %v2013_v22, %v1924_v16  ;;  %4650 = vmatpush1.bf16.msra.mxu0 %v455_v6  ;;  %4667 = vmatprep.mubr.bf16.mxu0 %v7161_v50  ;;  %v654_v22 = vsel %vm251_vm1, %v6224_v44, 0  ;;  %v194_v44 = vld [vmem:[%s7147_s1 + $0x58] sm:$0xf] }
 0x1d3   : > { %5686 = vmatprep.subr.msk.bf16.mxu0 %vm251_vm1, %v6152_v23  ;;  %v5813_v61 = vpop.f32.mrf.mxu1  ;;  %v2015_v59 = vpop.f32.mrf.mxu0 }
 0x1d4   : > { %v2143_v35 = vadd.f32 %v2015_v59, %v1925_v55 }
 0x1d5   : > { %v2017_v8 = vpop.f32.mrf.mxu0  ;;  %v2054_v4 = vpop.f32.mrf.mxu1  ;;  %5681 = vmatmul.mubr.msk.bf16.vlgmr.msra.gmra.mxu1 %vm247_vm2, %v192_v25 }
 0x1d6   : > { %v2144_v46 = vadd.f32 %v2054_v4, %v1926_v52  ;;  %5887 = vmatpush3.bf16.msra.mxu1 %v4551_v39  ;;  %5888 = vmatprep.mubr.msk.bf16.mxu1 %vm5977_vm3, %v7160_v0  ;;  %v660_v8 = vsel %vm251_vm1, %v6240_v49, 0  ;;  %v4906_v4 = vpop.permute.xlu1 %4905  ;;  %v666_v49 = vsel %vm251_vm1, %v6256_v54, 0 }
 0x1d7   : > { %5688 = vmatprep.subr.msk.bf16.mxu1 %vm251_vm1, %v6165_v26  ;;  %v2018_v16 = vpop.f32.mrf.mxu0  ;;  %v2056_v23 = vpop.f32.mrf.mxu1  ;;  %v4907_v12 = vsel %vm639_vm4, %v6227_v45, %v4906_v4 }
 0x1d8   : > { %v2145_v41 = vadd.f32 %v2056_v23, %v1927_v34 }
 0x1d9   : > { %v2058_v60 = vpop.f32.mrf.mxu1  ;;  %v2095_v55 = vpop.f32.mrf.mxu0  ;;  %5683 = vmatmul.mubr.msk.bf16.vlgmr.msra.gmra.mxu0 %vm247_vm2, %v192_v25 }
 0x1da   : > { %v2146_v33 = vadd.f32 %v2095_v55, %v1928_v57  ;;  %4750 = vmatpush1.bf16.msra.mxu0 %v256_v21  ;;  %4767 = vmatprep.mubr.bf16.mxu0 %v7161_v50 }
 0x1db   : > { %5690 = vmatprep.subr.msk.bf16.mxu0 %vm251_vm1, %v6172_v29  ;;  %v2059_v26 = vpop.f32.mrf.mxu1  ;;  %v2097_v47 = vpop.f32.mrf.mxu0 }
 0x1dc   : > { %v2147_v52 = vadd.f32 %v2097_v47, %v1929_v5  ;;  %v4912_v26 = vsel %vm251_vm1, %v4907_v12, 0  ;;  %v7164_v12 = vld [vmem:[#allocation2_spill] sm:$0xff] }
 0x1dd   : > { %v2099_v13 = vpop.f32.mrf.mxu0  ;;  %v2136_v17 = vpop.f32.mrf.mxu1  ;;  %5889 = vmatmul.mubr.msk.bf16.vlgmr.msra.gmra.mxu1 %vm247_vm2, %v192_v25 }
 0x1de   : > { %v2148_v34 = vadd.f32 %v2136_v17, %v1930_v51  ;;  %4791 = vmatpush1.bf16.msra.mxu1 %v262_v31  ;;  %4808 = vmatprep.mubr.bf16.mxu1 %v7161_v50  ;;  %v4733_v51 = vsel %vm251_vm1, %v4728_v7, 0 }
 0x1df   : > { %v2100_v29 = vpop.f32.mrf.mxu0  ;;  %v5818_v10 = vpop.f32.mrf.mxu1  ;;  %5892 = vmatprep.subr.bf16.mxu1 %v7160_v0 }
 0x1e1   : > { %v2139_v57 = vpop.f32.mrf.mxu1  ;;  %v2231_v40 = vpop.f32.mrf.mxu0  ;;  %5687 = vmatmul.mubr.msk.bf16.vlgmr.msra.gmra.mxu0 %vm247_vm2, %v193_v3 }
 0x1e2   : > { %v2360_v32 = vadd.f32 %v2231_v40, %v2142_v42  ;;  %4832 = vmatpush1.bf16.msra.mxu0 %v268_v24  ;;  %4849 = vmatprep.mubr.bf16.mxu0 %v7161_v50  ;;  %v878_v40 = vsel %vm251_vm1, %v6304_v14, 0  ;;  %v5085_v24 = vpop.permute.xlu0 %5084  ;;  %v884_v14 = vsel %vm251_vm1, %v6320_v20, 0 }
 0x1e3   : > { %5693 = vmatprep.subr.msk.bf16.mxu0 %vm251_vm1, %v6249_v53  ;;  %v5819_v5 = vpop.f32.mrf.mxu1  ;;  %v2233_v15 = vpop.f32.mrf.mxu0 }
 0x1e4   : > { %v2361_v9 = vadd.f32 %v2233_v15, %v2143_v35 }
 0x1e5   : > { %v2235_v25 = vpop.f32.mrf.mxu0  ;;  %v2272_v38 = vpop.f32.mrf.mxu1  ;;  %5689 = vmatmul.mubr.msk.bf16.vlgmr.msra.gmra.mxu1 %vm247_vm2, %v193_v3 }
 0x1e6   : > { %v2362_v30 = vadd.f32 %v2272_v38, %v2144_v46  ;;  %5893 = vmatpush3.bf16.msra.mxu1 %v4733_v51  ;;  %5894 = vmatprep.mubr.msk.bf16.mxu1 %vm5977_vm3, %v7160_v0 }
 0x1e7   : > { %5695 = vmatprep.subr.msk.bf16.mxu1 %vm251_vm1, %v6265_v58  ;;  %v2236_v27 = vpop.f32.mrf.mxu0  ;;  %v2274_v43 = vpop.f32.mrf.mxu1 }
 0x1e8   : > { %v2363_v53 = vadd.f32 %v2274_v43, %v2145_v41 }
 0x1e9   : > { %v2276_v6 = vpop.f32.mrf.mxu1  ;;  %v2313_v11 = vpop.f32.mrf.mxu0  ;;  %5691 = vmatmul.mubr.msk.bf16.vlgmr.msra.gmra.mxu0 %vm247_vm2, %v193_v3 }
 0x1ea   : > { %v2364_v42 = vadd.f32 %v2313_v11, %v2146_v33  ;;  %4929 = vmatpush1.bf16.msra.mxu0 %v654_v22  ;;  %4946 = vmatprep.mubr.bf16.mxu0 %v7161_v50 }
 0x1eb   : > { %5697 = vmatprep.subr.msk.bf16.mxu0 %vm251_vm1, %v6281_v63  ;;  %v2277_v61 = vpop.f32.mrf.mxu1  ;;  %v2315_v59 = vpop.f32.mrf.mxu0 }
 0x1ec   : > { %v2365_v58 = vadd.f32 %v2315_v59, %v2147_v52 }
 0x1ed   : > { %v2317_v39 = vpop.f32.mrf.mxu0  ;;  %v2354_v35 = vpop.f32.mrf.mxu1  ;;  %5895 = vmatmul.mubr.msk.bf16.vlgmr.msra.gmra.mxu1 %vm247_vm2, %v193_v3 }
 0x1ee   : > { %v2366_v46 = vadd.f32 %v2354_v35, %v2148_v34  ;;  %4970 = vmatpush1.bf16.msra.mxu1 %v660_v8  ;;  %4987 = vmatprep.mubr.bf16.mxu1 %v7161_v50  ;;  %v7162_v8 = vld [vmem:[#allocation3_spill] sm:$0xff] }
 0x1ef   : > { %v2318_v63 = vpop.f32.mrf.mxu0  ;;  %v5824_v16 = vpop.f32.mrf.mxu1  ;;  %5898 = vmatprep.subr.bf16.mxu1 %v7160_v0  ;;  %v1096_v4 = vsel %vm251_vm1, %v7162_v8, 0 }
 0x1f1   : > { %v2357_v23 = vpop.f32.mrf.mxu1  ;;  %v2449_v41 = vpop.f32.mrf.mxu0  ;;  %5694 = vmatmul.mubr.msk.bf16.vlgmr.msra.gmra.mxu0 %vm247_vm2, %v194_v44 }
 0x1f2   : > { %v2578_v21 = vadd.f32 %v2449_v41, %v2360_v32  ;;  %5011 = vmatpush1.bf16.msra.mxu0 %v666_v49  ;;  %5028 = vmatprep.mubr.bf16.mxu0 %v7161_v50  ;;  %v7163_v41 = vld [vmem:[#allocation4_spill] sm:$0xff] }
 0x1f3   : > { %5700 = vmatprep.subr.msk.bf16.mxu0 %vm251_vm1, %v6313_v19  ;;  %v5825_v60 = vpop.f32.mrf.mxu1  ;;  %v2451_v55 = vpop.f32.mrf.mxu0  ;;  %v1102_v49 = vsel %vm251_vm1, %v7163_v41, 0 }
 0x1f4   : > { %v2579_v33 = vadd.f32 %v2451_v55, %v2361_v9  ;;  %v5086_v9 = vsel %vm857_vm5, %v6291_v2, %v5085_v24 }
 0x1f5   : > { %v2453_v47 = vpop.f32.mrf.mxu0  ;;  %v2490_v52 = vpop.f32.mrf.mxu1  ;;  %5696 = vmatmul.mubr.msk.bf16.vlgmr.msra.gmra.mxu1 %vm247_vm2, %v194_v44  ;;  %v5091_v27 = vsel %vm251_vm1, %v5086_v9, 0 }
 0x1f6   : > { %v2580_v54 = vadd.f32 %v2490_v52, %v2362_v30  ;;  %5899 = vmatpush3.bf16.msra.mxu1 %v4912_v26  ;;  %5900 = vmatprep.mubr.msk.bf16.mxu1 %vm5977_vm3, %v7160_v0 }
 0x1f7   : > { %5702 = vmatprep.subr.msk.bf16.mxu1 %vm251_vm1, %v6329_v28  ;;  %v2454_v45 = vpop.f32.mrf.mxu0  ;;  %v2492_v31 = vpop.f32.mrf.mxu1 }
 0x1f8   : > { %v2581_v19 = vadd.f32 %v2492_v31, %v2363_v53 }
 0x1f9   : > { %v2494_v13 = vpop.f32.mrf.mxu1  ;;  %v2531_v17 = vpop.f32.mrf.mxu0  ;;  %5698 = vmatmul.mubr.msk.bf16.vlgmr.msra.gmra.mxu0 %vm247_vm2, %v194_v44 }
 0x1fa   : > { %v2582_v34 = vadd.f32 %v2531_v17, %v2364_v42  ;;  %5108 = vmatpush1.bf16.msra.mxu0 %v872_v18  ;;  %5125 = vmatprep.mubr.bf16.mxu0 %v7161_v50  ;;  %v1090_v42 = vsel %vm251_vm1, %v6352_v37, 0  ;;  %v196_v37 = vld [vmem:[%s7147_s1 + $0x60] sm:$0xf] }
 0x1fb   : > { %5704 = vmatprep.subr.msk.bf16.mxu0 %vm251_vm1, %v6345_v36  ;;  %v2495_v3 = vpop.f32.mrf.mxu1  ;;  %v2533_v29 = vpop.f32.mrf.mxu0 }
 0x1fc   : > { %v2583_v28 = vadd.f32 %v2533_v29, %v2365_v58 }
 0x1fd   : > { %v2535_v10 = vpop.f32.mrf.mxu0  ;;  %v2572_v57 = vpop.f32.mrf.mxu1  ;;  %5901 = vmatmul.mubr.msk.bf16.vlgmr.msra.gmra.mxu1 %vm247_vm2, %v194_v44 }
 0x1fe   : > { %v2584_v7 = vadd.f32 %v2572_v57, %v2366_v46  ;;  %5149 = vmatpush1.bf16.msra.mxu1 %v878_v40  ;;  %5166 = vmatprep.mubr.bf16.mxu1 %v7161_v50  ;;  %v5264_v46 = vpop.permute.xlu1 %5263 }
 0x1ff   : > { %v2536_v36 = vpop.f32.mrf.mxu0  ;;  %v5830_v32 = vpop.f32.mrf.mxu1  ;;  %5904 = vmatprep.subr.bf16.mxu1 %v7160_v0 }
 0x201   : > { %v2575_v5 = vpop.f32.mrf.mxu1  ;;  %v2667_v15 = vpop.f32.mrf.mxu0  ;;  %5701 = vmatmul.mubr.msk.bf16.vlgmr.msra.gmra.mxu0 %vm247_vm2, %v195_v1 }
 0x202   : > { %v2796_v51 = vadd.f32 %v2667_v15, %v2578_v21  ;;  %5190 = vmatpush1.bf16.msra.mxu0 %v884_v14  ;;  %5207 = vmatprep.mubr.bf16.mxu0 %v7161_v50  ;;  %v5265_v21 = vsel %vm1075_vm6, %v7164_v12, %v5264_v46 }
 0x203   : > { %5707 = vmatprep.subr.msk.bf16.mxu0 %vm251_vm1, %v6377_v48  ;;  %v5831_v25 = vpop.f32.mrf.mxu1  ;;  %v2669_v38 = vpop.f32.mrf.mxu0  ;;  %v5270_v47 = vsel %vm251_vm1, %v5265_v21, 0 }
 0x204   : > { %v2797_v30 = vadd.f32 %v2669_v38, %v2579_v33 }
 0x205   : > { %v2671_v43 = vpop.f32.mrf.mxu0  ;;  %v2708_v53 = vpop.f32.mrf.mxu1  ;;  %5703 = vmatmul.mubr.msk.bf16.vlgmr.msra.gmra.mxu1 %vm247_vm2, %v195_v1 }
 0x206   : > { %v2798_v20 = vadd.f32 %v2708_v53, %v2580_v54  ;;  %5905 = vmatpush3.bf16.msra.mxu1 %v5091_v27  ;;  %5906 = vmatprep.mubr.msk.bf16.mxu1 %vm5977_vm3, %v7160_v0 }
 0x207   : > { %5709 = vmatprep.subr.msk.bf16.mxu1 %vm251_vm1, %v6393_v56  ;;  %v2672_v2 = vpop.f32.mrf.mxu0  ;;  %v2710_v6 = vpop.f32.mrf.mxu1 }
 0x208   : > { %v2799_v48 = vadd.f32 %v2710_v6, %v2581_v19 }
 0x209   : > { %v2712_v11 = vpop.f32.mrf.mxu1  ;;  %v2749_v22 = vpop.f32.mrf.mxu0  ;;  %5705 = vmatmul.mubr.msk.bf16.vlgmr.msra.gmra.mxu0 %vm247_vm2, %v195_v1 }
 0x20a   : > { %v2800_v61 = vadd.f32 %v2749_v22, %v2582_v34  ;;  %5287 = vmatpush1.bf16.msra.mxu0 %v1090_v42  ;;  %5304 = vmatprep.mubr.bf16.mxu0 %v7161_v50 }
 0x20b   : > { %5711 = vmatprep.subr.msk.bf16.mxu0 %vm251_vm1, %v6409_v62  ;;  %v2713_v59 = vpop.f32.mrf.mxu1  ;;  %v2751_v58 = vpop.f32.mrf.mxu0 }
 0x20c   : > { %v2801_v56 = vadd.f32 %v2751_v58, %v2583_v28 }
 0x20d   : > { %v2753_v39 = vpop.f32.mrf.mxu0  ;;  %v2790_v35 = vpop.f32.mrf.mxu1  ;;  %5907 = vmatmul.mubr.msk.bf16.vlgmr.msra.gmra.mxu1 %vm247_vm2, %v195_v1 }
 0x20e   : > { %v2802_v44 = vadd.f32 %v2790_v35, %v2584_v7  ;;  %5328 = vmatpush1.bf16.msra.mxu1 %v1096_v4  ;;  %5345 = vmatprep.mubr.bf16.mxu1 %v7161_v50 }
 0x20f   : > { %v2754_v62 = vpop.f32.mrf.mxu0  ;;  %v5836_v63 = vpop.f32.mrf.mxu1  ;;  %5910 = vmatprep.subr.bf16.mxu1 %v7160_v0 }
 0x211   : > { %v2793_v16 = vpop.f32.mrf.mxu1  ;;  %v2885_v23 = vpop.f32.mrf.mxu0  ;;  %5708 = vmatmul.mubr.msk.bf16.vlgmr.msra.gmra.mxu0 %vm247_vm2, %v196_v37 }
 0x212   : > { %v3014_v60 = vadd.f32 %v2885_v23, %v2796_v51  ;;  %5369 = vmatpush1.bf16.msra.mxu0 %v1102_v49  ;;  %5386 = vmatprep.mubr.bf16.mxu0 %v7161_v50 }
 0x213   : > { %v5837_v55 = vpop.f32.mrf.mxu1  ;;  %v2887_v33 = vpop.f32.mrf.mxu0 }
 0x214   : > { %v3015_v26 = vadd.f32 %v2887_v33, %v2797_v30 }
 0x215   : > { %v2889_v52 = vpop.f32.mrf.mxu0  ;;  %v2926_v54 = vpop.f32.mrf.mxu1  ;;  %5710 = vmatmul.mubr.msk.bf16.vlgmr.msra.gmra.mxu1 %vm247_vm2, %v196_v37 }
 0x216   : > { %v3016_v45 = vadd.f32 %v2926_v54, %v2798_v20  ;;  %5911 = vmatpush3.bf16.msra.mxu1 %v5270_v47  ;;  %5912 = vmatprep.mubr.msk.bf16.mxu1 %vm5977_vm3, %v7160_v0 }
 0x217   : > { %v2890_v31 = vpop.f32.mrf.mxu0  ;;  %v2928_v19 = vpop.f32.mrf.mxu1 }
 0x218   : > { %v3017_v13 = vadd.f32 %v2928_v19, %v2799_v48 }
 0x219   : > { %v2930_v17 = vpop.f32.mrf.mxu1  ;;  %v2967_v18 = vpop.f32.mrf.mxu0  ;;  %5712 = vmatmul.mubr.msk.bf16.vlgmr.msra.gmra.mxu0 %vm247_vm2, %v196_v37 }
 0x21a   : > { %v3018_v50 = vadd.f32 %v2967_v18, %v2800_v61 }
 0x21b   : > { %v2931_v34 = vpop.f32.mrf.mxu1  ;;  %v2969_v3 = vpop.f32.mrf.mxu0 }
 0x21c   : > { %v3019_v29 = vadd.f32 %v2969_v3, %v2801_v56 }
 0x21d   : > { %v2971_v28 = vpop.f32.mrf.mxu0  ;;  %v3008_v10 = vpop.f32.mrf.mxu1  ;;  %5913 = vmatmul.mubr.msk.bf16.vlgmr.msra.gmra.mxu1 %vm247_vm2, %v196_v37 }
 0x21e   : > { %v3020_v57 = vadd.f32 %v3008_v10, %v2802_v44 }
 0x21f   : > { %v2972_v40 = vpop.f32.mrf.mxu0  ;;  %v5842_v24 = vpop.f32.mrf.mxu1 }
 0x221   : > { %v3011_v7 = vpop.f32.mrf.mxu1  ;;  %v3103_v0 = vpop.f32.mrf.mxu0 }
 0x222   : > { %v3232_v1 = vadd.f32 %v3103_v0, %v3014_v60 }
 0x223   : > { %v5843_v36 = vpop.f32.mrf.mxu1  ;;  %v3105_v32 = vpop.f32.mrf.mxu0 }
 0x224   : > { %v3233_v5 = vadd.f32 %v3105_v32, %v3015_v26 }
 0x225   : > { %v3107_v15 = vpop.f32.mrf.mxu0  ;;  %v3144_v14 = vpop.f32.mrf.mxu1 }
 0x226   : > { %v3234_v9 = vadd.f32 %v3144_v14, %v3016_v45 }
 0x227   : > { %v3108_v51 = vpop.f32.mrf.mxu0  ;;  %v3146_v25 = vpop.f32.mrf.mxu1 }
 0x228   : > { %v3235_v38 = vadd.f32 %v3146_v25, %v3017_v13 }
 0x229   : > { %v3148_v30 = vpop.f32.mrf.mxu1  ;;  %v3185_v27 = vpop.f32.mrf.mxu0 }
 0x22a   : > { %v3236_v43 = vadd.f32 %v3185_v27, %v3018_v50 }
 0x22b   : > { %v3149_v53 = vpop.f32.mrf.mxu1  ;;  %v3187_v20 = vpop.f32.mrf.mxu0 }
 0x22c   : > { %v3237_v2 = vadd.f32 %v3187_v20, %v3019_v29 }
 0x22d   : > { %v3189_v6 = vpop.f32.mrf.mxu0  ;;  %v3226_v48 = vpop.f32.mrf.mxu1 }
 0x22e   : > { %v3238_v11 = vadd.f32 %v3226_v48, %v3020_v57 }
 0x22f   : > { %v3190_v22 = vpop.f32.mrf.mxu0  ;;  %v5848_v42 = vpop.f32.mrf.mxu1 }
 0x231   : > { %v3229_v61 = vpop.f32.mrf.mxu1  ;;  %v3321_v59 = vpop.f32.mrf.mxu0 }
 0x232   : > { %v3450_v58 = vadd.f32 %v3321_v59, %v3232_v1 }
 0x233   : > { %v5849_v56 = vpop.f32.mrf.mxu1  ;;  %v3323_v39 = vpop.f32.mrf.mxu0 }
 0x234   : > { %v3451_v35 = vadd.f32 %v3323_v39, %v3233_v5 }
 0x235   : > { %v3325_v8 = vpop.f32.mrf.mxu0  ;;  %v3362_v4 = vpop.f32.mrf.mxu1 }
 0x236   : > { %v3452_v46 = vadd.f32 %v3362_v4, %v3234_v9 }
 0x237   : > { %v3326_v44 = vpop.f32.mrf.mxu0  ;;  %v3364_v37 = vpop.f32.mrf.mxu1 }
 0x238   : > { %v3453_v62 = vadd.f32 %v3364_v37, %v3235_v38 }
 0x239   : > { %v3366_v63 = vpop.f32.mrf.mxu1  ;;  %v3403_v16 = vpop.f32.mrf.mxu0 }
 0x23a   : > { %v3454_v23 = vadd.f32 %v3403_v16, %v3236_v43 }
 0x23b   : > { %v3367_v41 = vpop.f32.mrf.mxu1  ;;  %v3405_v49 = vpop.f32.mrf.mxu0 }
 0x23c   : > { %v3455_v12 = vadd.f32 %v3405_v49, %v3237_v2 }
 0x23d   : > { %v3407_v21 = vpop.f32.mrf.mxu0  ;;  %v3444_v60 = vpop.f32.mrf.mxu1 }
 0x23e   : > { %v3456_v55 = vadd.f32 %v3444_v60, %v3238_v11 }
 0x23f   : > { %v3408_v33 = vpop.f32.mrf.mxu0  ;;  %v5854_v26 = vpop.f32.mrf.mxu1 }
 0x241   : > { %v3447_v47 = vpop.f32.mrf.mxu1  ;;  %v3539_v52 = vpop.f32.mrf.mxu0 }
 0x242   : > { %v3668_v54 = vadd.f32 %v3539_v52, %v3450_v58 }
 0x243   : > { %v5855_v45 = vpop.f32.mrf.mxu1  ;;  %v3541_v31 = vpop.f32.mrf.mxu0 }
 0x244   : > { %v3669_v19 = vadd.f32 %v3541_v31, %v3451_v35 }
 0x245   : > { %v3543_v13 = vpop.f32.mrf.mxu0  ;;  %v3580_v17 = vpop.f32.mrf.mxu1 }
 0x246   : > { %v3670_v18 = vadd.f32 %v3580_v17, %v3452_v46 }
 0x247   : > { %v3544_v50 = vpop.f32.mrf.mxu0  ;;  %v3582_v34 = vpop.f32.mrf.mxu1 }
 0x248   : > { %v3671_v3 = vadd.f32 %v3582_v34, %v3453_v62 }
 0x249   : > { %v3584_v29 = vpop.f32.mrf.mxu1  ;;  %v3621_v28 = vpop.f32.mrf.mxu0 }
 0x24a   : > { %v3672_v10 = vadd.f32 %v3621_v28, %v3454_v23 }
 0x24b   : > { %v3585_v57 = vpop.f32.mrf.mxu1  ;;  %v3623_v40 = vpop.f32.mrf.mxu0 }
 0x24c   : > { %v3673_v24 = vadd.f32 %v3623_v40, %v3455_v12 }
 0x24d   : > { %v3625_v7 = vpop.f32.mrf.mxu0  ;;  %v3662_v0 = vpop.f32.mrf.mxu1 }
 0x24e   : > { %v3674_v1 = vadd.f32 %v3662_v0, %v3456_v55 }
 0x24f   : > { %v3626_v36 = vpop.f32.mrf.mxu0  ;;  %v5860_v32 = vpop.f32.mrf.mxu1 }
 0x251   : > { %v3665_v5 = vpop.f32.mrf.mxu1  ;;  %v3757_v15 = vpop.f32.mrf.mxu0 }
 0x252   : > { %v3886_v14 = vadd.f32 %v3757_v15, %v3668_v54 }
 0x253   : > { %v5861_v9 = vpop.f32.mrf.mxu1  ;;  %v3759_v51 = vpop.f32.mrf.mxu0 }
 0x254   : > { %v3887_v25 = vadd.f32 %v3759_v51, %v3669_v19 }
 0x255   : > { %v3761_v38 = vpop.f32.mrf.mxu0  ;;  %v3798_v30 = vpop.f32.mrf.mxu1 }
 0x256   : > { %v3888_v27 = vadd.f32 %v3798_v30, %v3670_v18 }
 0x257   : > { %v3762_v43 = vpop.f32.mrf.mxu0  ;;  %v3800_v53 = vpop.f32.mrf.mxu1 }
 0x258   : > { %v3889_v20 = vadd.f32 %v3800_v53, %v3671_v3 }
 0x259   : > { %v3802_v2 = vpop.f32.mrf.mxu1  ;;  %v3839_v6 = vpop.f32.mrf.mxu0 }
 0x25a   : > { %v3890_v48 = vadd.f32 %v3839_v6, %v3672_v10 }
 0x25b   : > { %v3803_v11 = vpop.f32.mrf.mxu1  ;;  %v3841_v22 = vpop.f32.mrf.mxu0 }
 0x25c   : > { %v3891_v42 = vadd.f32 %v3841_v22, %v3673_v24 }
 0x25d   : > { %v3843_v61 = vpop.f32.mrf.mxu0  ;;  %v3880_v59 = vpop.f32.mrf.mxu1 }
 0x25e   : > { %v3892_v58 = vadd.f32 %v3880_v59, %v3674_v1 }
 0x25f   : > { %v3844_v56 = vpop.f32.mrf.mxu0  ;;  %v5866_v39 = vpop.f32.mrf.mxu1 }
 0x261   : > { %v3883_v35 = vpop.f32.mrf.mxu1  ;;  %v3975_v8 = vpop.f32.mrf.mxu0 }
 0x262   : > { %v4104_v4 = vadd.f32 %v3975_v8, %v3886_v14 }
 0x263   : > { %v5867_v46 = vpop.f32.mrf.mxu1  ;;  %v3977_v44 = vpop.f32.mrf.mxu0 }
 0x264   : > { %v4105_v37 = vadd.f32 %v3977_v44, %v3887_v25 }
 0x265   : > { %v3979_v62 = vpop.f32.mrf.mxu0  ;;  %v4016_v63 = vpop.f32.mrf.mxu1 }
 0x266   : > { %v4106_v16 = vadd.f32 %v4016_v63, %v3888_v27 }
 0x267   : > { %v3980_v23 = vpop.f32.mrf.mxu0  ;;  %v4018_v41 = vpop.f32.mrf.mxu1 }
 0x268   : > { %v4107_v49 = vadd.f32 %v4018_v41, %v3889_v20 }
 0x269   : > { %v4020_v12 = vpop.f32.mrf.mxu1  ;;  %v4057_v21 = vpop.f32.mrf.mxu0 }
 0x26a   : > { %v4108_v60 = vadd.f32 %v4057_v21, %v3890_v48 }
 0x26b   : > { %v4021_v55 = vpop.f32.mrf.mxu1  ;;  %v4059_v33 = vpop.f32.mrf.mxu0 }
 0x26c   : > { %v4109_v26 = vadd.f32 %v4059_v33, %v3891_v42 }
 0x26d   : > { %v4061_v47 = vpop.f32.mrf.mxu0  ;;  %v4098_v52 = vpop.f32.mrf.mxu1 }
 0x26e   : > { %v4110_v54 = vadd.f32 %v4098_v52, %v3892_v58 }
 0x26f   : > { %v4062_v45 = vpop.f32.mrf.mxu0  ;;  %v5872_v31 = vpop.f32.mrf.mxu1 }
 0x271   : > { %v4101_v19 = vpop.f32.mrf.mxu1  ;;  %v4193_v13 = vpop.f32.mrf.mxu0 }
 0x272   : > { %v4322_v17 = vadd.f32 %v4193_v13, %v4104_v4 }
 0x273   : > { %v5873_v18 = vpop.f32.mrf.mxu1  ;;  %v4195_v50 = vpop.f32.mrf.mxu0 }
 0x274   : > { %v4323_v34 = vadd.f32 %v4195_v50, %v4105_v37 }
 0x275   : > { %v4197_v3 = vpop.f32.mrf.mxu0  ;;  %v4234_v29 = vpop.f32.mrf.mxu1 }
 0x276   : > { %v4324_v28 = vadd.f32 %v4234_v29, %v4106_v16 }
 0x277   : > { %v4198_v10 = vpop.f32.mrf.mxu0  ;;  %v4236_v57 = vpop.f32.mrf.mxu1 }
 0x278   : > { %v4325_v40 = vadd.f32 %v4236_v57, %v4107_v49 }
 0x279   : > { %v4238_v24 = vpop.f32.mrf.mxu1  ;;  %v4275_v7 = vpop.f32.mrf.mxu0 }
 0x27a   : > { %v4326_v0 = vadd.f32 %v4275_v7, %v4108_v60 }
 0x27b   : > { %v4239_v1 = vpop.f32.mrf.mxu1  ;;  %v4277_v36 = vpop.f32.mrf.mxu0 }
 0x27c   : > { %v4327_v32 = vadd.f32 %v4277_v36, %v4109_v26 }
 0x27d   : > { %v4279_v5 = vpop.f32.mrf.mxu0  ;;  %v4316_v15 = vpop.f32.mrf.mxu1 }
 0x27e   : > { %v4328_v14 = vadd.f32 %v4316_v15, %v4110_v54 }
 0x27f   : > { %v4280_v9 = vpop.f32.mrf.mxu0  ;;  %v5878_v51 = vpop.f32.mrf.mxu1 }
 0x281   : > { %v4319_v25 = vpop.f32.mrf.mxu1  ;;  %v4411_v38 = vpop.f32.mrf.mxu0 }
 0x282   : > { %v7088_v30 = vadd.f32 %v4411_v38, %v4322_v17 }
 0x283   : > { %v5879_v27 = vpop.f32.mrf.mxu1  ;;  %v4413_v43 = vpop.f32.mrf.mxu0 }
 0x284   : > { %v7090_v53 = vadd.f32 %v4413_v43, %v4323_v34 }
 0x285   : > { %v4415_v20 = vpop.f32.mrf.mxu0  ;;  %v4452_v2 = vpop.f32.mrf.mxu1 }
 0x286   : > { %v7092_v6 = vadd.f32 %v4452_v2, %v4324_v28 }
 0x287   : > { %v4416_v48 = vpop.f32.mrf.mxu0  ;;  %v4454_v11 = vpop.f32.mrf.mxu1 }
 0x288   : > { %v7094_v22 = vadd.f32 %v4454_v11, %v4325_v40 }
 0x289   : > { %v4456_v42 = vpop.f32.mrf.mxu1  ;;  %v4493_v61 = vpop.f32.mrf.mxu0 }
 0x28a   : > { %v7096_v59 = vadd.f32 %v4493_v61, %v4326_v0 }
 0x28b   : > { %v4457_v58 = vpop.f32.mrf.mxu1  ;;  %v4495_v56 = vpop.f32.mrf.mxu0 }
 0x28c   : > { %v7098_v39 = vadd.f32 %v4495_v56, %v4327_v32 }
 0x28d   : > { %v4497_v35 = vpop.f32.mrf.mxu0  ;;  %v4534_v8 = vpop.f32.mrf.mxu1 }
 0x28e   : > { %v7100_v4 = vadd.f32 %v4534_v8, %v4328_v14 }
 0x28f   : > { %v4498_v46 = vpop.f32.mrf.mxu0  ;;  %v5884_v44 = vpop.f32.mrf.mxu1 }
 0x291   : > { %v4537_v37 = vpop.f32.mrf.mxu1  ;;  %v4587_v62 = vpop.f32.mrf.mxu0 }
 0x293   : > { %v5885_v63 = vpop.f32.mrf.mxu1  ;;  %v4589_v16 = vpop.f32.mrf.mxu0 }
 0x294   : > { %v4716_v63 = vadd.f32 %v4587_v62, %v7088_v30  ;;  %v5445_v62 = vpop.permute.xlu0 %5444 }
 0x295   : > { %v4591_v23 = vpop.f32.mrf.mxu0  ;;  %v4628_v41 = vpop.f32.mrf.mxu1 }
 0x297   : > { %v4592_v49 = vpop.f32.mrf.mxu0  ;;  %v7102_v12 = vpop.f32.mrf.mxu1 }
 0x299   : > { %v4632_v21 = vpop.f32.mrf.mxu1  ;;  %v7104_v60 = vpop.f32.mrf.mxu0 }
 0x29a   : > { %v4717_v21 = vadd.f32 %v4589_v16, %v7090_v53  ;;  %v4720_v53 = vadd.f32 %v7104_v60, %v7096_v59 }
 0x29b   : > { %v4633_v55 = vpop.f32.mrf.mxu1  ;;  %v7106_v33 = vpop.f32.mrf.mxu0 }
 0x29d   : > { %v4673_v26 = vpop.f32.mrf.mxu0  ;;  %v7108_v47 = vpop.f32.mrf.mxu1 }
 0x29e   : > { %v4722_v59 = vadd.f32 %v7108_v47, %v7100_v4 }
 0x29f   : > { %v4674_v52 = vpop.f32.mrf.mxu0  ;;  %v5890_v54 = vpop.f32.mrf.mxu1 }
 0x2a0   : > { %v4718_v54 = vadd.f32 %v4628_v41, %v7092_v6 }
 0x2a1   : > { %v4713_v45 = vpop.f32.mrf.mxu1  ;;  %v4769_v31 = vpop.f32.mrf.mxu0 }
 0x2a2   : > { %v4898_v55 = vadd.f32 %v4769_v31, %v4716_v63 }
 0x2a3   : > { %v5891_v19 = vpop.f32.mrf.mxu1  ;;  %v4771_v13 = vpop.f32.mrf.mxu0 }
 0x2a4   : > { %v4899_v45 = vadd.f32 %v4771_v13, %v4717_v21  ;;  %v4721_v13 = vadd.f32 %v7106_v33, %v7098_v39 }
 0x2a5   : > { %v4773_v17 = vpop.f32.mrf.mxu0  ;;  %v4810_v18 = vpop.f32.mrf.mxu1 }
 0x2a7   : > { %v4774_v50 = vpop.f32.mrf.mxu0  ;;  %v4812_v34 = vpop.f32.mrf.mxu1 }
 0x2a9   : > { %v4814_v3 = vpop.f32.mrf.mxu1  ;;  %v4851_v29 = vpop.f32.mrf.mxu0 }
 0x2aa   : > { %v4719_v3 = vadd.f32 %v7102_v12, %v7094_v22 }
 0x2ab   : > { %v4815_v28 = vpop.f32.mrf.mxu1  ;;  %v7110_v10 = vpop.f32.mrf.mxu0 }
 0x2ac   : > { %v4900_v28 = vadd.f32 %v4810_v18, %v4718_v54  ;;  %v4903_v60 = vadd.f32 %v7110_v10, %v4721_v13 }
 0x2ad   : > { %v4855_v57 = vpop.f32.mrf.mxu0  ;;  %v7112_v40 = vpop.f32.mrf.mxu1 }
 0x2af   : > { %v4856_v24 = vpop.f32.mrf.mxu0  ;;  %v5896_v7 = vpop.f32.mrf.mxu1 }
 0x2b0   : > { %v4901_v24 = vadd.f32 %v4812_v34, %v4719_v3 }
 0x2b1   : > { %v4895_v0 = vpop.f32.mrf.mxu1  ;;  %v4948_v1 = vpop.f32.mrf.mxu0 }
 0x2b2   : > { %v5077_v19 = vadd.f32 %v4948_v1, %v4898_v55  ;;  %v4902_v0 = vadd.f32 %v4851_v29, %v4720_v53 }
 0x2b3   : > { %v5897_v36 = vpop.f32.mrf.mxu1  ;;  %v4950_v32 = vpop.f32.mrf.mxu0 }
 0x2b4   : > { %v5078_v57 = vadd.f32 %v4950_v32, %v4899_v45 }
 0x2b5   : > { %v4952_v5 = vpop.f32.mrf.mxu0  ;;  %v4989_v15 = vpop.f32.mrf.mxu1 }
 0x2b6   : > { %v5079_v7 = vadd.f32 %v4989_v15, %v4900_v28 }
 0x2b7   : > { %v4953_v14 = vpop.f32.mrf.mxu0  ;;  %v4991_v9 = vpop.f32.mrf.mxu1 }
 0x2b8   : > { %v5080_v12 = vadd.f32 %v4991_v9, %v4901_v24  ;;  %v4904_v9 = vadd.f32 %v7112_v40, %v4722_v59 }
 0x2b9   : > { %v4993_v51 = vpop.f32.mrf.mxu1  ;;  %v5030_v25 = vpop.f32.mrf.mxu0 }
 0x2ba   : > { %v5081_v5 = vadd.f32 %v5030_v25, %v4902_v0 }
 0x2bb   : > { %v4994_v38 = vpop.f32.mrf.mxu1  ;;  %v5032_v27 = vpop.f32.mrf.mxu0 }
 0x2bc   : > { %v5082_v51 = vadd.f32 %v5032_v27, %v4903_v60 }
 0x2bd   : > { %v5034_v43 = vpop.f32.mrf.mxu0  ;;  %v7114_v20 = vpop.f32.mrf.mxu1 }
 0x2bf   : > { %v5035_v2 = vpop.f32.mrf.mxu0  ;;  %v5902_v48 = vpop.f32.mrf.mxu1 }
 0x2c0   : > { %v5083_v2 = vadd.f32 %v7114_v20, %v4904_v9 }
 0x2c1   : > { %v5074_v11 = vpop.f32.mrf.mxu1  ;;  %v5127_v42 = vpop.f32.mrf.mxu0 }
 0x2c2   : > { %v5256_v30 = vadd.f32 %v5127_v42, %v5077_v19 }
 0x2c3   : > { %v5903_v61 = vpop.f32.mrf.mxu1  ;;  %v5129_v58 = vpop.f32.mrf.mxu0 }
 0x2c4   : > { %v5257_v6 = vadd.f32 %v5129_v58, %v5078_v57 }
 0x2c5   : > { %v5131_v56 = vpop.f32.mrf.mxu0  ;;  %v5168_v35 = vpop.f32.mrf.mxu1 }
 0x2c6   : > { %v5258_v18 = vadd.f32 %v5168_v35, %v5079_v7 }
 0x2c7   : > { %v5132_v8 = vpop.f32.mrf.mxu0  ;;  %v5170_v46 = vpop.f32.mrf.mxu1 }
 0x2c8   : > { %v5259_v34 = vadd.f32 %v5170_v46, %v5080_v12 }
 0x2c9   : > { %v5172_v44 = vpop.f32.mrf.mxu1  ;;  %v5209_v37 = vpop.f32.mrf.mxu0 }
 0x2ca   : > { %v5260_v10 = vadd.f32 %v5209_v37, %v5081_v5 }
 0x2cb   : > { %v5173_v23 = vpop.f32.mrf.mxu1  ;;  %v5211_v49 = vpop.f32.mrf.mxu0 }
 0x2cc   : > { %v5261_v42 = vadd.f32 %v5211_v49, %v5082_v51 }
 0x2cd   : > { %v5213_v26 = vpop.f32.mrf.mxu0  ;;  %v5250_v52 = vpop.f32.mrf.mxu1 }
 0x2ce   : > { %v5262_v35 = vadd.f32 %v5250_v52, %v5083_v2 }
 0x2cf   : > { %v5214_v17 = vpop.f32.mrf.mxu0  ;;  %v5908_v50 = vpop.f32.mrf.mxu1 }
 0x2d1   : > { %v5253_v16 = vpop.f32.mrf.mxu1  ;;  %v5306_v31 = vpop.f32.mrf.mxu0 }
 0x2d2   : > { %v5435_v41 = vadd.f32 %v5306_v31, %v5256_v30 }
 0x2d3   : > { %v5909_v1 = vpop.f32.mrf.mxu1  ;;  %v5308_v22 = vpop.f32.mrf.mxu0 }
 0x2d4   : > { %v5447_v36 = vadd.f32 %v5445_v62, %v5435_v41  ;;  %v5436_v32 = vadd.f32 %v5308_v22, %v5257_v6 }
 0x2d5   : > { %v5310_v39 = vpop.f32.mrf.mxu0  ;;  %v5347_v33 = vpop.f32.mrf.mxu1 }
 0x2d6   : > { %v5454_v29 = vmax.f32 %v5447_v36, 0.0  ;;  %v5448_v15 = vadd.f32 %v5445_v62, %v5436_v32  ;;  %v5437_v14 = vadd.f32 %v5347_v33, %v5258_v18 }
 0x2d7   : > { %v5311_v4 = vpop.f32.mrf.mxu0  ;;  %v5349_v47 = vpop.f32.mrf.mxu1 }
 0x2d8   : > { %5461 = vst [vmem:[%s7132_s16] sm:$0xff] %v5454_v29  ;;  %v5455_v25 = vmax.f32 %v5448_v15, 0.0  ;;  %v5449_v38 = vadd.f32 %v5445_v62, %v5437_v14  ;;  %v5438_v43 = vadd.f32 %v5349_v47, %v5259_v34 }
 0x2d9   : > { %v5351_v48 = vpop.f32.mrf.mxu1  ;;  %v5388_v11 = vpop.f32.mrf.mxu0 }
 0x2da   : > { %5462 = vst [vmem:[%s7132_s16 + $0x8] sm:$0xff] %v5455_v25  ;;  %v5456_v61 = vmax.f32 %v5449_v38, 0.0  ;;  %v5450_v58 = vadd.f32 %v5445_v62, %v5438_v43  ;;  %v5439_v56 = vadd.f32 %v5388_v11, %v5260_v10 }
 0x2db   : > { %v5352_v40 = vpop.f32.mrf.mxu1  ;;  %v5390_v27 = vpop.f32.mrf.mxu0 }
 0x2dc   : > { %5463 = vst [vmem:[%s7132_s16 + $0x10] sm:$0xff] %v5456_v61  ;;  %v5457_v8 = vmax.f32 %v5450_v58, 0.0  ;;  %v5451_v46 = vadd.f32 %v5445_v62, %v5439_v56  ;;  %v5440_v44 = vadd.f32 %v5390_v27, %v5261_v42 }
 0x2dd   : > { %v5392_v37 = vpop.f32.mrf.mxu0  ;;  %v5429_v20 = vpop.f32.mrf.mxu1 }
 0x2de   : > { %5464 = vst [vmem:[%s7132_s16 + $0x18] sm:$0xff] %v5457_v8  ;;  %v5458_v63 = vmax.f32 %v5451_v46, 0.0  ;;  %v5452_v23 = vadd.f32 %v5445_v62, %v5440_v44  ;;  %v5441_v49 = vadd.f32 %v5429_v20, %v5262_v35 }
 0x2df   : > { %v5393_v21 = vpop.f32.mrf.mxu0  ;;  %v5914_v55 = vpop.f32.mrf.mxu1 }
 0x2e0   : > { %5465 = vst [vmem:[%s7132_s16 + $0x20] sm:$0xff] %v5458_v63  ;;  %v5459_v26 = vmax.f32 %v5452_v23, 0.0  ;;  %v5453_v54 = vadd.f32 %v5445_v62, %v5441_v49 }
 0x2e1   : > { %v5432_v45 = vpop.f32.mrf.mxu1 }
 0x2e2   : > { %5466 = vst [vmem:[%s7132_s16 + $0x28] sm:$0xff] %v5459_v26  ;;  %v5460_v52 = vmax.f32 %v5453_v54, 0.0 }
 0x2e3   : > { %v5915_v19 = vpop.f32.mrf.mxu1 }
 0x2e4   : > { %5467 = vst [vmem:[%s7132_s16 + $0x30] sm:$0xff] %v5460_v52 }
 0x2e5 PF: > { %s13_s12 = sadd.s32 1, %s5964_s12  }
 0x2e6   : > { %p10_p4 = scmp.ge.s32.totalorder %s13_s12, 4  }
 0x2e8   :  { %12 = sbr.rel (!%p10_p4) target bundleno = 1 (0x1), region = 62 }

// kernel: net_forward.4
= control target key start
LH: loop header
LB: loop body
LE: loop exit
PB: predicated region body
PF: predicated region fallthrough
CT: control target
= control target key end

     0   :  { %s2176_s12 = smov 0   ;;  %s2434_s0 = inlined_call_operand.vmem [shape: bf16[2,8,200], index: 0, kind: input, shape index: {}]   ;;  %s2435_s1 = inlined_call_operand.vmem [shape: bf16[25,16,8], index: 1, kind: input, shape index: {}]   ;;  %s2436_s2 = inlined_call_operand.vmem [shape: f32[16,1], index: 2, kind: input, shape index: {}]   ;;  %s2437_s3 = inlined_call_operand.vmem [shape: f32[2,16,140], index: 3, kind: output, shape index: {}]  }
   0x1 LB: > { %s1971_s13 = sadd.s32 4294967295, %s2129_s12   ;;  %p1975_p0 = scmp.ge.s32.totalorder %s2129_s12, 1  ;;  %s2129_s12 = sphi %s2176_s12, %s13_s12  }
   0x2   : > { %p137_p1 = scmp.lt.s32.totalorder %s2129_s12, 3 }
   0x4   : > { %p138_p2 = pnand %p1975_p0, %p137_p1 }
   0x5   : > { %p161_p3 = scmp.lt.s32.totalorder (!%p138_p2), %s1971_s13, 1  ;;  %s2132_s18 = smov (!%p138_p2), 126  }
   0x6   : > { %141 = sbr.rel (%p138_p2) target bundleno = 443 (0x1bb), region = 32  ;;  %s2133_s19 = smov (!%p138_p2), 127  }
   0x7   : > { %s2134_s22 = smov (!%p138_p2), 125   ;;  %s2135_s23 = smov (!%p138_p2), 124  }
   0x8   : > { %s2136_s24 = smov (!%p138_p2), 114   ;;  %s2137_s25 = smov (!%p138_p2), 113  }
   0x9   : > { %s2138_s26 = smov (!%p138_p2), 112   ;;  %s2139_s27 = smov (!%p138_p2), 111  }
   0xa   : > { %s2140_s28 = smov (!%p138_p2), 110   ;;  %s2141_s29 = smov (!%p138_p2), 100  }
   0xb   : > { %s2439_s13 = smov (!%p161_p3, %s1971_s13), 1  ;;  %v2131_v0 = vmov 0   ;;  %vm245_vm0 = vcmask 1043456   ;;  %v2099_v5 = vld [vmem:[%s2435_s1] sm:$0xff]   ;;  %vm241_vm1 = vcmask 64512   ;;  %s2142_s30 = smov 99  }
   0xc   : > { %284 = vmatprep.mubr.bf16.mxu0 %v2131_v0  ;;  %341 = vmatprep.mubr.bf16.mxu1 %v2131_v0  ;;  %s2059_s14 = sshll.u32 %s2439_s13, 3  ;;  %s2143_s4 = smov 98   ;;  %v222_v6 = vld [vmem:[%s2436_s2] sm:$0xff]  ;;  %v223_v7 = vld [vmem:[%s2436_s2 + $0x8] sm:$0xff]  ;;  %vm361_vm2 = vcmask 1031168   ;;  %vm239_vm3 = vcmask 1039360  }
   0xd   : > { %2094 = vset.pattern.permute.xlu0 %v2131_v0  ;;  %2095 = vset.pattern.permute.xlu1 %v2131_v0  ;;  %s165_s17 = scalar_lea.vmem %s2434_s0, %s2059_s14  ;;  %s2144_s5 = smov 97   ;;  %v2098_v15 = vld [vmem:[%s2435_s1 + $0x8] sm:$0xff]   ;;  %vm428_vm4 = vcmask 1022976   ;;  %vm495_vm5 = vcmask 1014784   ;;  %v2101_v21 = vld [vmem:[%s2435_s1 + $0x18] sm:$0xff]   ;;  %v2100_v25 = vld [vmem:[%s2435_s1 + $0x10] sm:$0xff]  }
   0xe   : > { %v224_v1 = vld [vmem:[%s165_s17] sm:$0xff]  ;;  %s2145_s6 = smov 96   ;;  %s2146_s7 = smov 86   ;;  %vm562_vm6 = vcmask 932864   ;;  %vm629_vm7 = vcmask 924672   ;;  %v2103_v31 = vld [vmem:[%s2435_s1 + $0x28] sm:$0xff]  }
   0xf   : > { %v2194_v2 = vcombine.low %v224_v1, %v224_v1  ;;  %v2196_v3 = vcombine.high %v224_v1, %v224_v1  ;;  %s2147_s8 = smov 85   ;;  %s2148_s9 = smov 84   ;;  %v2102_v35 = vld [vmem:[%s2435_s1 + $0x20] sm:$0xff]   ;;  %vm696_vm8 = vcmask 916480   ;;  %vm763_vm9 = vcmask 908288   ;;  %v2105_v41 = vld [vmem:[%s2435_s1 + $0x38] sm:$0xff]  }
  0x10   : > { %s2149_s10 = smov 83   ;;  %s2150_s11 = smov 82   ;;  %v2104_v45 = vld [vmem:[%s2435_s1 + $0x30] sm:$0xff]   ;;  %vm830_vm10 = vcmask 900096   ;;  %vm897_vm11 = vcmask 818176   ;;  %v2107_v51 = vld [vmem:[%s2435_s1 + $0x48] sm:$0xff]  }
  0x11   : > { %357 = vrot.lane.b32.xlu1 %v2194_v2, %s2132_s18  ;;  %235 = vrot.lane.b32.xlu0 %v2194_v2, %s2133_s19  ;;  %v304_v4 = vsel %vm245_vm0, %v2194_v2, 0  ;;  %s2151_s14 = smov 72   ;;  %s2152_s15 = smov 71   ;;  %v2106_v55 = vld [vmem:[%s2435_s1 + $0x40] sm:$0xff]   ;;  %vm964_vm12 = vcmask 809984   ;;  %vm1031_vm13 = vcmask 801792  }
  0x12   : > { %1986 = vmatprep.subr.msk.bf16.mxu1 %vm245_vm0, %v2196_v3  ;;  %s2153_s16 = smov 70   ;;  %s2154_s17 = smov 69   ;;  %v2109_v61 = vld [vmem:[%s2435_s1 + $0x58] sm:$0xff]   ;;  %vm1098_vm14 = vcmask 793600   ;;  %vm1165_vm15 = vcmask 785408  }
  0x13   : > { %324 = vmatpush1.bf16.msra.mxu1 %v304_v4  ;;  %s2060_s21 = sshll.u32 %s2439_s13, 5 }
  0x15   : > { %359 = vrot.lane.b32.xlu1 %v2196_v3, %s2132_s18  ;;  %237 = vrot.lane.b32.xlu0 %v2196_v3, %s2133_s19  ;;  %s2155_s18 = smov 68  }
  0x16   : > { %1987 = vmatmul.mubr.msk.bf16.vlgmr.msra.gmra.mxu1 %vm241_vm1, %v2099_v5 }
  0x17   : > { %471 = vmatprep.mubr.bf16.mxu1 %v2131_v0 }
  0x19   : > { %426 = vrot.lane.b32.xlu1 %v2196_v3, %s2134_s22  ;;  %424 = vrot.lane.b32.xlu0 %v2194_v2, %s2134_s22 }
  0x1d   : > { %493 = vrot.lane.b32.xlu1 %v2196_v3, %s2135_s23  ;;  %491 = vrot.lane.b32.xlu0 %v2194_v2, %s2135_s23 }
  0x21   : > { %560 = vrot.lane.b32.xlu1 %v2196_v3, %s2136_s24  ;;  %558 = vrot.lane.b32.xlu0 %v2194_v2, %s2136_s24  ;;  %s170_s24 = scalar_lea.vmem %s2437_s3, %s2060_s21 }
  0x25   : > { %627 = vrot.lane.b32.xlu1 %v2196_v3, %s2137_s25  ;;  %625 = vrot.lane.b32.xlu0 %v2194_v2, %s2137_s25 }
  0x29   : > { %694 = vrot.lane.b32.xlu1 %v2196_v3, %s2138_s26  ;;  %692 = vrot.lane.b32.xlu0 %v2194_v2, %s2138_s26 }
  0x2d   : > { %761 = vrot.lane.b32.xlu1 %v2196_v3, %s2139_s27  ;;  %759 = vrot.lane.b32.xlu0 %v2194_v2, %s2139_s27 }
  0x31   : > { %828 = vrot.lane.b32.xlu1 %v2196_v3, %s2140_s28  ;;  %826 = vrot.lane.b32.xlu0 %v2194_v2, %s2140_s28 }
  0x35   : > { %895 = vrot.lane.b32.xlu1 %v2196_v3, %s2141_s29  ;;  %893 = vrot.lane.b32.xlu0 %v2194_v2, %s2141_s29 }
  0x39   : > { %962 = vrot.lane.b32.xlu1 %v2196_v3, %s2142_s30  ;;  %960 = vrot.lane.b32.xlu0 %v2194_v2, %s2142_s30 }
  0x3d   : > { %1029 = vrot.lane.b32.xlu1 %v2196_v3, %s2143_s4  ;;  %1027 = vrot.lane.b32.xlu0 %v2194_v2, %s2143_s4 }
  0x41   : > { %1096 = vrot.lane.b32.xlu1 %v2196_v3, %s2144_s5  ;;  %1094 = vrot.lane.b32.xlu0 %v2194_v2, %s2144_s5 }
  0x45   : > { %1163 = vrot.lane.b32.xlu1 %v2196_v3, %s2145_s6  ;;  %1161 = vrot.lane.b32.xlu0 %v2194_v2, %s2145_s6 }
  0x49   : > { %1230 = vrot.lane.b32.xlu1 %v2196_v3, %s2146_s7  ;;  %1228 = vrot.lane.b32.xlu0 %v2194_v2, %s2146_s7 }
  0x4d   : > { %1297 = vrot.lane.b32.xlu1 %v2196_v3, %s2147_s8  ;;  %1295 = vrot.lane.b32.xlu0 %v2194_v2, %s2147_s8 }
  0x51   : > { %1364 = vrot.lane.b32.xlu1 %v2196_v3, %s2148_s9  ;;  %1362 = vrot.lane.b32.xlu0 %v2194_v2, %s2148_s9 }
  0x55   : > { %1431 = vrot.lane.b32.xlu1 %v2196_v3, %s2149_s10  ;;  %1429 = vrot.lane.b32.xlu0 %v2194_v2, %s2149_s10 }
  0x59   : > { %1498 = vrot.lane.b32.xlu1 %v2196_v3, %s2150_s11  ;;  %1496 = vrot.lane.b32.xlu0 %v2194_v2, %s2150_s11 }
  0x5d   : > { %1565 = vrot.lane.b32.xlu1 %v2196_v3, %s2151_s14  ;;  %1563 = vrot.lane.b32.xlu0 %v2194_v2, %s2151_s14 }
  0x61   : > { %1632 = vrot.lane.b32.xlu1 %v2196_v3, %s2152_s15  ;;  %1630 = vrot.lane.b32.xlu0 %v2194_v2, %s2152_s15 }
  0x65   : > { %1699 = vrot.lane.b32.xlu1 %v2196_v3, %s2153_s16  ;;  %1697 = vrot.lane.b32.xlu0 %v2194_v2, %s2153_s16 }
  0x69   : > { %1766 = vrot.lane.b32.xlu1 %v2196_v3, %s2154_s17  ;;  %1764 = vrot.lane.b32.xlu0 %v2194_v2, %s2154_s17 }
  0x6d   : > { %1833 = vrot.lane.b32.xlu1 %v2196_v3, %s2155_s18  ;;  %1831 = vrot.lane.b32.xlu0 %v2194_v2, %s2155_s18  ;;  %v2108_v2 = vld [vmem:[%s2435_s1 + $0x50] sm:$0xff]  }
  0x71   : > { %1895 = vperm.xlu0 %2094, %v222_v6   ;;  %1900 = vperm.xlu1 %2095, %v223_v7  }
  0x83   : > { %v358_v8 = vpop.permute.xlu1 %357  ;;  %v236_v9 = vpop.permute.xlu0 %235 }
  0x87   : > { %v360_v10 = vpop.permute.xlu1 %359  ;;  %v238_v11 = vpop.permute.xlu0 %237 }
  0x88   : > { %v362_v12 = vsel %vm361_vm2, %v358_v8, %v360_v10  ;;  %1983 = vmatprep.subr.msk.bf16.mxu0 %vm245_vm0, %v238_v11  ;;  %v240_v13 = vsel %vm239_vm3, %v236_v9, %v238_v11  ;;  %v2111_v8 = vld [vmem:[%s2435_s1 + $0x68] sm:$0xff]   ;;  %vm1232_vm2 = vcmask 703488   ;;  %vm1299_vm3 = vcmask 695296  }
  0x89   : > { %v247_v14 = vsel %vm245_vm0, %v240_v13, 0  ;;  %v367_v16 = vsel %vm245_vm0, %v362_v12, 0  ;;  %v2110_v12 = vld [vmem:[%s2435_s1 + $0x60] sm:$0xff]  }
  0x8a   : > { %267 = vmatpush1.bf16.msra.mxu0 %v247_v14 }
  0x8b   : > { %1989 = vmatprep.subr.msk.bf16.mxu0 %vm245_vm0, %v360_v10  ;;  %v427_v17 = vpop.permute.xlu1 %426  ;;  %v425_v18 = vpop.permute.xlu0 %424 }
  0x8c   : > { %v429_v19 = vsel %vm428_vm4, %v425_v18, %v427_v17  ;;  %1992 = vmatprep.subr.msk.bf16.mxu1 %vm245_vm0, %v427_v17  ;;  %v2113_v18 = vld [vmem:[%s2435_s1 + $0x78] sm:$0xff]   ;;  %vm1366_vm4 = vcmask 687104  }
  0x8d   : > { %1984 = vmatmul.mubr.msk.bf16.vlgmr.msra.gmra.mxu0 %vm241_vm1, %v2098_v15  ;;  %v434_v20 = vsel %vm245_vm0, %v429_v19, 0 }
  0x8e   : > { %387 = vmatpush1.bf16.msra.mxu0 %v367_v16  ;;  %454 = vmatpush1.bf16.msra.mxu1 %v434_v20 }
  0x8f   : > { %v494_v22 = vpop.permute.xlu1 %493  ;;  %v492_v23 = vpop.permute.xlu0 %491  ;;  %404 = vmatprep.mubr.bf16.mxu0 %v2131_v0 }
  0x90   : > { %v496_v24 = vsel %vm495_vm5, %v492_v23, %v494_v22  ;;  %1995 = vmatprep.subr.msk.bf16.mxu0 %vm245_vm0, %v494_v22  ;;  %v2112_v22 = vld [vmem:[%s2435_s1 + $0x70] sm:$0xff]   ;;  %vm1433_vm5 = vcmask 678912  }
  0x91   : > { %1993 = vmatmul.mubr.msk.bf16.vlgmr.msra.gmra.mxu1 %vm241_vm1, %v2101_v21  ;;  %v501_v26 = vsel %vm245_vm0, %v496_v24, 0 }
  0x92   : > { %605 = vmatprep.mubr.bf16.mxu1 %v2131_v0 }
  0x93   : > { %v561_v27 = vpop.permute.xlu1 %560  ;;  %v559_v28 = vpop.permute.xlu0 %558 }
  0x94   : > { %v563_v29 = vsel %vm562_vm6, %v559_v28, %v561_v27  ;;  %1998 = vmatprep.subr.msk.bf16.mxu1 %vm245_vm0, %v561_v27  ;;  %v2115_v28 = vld [vmem:[%s2435_s1 + $0x88] sm:$0xff]   ;;  %vm1500_vm6 = vcmask 670720  }
  0x95   : > { %1990 = vmatmul.mubr.msk.bf16.vlgmr.msra.gmra.mxu0 %vm241_vm1, %v2100_v25  ;;  %v568_v30 = vsel %vm245_vm0, %v563_v29, 0 }
  0x96   : > { %521 = vmatpush1.bf16.msra.mxu0 %v501_v26  ;;  %588 = vmatpush1.bf16.msra.mxu1 %v568_v30 }
  0x97   : > { %v628_v32 = vpop.permute.xlu1 %627  ;;  %v626_v33 = vpop.permute.xlu0 %625  ;;  %538 = vmatprep.mubr.bf16.mxu0 %v2131_v0 }
  0x98   : > { %v630_v34 = vsel %vm629_vm7, %v626_v33, %v628_v32  ;;  %2001 = vmatprep.subr.msk.bf16.mxu0 %vm245_vm0, %v628_v32  ;;  %v2114_v32 = vld [vmem:[%s2435_s1 + $0x80] sm:$0xff]   ;;  %vm1567_vm7 = vcmask 588800  }
  0x99   : > { %1999 = vmatmul.mubr.msk.bf16.vlgmr.msra.gmra.mxu1 %vm241_vm1, %v2103_v31  ;;  %v635_v36 = vsel %vm245_vm0, %v630_v34, 0 }
  0x9a   : > { %739 = vmatprep.mubr.bf16.mxu1 %v2131_v0 }
  0x9b   : > { %v695_v37 = vpop.permute.xlu1 %694  ;;  %v693_v38 = vpop.permute.xlu0 %692 }
  0x9c   : > { %v697_v39 = vsel %vm696_vm8, %v693_v38, %v695_v37  ;;  %2004 = vmatprep.subr.msk.bf16.mxu1 %vm245_vm0, %v695_v37  ;;  %v2117_v38 = vld [vmem:[%s2435_s1 + $0x98] sm:$0xff]   ;;  %vm1634_vm8 = vcmask 580608  }
  0x9d   : > { %1996 = vmatmul.mubr.msk.bf16.vlgmr.msra.gmra.mxu0 %vm241_vm1, %v2102_v35  ;;  %v702_v40 = vsel %vm245_vm0, %v697_v39, 0 }
  0x9e   : > { %655 = vmatpush1.bf16.msra.mxu0 %v635_v36  ;;  %722 = vmatpush1.bf16.msra.mxu1 %v702_v40 }
  0x9f   : > { %v762_v42 = vpop.permute.xlu1 %761  ;;  %v760_v43 = vpop.permute.xlu0 %759  ;;  %672 = vmatprep.mubr.bf16.mxu0 %v2131_v0 }
  0xa0   : > { %v764_v44 = vsel %vm763_vm9, %v760_v43, %v762_v42  ;;  %2007 = vmatprep.subr.msk.bf16.mxu0 %vm245_vm0, %v762_v42  ;;  %v2116_v42 = vld [vmem:[%s2435_s1 + $0x90] sm:$0xff]   ;;  %vm1701_vm9 = vcmask 572416  }
  0xa1   : > { %2005 = vmatmul.mubr.msk.bf16.vlgmr.msra.gmra.mxu1 %vm241_vm1, %v2105_v41  ;;  %v769_v46 = vsel %vm245_vm0, %v764_v44, 0 }
  0xa2   : > { %873 = vmatprep.mubr.bf16.mxu1 %v2131_v0 }
  0xa3   : > { %v829_v47 = vpop.permute.xlu1 %828  ;;  %v827_v48 = vpop.permute.xlu0 %826 }
  0xa4   : > { %v831_v49 = vsel %vm830_vm10, %v827_v48, %v829_v47  ;;  %2010 = vmatprep.subr.msk.bf16.mxu1 %vm245_vm0, %v829_v47  ;;  %v2119_v48 = vld [vmem:[%s2435_s1 + $0xa8] sm:$0xff]   ;;  %vm1768_vm10 = vcmask 564224  }
  0xa5   : > { %2002 = vmatmul.mubr.msk.bf16.vlgmr.msra.gmra.mxu0 %vm241_vm1, %v2104_v45  ;;  %v836_v50 = vsel %vm245_vm0, %v831_v49, 0 }
  0xa6   : > { %789 = vmatpush1.bf16.msra.mxu0 %v769_v46  ;;  %856 = vmatpush1.bf16.msra.mxu1 %v836_v50 }
  0xa7   : > { %v896_v52 = vpop.permute.xlu1 %895  ;;  %v894_v53 = vpop.permute.xlu0 %893  ;;  %806 = vmatprep.mubr.bf16.mxu0 %v2131_v0 }
  0xa8   : > { %v898_v54 = vsel %vm897_vm11, %v894_v53, %v896_v52  ;;  %2013 = vmatprep.subr.msk.bf16.mxu0 %vm245_vm0, %v896_v52  ;;  %v2118_v52 = vld [vmem:[%s2435_s1 + $0xa0] sm:$0xff]   ;;  %vm1835_vm11 = vcmask 556032  }
  0xa9   : > { %2011 = vmatmul.mubr.msk.bf16.vlgmr.msra.gmra.mxu1 %vm241_vm1, %v2107_v51  ;;  %v903_v56 = vsel %vm245_vm0, %v898_v54, 0 }
  0xaa   : > { %1007 = vmatprep.mubr.bf16.mxu1 %v2131_v0 }
  0xab   : > { %v963_v57 = vpop.permute.xlu1 %962  ;;  %v961_v58 = vpop.permute.xlu0 %960 }
  0xac   : > { %v965_v59 = vsel %vm964_vm12, %v961_v58, %v963_v57  ;;  %2016 = vmatprep.subr.msk.bf16.mxu1 %vm245_vm0, %v963_v57  ;;  %v2121_v58 = vld [vmem:[%s2435_s1 + $0xb8] sm:$0xff]  }
  0xad   : > { %2008 = vmatmul.mubr.msk.bf16.vlgmr.msra.gmra.mxu0 %vm241_vm1, %v2106_v55  ;;  %v970_v60 = vsel %vm245_vm0, %v965_v59, 0 }
  0xae   : > { %923 = vmatpush1.bf16.msra.mxu0 %v903_v56  ;;  %990 = vmatpush1.bf16.msra.mxu1 %v970_v60 }
  0xaf   : > { %v1030_v62 = vpop.permute.xlu1 %1029  ;;  %v1028_v63 = vpop.permute.xlu0 %1027  ;;  %940 = vmatprep.mubr.bf16.mxu0 %v2131_v0 }
  0xb0   : > { %v1032_v1 = vsel %vm1031_vm13, %v1028_v63, %v1030_v62  ;;  %2019 = vmatprep.subr.msk.bf16.mxu0 %vm245_vm0, %v1030_v62  ;;  %v2120_v62 = vld [vmem:[%s2435_s1 + $0xb0] sm:$0xff]  }
  0xb1   : > { %2017 = vmatmul.mubr.msk.bf16.vlgmr.msra.gmra.mxu1 %vm241_vm1, %v2109_v61  ;;  %v1037_v3 = vsel %vm245_vm0, %v1032_v1, 0  ;;  %v2122_v1 = vld [vmem:[%s2435_s1 + $0xc0] sm:$0xff]  }
  0xb2   : > { %1141 = vmatprep.mubr.bf16.mxu1 %v2131_v0 }
  0xb3   : > { %v1097_v4 = vpop.permute.xlu1 %1096  ;;  %v1095_v5 = vpop.permute.xlu0 %1094 }
  0xb4   : > { %v1099_v6 = vsel %vm1098_vm14, %v1095_v5, %v1097_v4  ;;  %2022 = vmatprep.subr.msk.bf16.mxu1 %vm245_vm0, %v1097_v4 }
  0xb5   : > { %2014 = vmatmul.mubr.msk.bf16.vlgmr.msra.gmra.mxu0 %vm241_vm1, %v2108_v2  ;;  %v1104_v7 = vsel %vm245_vm0, %v1099_v6, 0 }
  0xb6   : > { %1057 = vmatpush1.bf16.msra.mxu0 %v1037_v3  ;;  %1124 = vmatpush1.bf16.msra.mxu1 %v1104_v7 }
  0xb7   : > { %v1164_v9 = vpop.permute.xlu1 %1163  ;;  %v1162_v10 = vpop.permute.xlu0 %1161  ;;  %1074 = vmatprep.mubr.bf16.mxu0 %v2131_v0 }
  0xb8   : > { %v1166_v11 = vsel %vm1165_vm15, %v1162_v10, %v1164_v9  ;;  %2025 = vmatprep.subr.msk.bf16.mxu0 %vm245_vm0, %v1164_v9 }
  0xb9   : > { %2023 = vmatmul.mubr.msk.bf16.vlgmr.msra.gmra.mxu1 %vm241_vm1, %v2111_v8  ;;  %v1171_v13 = vsel %vm245_vm0, %v1166_v11, 0 }
  0xba   : > { %1275 = vmatprep.mubr.bf16.mxu1 %v2131_v0 }
  0xbb   : > { %v1231_v14 = vpop.permute.xlu1 %1230  ;;  %v1229_v15 = vpop.permute.xlu0 %1228 }
  0xbc   : > { %v1233_v16 = vsel %vm1232_vm2, %v1229_v15, %v1231_v14  ;;  %2028 = vmatprep.subr.msk.bf16.mxu1 %vm245_vm0, %v1231_v14 }
  0xbd   : > { %2020 = vmatmul.mubr.msk.bf16.vlgmr.msra.gmra.mxu0 %vm241_vm1, %v2110_v12  ;;  %v1238_v17 = vsel %vm245_vm0, %v1233_v16, 0 }
  0xbe   : > { %1191 = vmatpush1.bf16.msra.mxu0 %v1171_v13  ;;  %1258 = vmatpush1.bf16.msra.mxu1 %v1238_v17 }
  0xbf   : > { %v1298_v19 = vpop.permute.xlu1 %1297  ;;  %v1296_v20 = vpop.permute.xlu0 %1295  ;;  %1208 = vmatprep.mubr.bf16.mxu0 %v2131_v0 }
  0xc0   : > { %v1300_v21 = vsel %vm1299_vm3, %v1296_v20, %v1298_v19  ;;  %2031 = vmatprep.subr.msk.bf16.mxu0 %vm245_vm0, %v1298_v19 }
  0xc1   : > { %2029 = vmatmul.mubr.msk.bf16.vlgmr.msra.gmra.mxu1 %vm241_vm1, %v2113_v18  ;;  %v1305_v23 = vsel %vm245_vm0, %v1300_v21, 0 }
  0xc2   : > { %1409 = vmatprep.mubr.bf16.mxu1 %v2131_v0 }
  0xc3   : > { %v1365_v24 = vpop.permute.xlu1 %1364  ;;  %v1363_v25 = vpop.permute.xlu0 %1362 }
  0xc4   : > { %v1367_v26 = vsel %vm1366_vm4, %v1363_v25, %v1365_v24  ;;  %2034 = vmatprep.subr.msk.bf16.mxu1 %vm245_vm0, %v1365_v24 }
  0xc5   : > { %2026 = vmatmul.mubr.msk.bf16.vlgmr.msra.gmra.mxu0 %vm241_vm1, %v2112_v22  ;;  %v1372_v27 = vsel %vm245_vm0, %v1367_v26, 0 }
  0xc6   : > { %1325 = vmatpush1.bf16.msra.mxu0 %v1305_v23  ;;  %1392 = vmatpush1.bf16.msra.mxu1 %v1372_v27 }
  0xc7   : > { %v1432_v29 = vpop.permute.xlu1 %1431  ;;  %v1430_v30 = vpop.permute.xlu0 %1429  ;;  %1342 = vmatprep.mubr.bf16.mxu0 %v2131_v0 }
  0xc8   : > { %v1434_v31 = vsel %vm1433_vm5, %v1430_v30, %v1432_v29  ;;  %2037 = vmatprep.subr.msk.bf16.mxu0 %vm245_vm0, %v1432_v29 }
  0xc9   : > { %2035 = vmatmul.mubr.msk.bf16.vlgmr.msra.gmra.mxu1 %vm241_vm1, %v2115_v28  ;;  %v1439_v33 = vsel %vm245_vm0, %v1434_v31, 0 }
  0xca   : > { %1543 = vmatprep.mubr.bf16.mxu1 %v2131_v0 }
  0xcb   : > { %v1499_v34 = vpop.permute.xlu1 %1498  ;;  %v1497_v35 = vpop.permute.xlu0 %1496 }
  0xcc   : > { %v1501_v36 = vsel %vm1500_vm6, %v1497_v35, %v1499_v34  ;;  %2040 = vmatprep.subr.msk.bf16.mxu1 %vm245_vm0, %v1499_v34 }
  0xcd   : > { %2032 = vmatmul.mubr.msk.bf16.vlgmr.msra.gmra.mxu0 %vm241_vm1, %v2114_v32  ;;  %v1506_v37 = vsel %vm245_vm0, %v1501_v36, 0 }
  0xce   : > { %1459 = vmatpush1.bf16.msra.mxu0 %v1439_v33  ;;  %1526 = vmatpush1.bf16.msra.mxu1 %v1506_v37 }
  0xcf   : > { %v1566_v39 = vpop.permute.xlu1 %1565  ;;  %v1564_v40 = vpop.permute.xlu0 %1563  ;;  %1476 = vmatprep.mubr.bf16.mxu0 %v2131_v0 }
  0xd0   : > { %v1568_v41 = vsel %vm1567_vm7, %v1564_v40, %v1566_v39  ;;  %2043 = vmatprep.subr.msk.bf16.mxu0 %vm245_vm0, %v1566_v39 }
  0xd1   : > { %2041 = vmatmul.mubr.msk.bf16.vlgmr.msra.gmra.mxu1 %vm241_vm1, %v2117_v38  ;;  %v1573_v43 = vsel %vm245_vm0, %v1568_v41, 0 }
  0xd2   : > { %1677 = vmatprep.mubr.bf16.mxu1 %v2131_v0 }
  0xd3   : > { %v1633_v44 = vpop.permute.xlu1 %1632  ;;  %v1631_v45 = vpop.permute.xlu0 %1630 }
  0xd4   : > { %v1635_v46 = vsel %vm1634_vm8, %v1631_v45, %v1633_v44  ;;  %2046 = vmatprep.subr.msk.bf16.mxu1 %vm245_vm0, %v1633_v44 }
  0xd5   : > { %2038 = vmatmul.mubr.msk.bf16.vlgmr.msra.gmra.mxu0 %vm241_vm1, %v2116_v42  ;;  %v1640_v47 = vsel %vm245_vm0, %v1635_v46, 0 }
  0xd6   : > { %1593 = vmatpush1.bf16.msra.mxu0 %v1573_v43  ;;  %1660 = vmatpush1.bf16.msra.mxu1 %v1640_v47  ;;  %v343_v2 = vpop.f32.mrf.mxu1 }
  0xd7   : > { %v1700_v49 = vpop.permute.xlu1 %1699  ;;  %v1698_v50 = vpop.permute.xlu0 %1697  ;;  %1610 = vmatprep.mubr.bf16.mxu0 %v2131_v0 }
  0xd8   : > { %v1702_v51 = vsel %vm1701_vm9, %v1698_v50, %v1700_v49  ;;  %2049 = vmatprep.subr.msk.bf16.mxu0 %vm245_vm0, %v1700_v49  ;;  %v345_v3 = vpop.f32.mrf.mxu1 }
  0xd9   : > { %2047 = vmatmul.mubr.msk.bf16.vlgmr.msra.gmra.mxu1 %vm241_vm1, %v2119_v48  ;;  %v1707_v53 = vsel %vm245_vm0, %v1702_v51, 0 }
  0xda   : > { %1811 = vmatprep.mubr.bf16.mxu1 %v2131_v0  ;;  %v347_v4 = vpop.f32.mrf.mxu1 }
  0xdb   : > { %v1767_v54 = vpop.permute.xlu1 %1766  ;;  %v1765_v55 = vpop.permute.xlu0 %1764 }
  0xdc   : > { %v1769_v56 = vsel %vm1768_vm10, %v1765_v55, %v1767_v54  ;;  %2052 = vmatprep.subr.msk.bf16.mxu1 %vm245_vm0, %v1767_v54  ;;  %v349_v6 = vpop.f32.mrf.mxu1 }
  0xdd   : > { %2044 = vmatmul.mubr.msk.bf16.vlgmr.msra.gmra.mxu0 %vm241_vm1, %v2118_v52  ;;  %v1774_v57 = vsel %vm245_vm0, %v1769_v56, 0 }
  0xde   : > { %1727 = vmatpush1.bf16.msra.mxu0 %v1707_v53  ;;  %1794 = vmatpush1.bf16.msra.mxu1 %v1774_v57 }
  0xdf   : > { %v1834_v59 = vpop.permute.xlu1 %1833  ;;  %v1832_v60 = vpop.permute.xlu0 %1831  ;;  %1744 = vmatprep.mubr.bf16.mxu0 %v2131_v0 }
  0xe0   : > { %v1836_v61 = vsel %vm1835_vm11, %v1832_v60, %v1834_v59  ;;  %2055 = vmatprep.subr.msk.bf16.mxu0 %vm245_vm0, %v1834_v59 }
  0xe1   : > { %2053 = vmatmul.mubr.msk.bf16.vlgmr.msra.gmra.mxu1 %vm241_vm1, %v2121_v58  ;;  %v1841_v63 = vsel %vm245_vm0, %v1836_v61, 0  ;;  %vm1912_vm0 = vcmask 97280  }
  0xe5   : > { %2050 = vmatmul.mubr.msk.bf16.vlgmr.msra.gmra.mxu0 %vm241_vm1, %v2120_v62 }
  0xe6   : > { %1861 = vmatpush1.bf16.msra.mxu0 %v1841_v63  ;;  %1878 = vmatprep.mubr.bf16.mxu0 %v2131_v0 }
  0xed   : > { %2056 = vmatmul.mubr.msk.bf16.vlgmr.msra.gmra.mxu0 %vm241_vm1, %v2122_v1 }
 0x14d   : > { %v286_v5 = vpop.f32.mrf.mxu0 }
 0x14e   : > { %v344_v33 = vadd.f32 %v343_v2, %v286_v5 }
 0x14f   : > { %v288_v7 = vpop.f32.mrf.mxu0 }
 0x150   : > { %v346_v36 = vadd.f32 %v345_v3, %v288_v7 }
 0x151   : > { %v290_v8 = vpop.f32.mrf.mxu0  ;;  %v473_v9 = vpop.f32.mrf.mxu1 }
 0x152   : > { %v348_v40 = vadd.f32 %v347_v4, %v290_v8 }
 0x153   : > { %v292_v10 = vpop.f32.mrf.mxu0  ;;  %v475_v11 = vpop.f32.mrf.mxu1 }
 0x154   : > { %v350_v44 = vadd.f32 %v349_v6, %v292_v10 }
 0x155   : > { %v406_v12 = vpop.f32.mrf.mxu0  ;;  %v477_v13 = vpop.f32.mrf.mxu1 }
 0x156   : > { %v415_v37 = vadd.f32 %v406_v12, %v344_v33 }
 0x157   : > { %v408_v14 = vpop.f32.mrf.mxu0  ;;  %v479_v0 = vpop.f32.mrf.mxu1 }
 0x158   : > { %v416_v41 = vadd.f32 %v408_v14, %v346_v36  ;;  %v482_v45 = vadd.f32 %v473_v9, %v415_v37 }
 0x159   : > { %v410_v15 = vpop.f32.mrf.mxu0  ;;  %v607_v16 = vpop.f32.mrf.mxu1 }
 0x15a   : > { %v417_v46 = vadd.f32 %v410_v15, %v348_v40  ;;  %v483_v49 = vadd.f32 %v475_v11, %v416_v41 }
 0x15b   : > { %v412_v17 = vpop.f32.mrf.mxu0  ;;  %v609_v18 = vpop.f32.mrf.mxu1 }
 0x15c   : > { %v418_v50 = vadd.f32 %v412_v17, %v350_v44  ;;  %v484_v54 = vadd.f32 %v477_v13, %v417_v46 }
 0x15d   : > { %v540_v19 = vpop.f32.mrf.mxu0  ;;  %v611_v20 = vpop.f32.mrf.mxu1 }
 0x15e   : > { %v549_v51 = vadd.f32 %v540_v19, %v482_v45  ;;  %v485_v58 = vadd.f32 %v479_v0, %v418_v50 }
 0x15f   : > { %v542_v21 = vpop.f32.mrf.mxu0  ;;  %v613_v22 = vpop.f32.mrf.mxu1 }
 0x160   : > { %v550_v55 = vadd.f32 %v542_v21, %v483_v49  ;;  %v616_v59 = vadd.f32 %v607_v16, %v549_v51 }
 0x161   : > { %v544_v23 = vpop.f32.mrf.mxu0  ;;  %v741_v24 = vpop.f32.mrf.mxu1 }
 0x162   : > { %v551_v60 = vadd.f32 %v544_v23, %v484_v54  ;;  %v617_v63 = vadd.f32 %v609_v18, %v550_v55 }
 0x163   : > { %v546_v25 = vpop.f32.mrf.mxu0  ;;  %v743_v26 = vpop.f32.mrf.mxu1 }
 0x164   : > { %v552_v1 = vadd.f32 %v546_v25, %v485_v58  ;;  %v618_v5 = vadd.f32 %v611_v20, %v551_v60 }
 0x165   : > { %v674_v27 = vpop.f32.mrf.mxu0  ;;  %v745_v28 = vpop.f32.mrf.mxu1 }
 0x166   : > { %v683_v2 = vadd.f32 %v674_v27, %v616_v59  ;;  %v619_v9 = vadd.f32 %v613_v22, %v552_v1 }
 0x167   : > { %v676_v29 = vpop.f32.mrf.mxu0  ;;  %v747_v30 = vpop.f32.mrf.mxu1 }
 0x168   : > { %v684_v6 = vadd.f32 %v676_v29, %v617_v63  ;;  %v750_v10 = vadd.f32 %v741_v24, %v683_v2 }
 0x169   : > { %v678_v31 = vpop.f32.mrf.mxu0  ;;  %v875_v32 = vpop.f32.mrf.mxu1 }
 0x16a   : > { %v685_v11 = vadd.f32 %v678_v31, %v618_v5  ;;  %v751_v14 = vadd.f32 %v743_v26, %v684_v6 }
 0x16b   : > { %v680_v34 = vpop.f32.mrf.mxu0  ;;  %v877_v35 = vpop.f32.mrf.mxu1 }
 0x16c   : > { %v686_v0 = vadd.f32 %v680_v34, %v619_v9  ;;  %v752_v19 = vadd.f32 %v745_v28, %v685_v11 }
 0x16d   : > { %v808_v38 = vpop.f32.mrf.mxu0  ;;  %v879_v39 = vpop.f32.mrf.mxu1 }
 0x16e   : > { %v817_v15 = vadd.f32 %v808_v38, %v750_v10  ;;  %v753_v25 = vadd.f32 %v747_v30, %v686_v0 }
 0x16f   : > { %v810_v42 = vpop.f32.mrf.mxu0  ;;  %v881_v43 = vpop.f32.mrf.mxu1 }
 0x170   : > { %v818_v18 = vadd.f32 %v810_v42, %v751_v14  ;;  %v884_v27 = vadd.f32 %v875_v32, %v817_v15 }
 0x171   : > { %v812_v47 = vpop.f32.mrf.mxu0  ;;  %v1009_v48 = vpop.f32.mrf.mxu1 }
 0x172   : > { %v819_v20 = vadd.f32 %v812_v47, %v752_v19  ;;  %v885_v36 = vadd.f32 %v877_v35, %v818_v18 }
 0x173   : > { %v814_v52 = vpop.f32.mrf.mxu0  ;;  %v1011_v53 = vpop.f32.mrf.mxu1 }
 0x174   : > { %v820_v22 = vadd.f32 %v814_v52, %v753_v25  ;;  %v886_v40 = vadd.f32 %v879_v39, %v819_v20 }
 0x175   : > { %v942_v56 = vpop.f32.mrf.mxu0  ;;  %v1013_v57 = vpop.f32.mrf.mxu1 }
 0x176   : > { %v951_v24 = vadd.f32 %v942_v56, %v884_v27  ;;  %v887_v41 = vadd.f32 %v881_v43, %v820_v22 }
 0x177   : > { %v944_v61 = vpop.f32.mrf.mxu0  ;;  %v1015_v62 = vpop.f32.mrf.mxu1 }
 0x178   : > { %v952_v26 = vadd.f32 %v944_v61, %v885_v36  ;;  %v1018_v44 = vadd.f32 %v1009_v48, %v951_v24 }
 0x179   : > { %v946_v3 = vpop.f32.mrf.mxu0  ;;  %v1143_v4 = vpop.f32.mrf.mxu1 }
 0x17a   : > { %v953_v28 = vadd.f32 %v946_v3, %v886_v40  ;;  %v1019_v46 = vadd.f32 %v1011_v53, %v952_v26 }
 0x17b   : > { %v948_v7 = vpop.f32.mrf.mxu0  ;;  %v1145_v8 = vpop.f32.mrf.mxu1 }
 0x17c   : > { %v954_v30 = vadd.f32 %v948_v7, %v887_v41  ;;  %v1020_v50 = vadd.f32 %v1013_v57, %v953_v28 }
 0x17d   : > { %v1076_v12 = vpop.f32.mrf.mxu0  ;;  %v1147_v13 = vpop.f32.mrf.mxu1 }
 0x17e   : > { %v1085_v32 = vadd.f32 %v1076_v12, %v1018_v44  ;;  %v1021_v54 = vadd.f32 %v1015_v62, %v954_v30 }
 0x17f   : > { %v1078_v16 = vpop.f32.mrf.mxu0  ;;  %v1149_v17 = vpop.f32.mrf.mxu1 }
 0x180   : > { %v1086_v35 = vadd.f32 %v1078_v16, %v1019_v46  ;;  %v1152_v55 = vadd.f32 %v1143_v4, %v1085_v32 }
 0x181   : > { %v1080_v21 = vpop.f32.mrf.mxu0  ;;  %v1277_v23 = vpop.f32.mrf.mxu1 }
 0x182   : > { %v1087_v39 = vadd.f32 %v1080_v21, %v1020_v50  ;;  %v1153_v59 = vadd.f32 %v1145_v8, %v1086_v35 }
 0x183   : > { %v1082_v29 = vpop.f32.mrf.mxu0  ;;  %v1279_v33 = vpop.f32.mrf.mxu1 }
 0x184   : > { %v1088_v43 = vadd.f32 %v1082_v29, %v1021_v54  ;;  %v1154_v63 = vadd.f32 %v1147_v13, %v1087_v39 }
 0x185   : > { %v1210_v31 = vpop.f32.mrf.mxu0  ;;  %v1281_v37 = vpop.f32.mrf.mxu1 }
 0x186   : > { %v1219_v48 = vadd.f32 %v1210_v31, %v1152_v55  ;;  %v1155_v3 = vadd.f32 %v1149_v17, %v1088_v43 }
 0x187   : > { %v1212_v34 = vpop.f32.mrf.mxu0  ;;  %v1283_v38 = vpop.f32.mrf.mxu1 }
 0x188   : > { %v1220_v53 = vadd.f32 %v1212_v34, %v1153_v59  ;;  %v1286_v5 = vadd.f32 %v1277_v23, %v1219_v48  ;;  %v1896_v59 = vpop.permute.xlu0 %1895 }
 0x189   : > { %v1214_v42 = vpop.f32.mrf.mxu0  ;;  %v1411_v45 = vpop.f32.mrf.mxu1 }
 0x18a   : > { %v1221_v57 = vadd.f32 %v1214_v42, %v1154_v63  ;;  %v1287_v9 = vadd.f32 %v1279_v33, %v1220_v53 }
 0x18b   : > { %v1216_v47 = vpop.f32.mrf.mxu0  ;;  %v1413_v49 = vpop.f32.mrf.mxu1 }
 0x18c   : > { %v1222_v62 = vadd.f32 %v1216_v47, %v1155_v3  ;;  %v1288_v12 = vadd.f32 %v1281_v37, %v1221_v57 }
 0x18d   : > { %v1344_v51 = vpop.f32.mrf.mxu0  ;;  %v1415_v52 = vpop.f32.mrf.mxu1 }
 0x18e   : > { %v1353_v4 = vadd.f32 %v1344_v51, %v1286_v5  ;;  %v1289_v15 = vadd.f32 %v1283_v38, %v1222_v62  ;;  %v1901_v5 = vpop.permute.xlu1 %1900 }
 0x18f   : > { %v1346_v56 = vpop.f32.mrf.mxu0  ;;  %v1417_v58 = vpop.f32.mrf.mxu1 }
 0x190   : > { %v1354_v8 = vadd.f32 %v1346_v56, %v1287_v9  ;;  %v1420_v16 = vadd.f32 %v1411_v45, %v1353_v4 }
 0x191   : > { %v1348_v60 = vpop.f32.mrf.mxu0  ;;  %v1545_v61 = vpop.f32.mrf.mxu1 }
 0x192   : > { %v1355_v13 = vadd.f32 %v1348_v60, %v1288_v12  ;;  %v1421_v21 = vadd.f32 %v1413_v49, %v1354_v8 }
 0x193   : > { %v1350_v1 = vpop.f32.mrf.mxu0  ;;  %v1547_v2 = vpop.f32.mrf.mxu1 }
 0x194   : > { %v1356_v17 = vadd.f32 %v1350_v1, %v1289_v15  ;;  %v1422_v20 = vadd.f32 %v1415_v52, %v1355_v13 }
 0x195   : > { %v1478_v6 = vpop.f32.mrf.mxu0  ;;  %v1549_v7 = vpop.f32.mrf.mxu1 }
 0x196   : > { %v1487_v23 = vadd.f32 %v1478_v6, %v1420_v16  ;;  %v1423_v36 = vadd.f32 %v1417_v58, %v1356_v17 }
 0x197   : > { %v1480_v10 = vpop.f32.mrf.mxu0  ;;  %v1551_v11 = vpop.f32.mrf.mxu1 }
 0x198   : > { %v1488_v29 = vadd.f32 %v1480_v10, %v1421_v21  ;;  %v1554_v22 = vadd.f32 %v1545_v61, %v1487_v23 }
 0x199   : > { %v1482_v14 = vpop.f32.mrf.mxu0  ;;  %v1679_v0 = vpop.f32.mrf.mxu1 }
 0x19a   : > { %v1489_v24 = vadd.f32 %v1482_v14, %v1422_v20  ;;  %v1555_v40 = vadd.f32 %v1547_v2, %v1488_v29 }
 0x19b   : > { %v1484_v19 = vpop.f32.mrf.mxu0  ;;  %v1681_v18 = vpop.f32.mrf.mxu1 }
 0x19c   : > { %v1490_v26 = vadd.f32 %v1484_v19, %v1423_v36  ;;  %v1556_v41 = vadd.f32 %v1549_v7, %v1489_v24 }
 0x19d   : > { %v1612_v25 = vpop.f32.mrf.mxu0  ;;  %v1683_v27 = vpop.f32.mrf.mxu1 }
 0x19e   : > { %v1621_v34 = vadd.f32 %v1612_v25, %v1554_v22  ;;  %v1557_v45 = vadd.f32 %v1551_v11, %v1490_v26 }
 0x19f   : > { %v1614_v33 = vpop.f32.mrf.mxu0  ;;  %v1685_v37 = vpop.f32.mrf.mxu1 }
 0x1a0   : > { %v1622_v44 = vadd.f32 %v1614_v33, %v1555_v40  ;;  %v1688_v46 = vadd.f32 %v1679_v0, %v1621_v34 }
 0x1a1   : > { %v1616_v31 = vpop.f32.mrf.mxu0  ;;  %v1813_v42 = vpop.f32.mrf.mxu1 }
 0x1a2   : > { %v1623_v30 = vadd.f32 %v1616_v31, %v1556_v41  ;;  %v1689_v47 = vadd.f32 %v1681_v18, %v1622_v44 }
 0x1a3   : > { %v1618_v38 = vpop.f32.mrf.mxu0  ;;  %v1815_v35 = vpop.f32.mrf.mxu1 }
 0x1a4   : > { %v1624_v49 = vadd.f32 %v1618_v38, %v1557_v45  ;;  %v1690_v52 = vadd.f32 %v1683_v27, %v1623_v30 }
 0x1a5   : > { %v1746_v28 = vpop.f32.mrf.mxu0  ;;  %v1817_v43 = vpop.f32.mrf.mxu1 }
 0x1a6   : > { %v1755_v50 = vadd.f32 %v1746_v28, %v1688_v46  ;;  %v1691_v39 = vadd.f32 %v1685_v37, %v1624_v49 }
 0x1a7   : > { %v1748_v32 = vpop.f32.mrf.mxu0  ;;  %v1819_v57 = vpop.f32.mrf.mxu1 }
 0x1a8   : > { %v1756_v54 = vadd.f32 %v1748_v32, %v1689_v47  ;;  %v1822_v56 = vadd.f32 %v1813_v42, %v1755_v50 }
 0x1a9   : > { %v1750_v51 = vpop.f32.mrf.mxu0 }
 0x1aa   : > { %v1757_v58 = vadd.f32 %v1750_v51, %v1690_v52  ;;  %v1823_v60 = vadd.f32 %v1815_v35, %v1756_v54 }
 0x1ab   : > { %v1752_v55 = vpop.f32.mrf.mxu0 }
 0x1ac   : > { %v1758_v61 = vadd.f32 %v1752_v55, %v1691_v39  ;;  %v1824_v1 = vadd.f32 %v1817_v43, %v1757_v58 }
 0x1ad   : > { %v1880_v48 = vpop.f32.mrf.mxu0 }
 0x1ae   : > { %v1889_v63 = vadd.f32 %v1880_v48, %v1822_v56  ;;  %v1825_v7 = vadd.f32 %v1819_v57, %v1758_v61 }
 0x1af   : > { %v1882_v53 = vpop.f32.mrf.mxu0 }
 0x1b0   : > { %v1890_v2 = vadd.f32 %v1882_v53, %v1823_v60  ;;  %v1903_v3 = vadd.f32 %v1896_v59, %v1889_v63 }
 0x1b1   : > { %v1884_v6 = vpop.f32.mrf.mxu0 }
 0x1b2   : > { %v1904_v9 = vadd.f32 %v1896_v59, %v1890_v2  ;;  %v1907_v62 = vmax.f32 %v1903_v3, 0.0  ;;  %v1891_v4 = vadd.f32 %v1884_v6, %v1824_v1 }
 0x1b3   : > { %v1886_v10 = vpop.f32.mrf.mxu0 }
 0x1b4   : > { %v1908_v11 = vmax.f32 %v1904_v9, 0.0  ;;  %1911 = vst [vmem:[%s170_s24] sm:$0xff] %v1907_v62  ;;  %v1905_v12 = vadd.f32 %v1901_v5, %v1891_v4  ;;  %v1892_v8 = vadd.f32 %v1886_v10, %v1825_v7 }
 0x1b6   : > { %1913 = vst.msk [vmem:[%s170_s24 + $0x8] sm:$0xff] %vm1912_vm0, %v1908_v11  ;;  %v1909_v14 = vmax.f32 %v1905_v12, 0.0  ;;  %v1906_v0 = vadd.f32 %v1901_v5, %v1892_v8 }
 0x1b8   : > { %1914 = vst [vmem:[%s170_s24 + $0x10] sm:$0xff] %v1909_v14  ;;  %v1910_v15 = vmax.f32 %v1906_v0, 0.0 }
 0x1ba   : > { %1915 = vst.msk [vmem:[%s170_s24 + $0x18] sm:$0xff] %vm1912_vm0, %v1910_v15 }
 0x1bb PF: > { %s13_s12 = sadd.s32 1, %s2129_s12  }
 0x1bc   : > { %p10_p4 = scmp.ge.s32.totalorder %s13_s12, 4  }
 0x1be   :  { %12 = sbr.rel (!%p10_p4) target bundleno = 1 (0x1), region = 62 }

// kernel: net_forward.5
= control target key start
LH: loop header
LB: loop body
LE: loop exit
PB: predicated region body
PF: predicated region fallthrough
CT: control target
= control target key end

     0   :  { %v569_v1 = vmov 0.0   ;;  %vm87_vm0 = vcmask 130048   ;;  %vm570_vm1 = vmmov 0   ;;  %s933_s1 = inlined_call_operand.vmem [shape: f32[400,128], index: 1, kind: input, shape index: {}]   ;;  %s934_s0 = inlined_call_operand.vmem [shape: f32[8,400], index: 0, kind: input, shape index: {}]   ;;  %s935_s3 = inlined_call_operand.vmem [shape: f32[128,128], index: 3, kind: input, shape index: {}]   ;;  %s936_s5 = inlined_call_operand.vmem [shape: f32[128,128], index: 5, kind: input, shape index: {}]   ;;  %s937_s2 = inlined_call_operand.vmem [shape: f32[1,128], index: 2, kind: input, shape index: {}]   ;;  %s938_s4 = inlined_call_operand.vmem [shape: f32[1,128], index: 4, kind: input, shape index: {}]   ;;  %s939_s6 = inlined_call_operand.vmem [shape: f32[1,128], index: 6, kind: input, shape index: {}]   ;;  %s940_s7 = inlined_call_operand.vmem [shape: f32[8,128], index: 7, kind: output, shape index: {}]  }
   0x1   :  { %v61_v0 = vld [vmem:[%s933_s1 + $0xf8] sm:$0xff]  ;;  %161 = vmatprep.subr.mxu1 %v569_v1  ;;  %v60_v4 = vld [vmem:[%s933_s1 + $0xf0] sm:$0xff]  ;;  %v59_v7 = vld [vmem:[%s933_s1 + $0xe8] sm:$0xff] }
   0x2   :  { %v45_v2 = vld [vmem:[%s933_s1 + $0x78] sm:$0xff]  ;;  %428 = vmatprep.subr.mxu0 %v61_v0  ;;  %v44_v5 = vld [vmem:[%s933_s1 + $0x70] sm:$0xff]  ;;  %v75_v8 = vld [vmem:[%s933_s1 + $0x168] sm:$0xff] }
   0x3   :  { %v77_v3 = vld [vmem:[%s933_s1 + $0x178] sm:$0xff]  ;;  %v76_v6 = vld [vmem:[%s933_s1 + $0x170] sm:$0xff]  ;;  %429 = vmatpush3.msra.mxu0 %v45_v2  ;;  %v43_v9 = vld [vmem:[%s933_s1 + $0x68] sm:$0xff] }
   0x4   :  { %162 = vmatpush1.msra.mxu1 %v77_v3  ;;  %430 = vmatprep.subr.mxu0 %v60_v4  ;;  %v58_v10 = vld [vmem:[%s933_s1 + $0xe0] sm:$0xff]  ;;  %v57_v13 = vld [vmem:[%s933_s1 + $0xd8] sm:$0xff]  ;;  %v56_v16 = vld [vmem:[%s933_s1 + $0xd0] sm:$0xff] }
   0x5   :  { %163 = vmatprep.subr.mxu1 %v569_v1  ;;  %431 = vmatpush3.msra.mxu0 %v44_v5  ;;  %v74_v11 = vld [vmem:[%s933_s1 + $0x160] sm:$0xff]  ;;  %v73_v14 = vld [vmem:[%s933_s1 + $0x158] sm:$0xff]  ;;  %v72_v17 = vld [vmem:[%s933_s1 + $0x150] sm:$0xff] }
   0x6   :  { %164 = vmatpush1.msra.mxu1 %v76_v6  ;;  %432 = vmatprep.subr.mxu0 %v59_v7  ;;  %v42_v12 = vld [vmem:[%s933_s1 + $0x60] sm:$0xff]  ;;  %v41_v15 = vld [vmem:[%s933_s1 + $0x58] sm:$0xff]  ;;  %v40_v18 = vld [vmem:[%s933_s1 + $0x50] sm:$0xff] }
   0x7   :  { %165 = vmatprep.subr.mxu1 %v569_v1  ;;  %433 = vmatpush3.msra.mxu0 %v43_v9  ;;  %v55_v19 = vld [vmem:[%s933_s1 + $0xc8] sm:$0xff]  ;;  %v54_v22 = vld [vmem:[%s933_s1 + $0xc0] sm:$0xff]  ;;  %v53_v25 = vld [vmem:[%s933_s1 + $0xb8] sm:$0xff] }
   0x8   :  { %166 = vmatpush1.msra.mxu1 %v75_v8  ;;  %434 = vmatprep.subr.mxu0 %v58_v10  ;;  %v71_v20 = vld [vmem:[%s933_s1 + $0x148] sm:$0xff]  ;;  %v70_v23 = vld [vmem:[%s933_s1 + $0x140] sm:$0xff]  ;;  %v69_v26 = vld [vmem:[%s933_s1 + $0x138] sm:$0xff] }
   0x9   :  { %167 = vmatprep.subr.mxu1 %v569_v1  ;;  %435 = vmatpush3.msra.mxu0 %v42_v12  ;;  %v39_v21 = vld [vmem:[%s933_s1 + $0x48] sm:$0xff]  ;;  %v38_v24 = vld [vmem:[%s933_s1 + $0x40] sm:$0xff]  ;;  %v37_v27 = vld [vmem:[%s933_s1 + $0x38] sm:$0xff] }
   0xa   :  { %168 = vmatpush1.msra.mxu1 %v74_v11  ;;  %436 = vmatprep.subr.mxu0 %v57_v13  ;;  %v52_v28 = vld [vmem:[%s933_s1 + $0xb0] sm:$0xff]  ;;  %v51_v31 = vld [vmem:[%s933_s1 + $0xa8] sm:$0xff]  ;;  %v50_v34 = vld [vmem:[%s933_s1 + $0xa0] sm:$0xff] }
   0xb   :  { %169 = vmatprep.subr.mxu1 %v569_v1  ;;  %437 = vmatpush3.msra.mxu0 %v41_v15  ;;  %v68_v29 = vld [vmem:[%s933_s1 + $0x130] sm:$0xff]  ;;  %v67_v32 = vld [vmem:[%s933_s1 + $0x128] sm:$0xff]  ;;  %v66_v35 = vld [vmem:[%s933_s1 + $0x120] sm:$0xff] }
   0xc   :  { %170 = vmatpush1.msra.mxu1 %v73_v14  ;;  %438 = vmatprep.subr.mxu0 %v56_v16  ;;  %v36_v30 = vld [vmem:[%s933_s1 + $0x30] sm:$0xff]  ;;  %v35_v33 = vld [vmem:[%s933_s1 + $0x28] sm:$0xff]  ;;  %v34_v36 = vld [vmem:[%s933_s1 + $0x20] sm:$0xff] }
   0xd   :  { %171 = vmatprep.subr.mxu1 %v569_v1  ;;  %439 = vmatpush3.msra.mxu0 %v40_v18  ;;  %v49_v37 = vld [vmem:[%s933_s1 + $0x98] sm:$0xff]  ;;  %v48_v40 = vld [vmem:[%s933_s1 + $0x90] sm:$0xff]  ;;  %v47_v43 = vld [vmem:[%s933_s1 + $0x88] sm:$0xff] }
   0xe   :  { %172 = vmatpush1.msra.mxu1 %v72_v17  ;;  %440 = vmatprep.subr.mxu0 %v55_v19  ;;  %v65_v38 = vld [vmem:[%s933_s1 + $0x118] sm:$0xff]  ;;  %v64_v41 = vld [vmem:[%s933_s1 + $0x110] sm:$0xff]  ;;  %v63_v44 = vld [vmem:[%s933_s1 + $0x108] sm:$0xff] }
   0xf   :  { %173 = vmatprep.subr.mxu1 %v569_v1  ;;  %441 = vmatpush3.msra.mxu0 %v39_v21  ;;  %v33_v39 = vld [vmem:[%s933_s1 + $0x18] sm:$0xff]  ;;  %v32_v42 = vld [vmem:[%s933_s1 + $0x10] sm:$0xff]  ;;  %v31_v45 = vld [vmem:[%s933_s1 + $0x8] sm:$0xff] }
  0x10   :  { %174 = vmatpush1.msra.mxu1 %v71_v20  ;;  %442 = vmatprep.subr.mxu0 %v54_v22  ;;  %v46_v46 = vld [vmem:[%s933_s1 + $0x80] sm:$0xff]  ;;  %v27_v47 = vld [vmem:[%s934_s0 + $0x8] sm:$0xff]  ;;  %v29_v52 = vld [vmem:[%s934_s0 + $0x18] sm:$0xff] }
  0x11   :  { %175 = vmatprep.subr.mxu1 %v569_v1  ;;  %443 = vmatpush3.msra.mxu0 %v38_v24  ;;  %v30_v48 = vld [vmem:[%s933_s1] sm:$0xff]  ;;  %v79_v51 = vld [vmem:[%s933_s1 + $0x188] sm:$0xff]  ;;  %v247_v54 = vld [vmem:[%s935_s3 + $0x78] sm:$0xff] }
  0x12   :  { %176 = vmatpush1.msra.mxu1 %v70_v23  ;;  %444 = vmatprep.subr.mxu0 %v53_v25  ;;  %v62_v49 = vld [vmem:[%s933_s1 + $0x100] sm:$0xff]  ;;  %v28_v55 = vld [vmem:[%s934_s0 + $0x10] sm:$0xff]  ;;  %v245_v57 = vld [vmem:[%s935_s3 + $0x68] sm:$0xff] }
  0x13   :  { %177 = vmatprep.subr.mxu1 %v569_v1  ;;  %445 = vmatpush3.msra.mxu0 %v37_v27  ;;  %v26_v50 = vld [vmem:[%s934_s0] sm:$0xff]  ;;  %v246_v56 = vld [vmem:[%s935_s3 + $0x70] sm:$0xff]  ;;  %v243_v59 = vld [vmem:[%s935_s3 + $0x58] sm:$0xff] }
  0x14   :  { %178 = vmatpush1.msra.mxu1 %v69_v26  ;;  %446 = vmatprep.subr.mxu0 %v52_v28  ;;  %v78_v53 = vld [vmem:[%s933_s1 + $0x180] sm:$0xff]  ;;  %v242_v60 = vld [vmem:[%s935_s3 + $0x50] sm:$0xff]  ;;  %v241_v61 = vld [vmem:[%s935_s3 + $0x48] sm:$0xff] }
  0x15   :  { %179 = vmatprep.subr.mxu1 %v569_v1  ;;  %447 = vmatpush3.msra.mxu0 %v36_v30  ;;  %v244_v58 = vld [vmem:[%s935_s3 + $0x60] sm:$0xff]  ;;  %v239_v63 = vld [vmem:[%s935_s3 + $0x38] sm:$0xff]  ;;  %v238_v0 = vld [vmem:[%s935_s3 + $0x30] sm:$0xff] }
  0x16   :  { %180 = vmatpush1.msra.mxu1 %v68_v29  ;;  %448 = vmatprep.subr.mxu0 %v51_v31  ;;  %v240_v62 = vld [vmem:[%s935_s3 + $0x40] sm:$0xff]  ;;  %v237_v2 = vld [vmem:[%s935_s3 + $0x28] sm:$0xff]  ;;  %v235_v4 = vld [vmem:[%s935_s3 + $0x18] sm:$0xff] }
  0x17   :  { %181 = vmatprep.subr.mxu1 %v569_v1  ;;  %449 = vmatpush3.msra.mxu0 %v35_v33  ;;  %v236_v3 = vld [vmem:[%s935_s3 + $0x20] sm:$0xff]  ;;  %v234_v5 = vld [vmem:[%s935_s3 + $0x10] sm:$0xff]  ;;  %v233_v6 = vld [vmem:[%s935_s3 + $0x8] sm:$0xff] }
  0x18   :  { %182 = vmatpush1.msra.mxu1 %v67_v32  ;;  %450 = vmatprep.subr.mxu0 %v50_v34  ;;  %v232_v7 = vld [vmem:[%s935_s3] sm:$0xff]  ;;  %v341_v8 = vld [vmem:[%s936_s5 + $0x78] sm:$0xff]  ;;  %v340_v9 = vld [vmem:[%s936_s5 + $0x70] sm:$0xff] }
  0x19   :  { %183 = vmatprep.subr.mxu1 %v569_v1  ;;  %451 = vmatpush3.msra.mxu0 %v34_v36  ;;  %v339_v10 = vld [vmem:[%s936_s5 + $0x68] sm:$0xff]  ;;  %v338_v11 = vld [vmem:[%s936_s5 + $0x60] sm:$0xff]  ;;  %v337_v12 = vld [vmem:[%s936_s5 + $0x58] sm:$0xff] }
  0x1a   :  { %184 = vmatpush1.msra.mxu1 %v66_v35  ;;  %452 = vmatprep.subr.mxu0 %v49_v37  ;;  %v336_v13 = vld [vmem:[%s936_s5 + $0x50] sm:$0xff]  ;;  %v335_v14 = vld [vmem:[%s936_s5 + $0x48] sm:$0xff]  ;;  %v334_v15 = vld [vmem:[%s936_s5 + $0x40] sm:$0xff] }
  0x1b   :  { %185 = vmatprep.subr.mxu1 %v569_v1  ;;  %453 = vmatpush3.msra.mxu0 %v33_v39  ;;  %v333_v16 = vld [vmem:[%s936_s5 + $0x38] sm:$0xff]  ;;  %v332_v17 = vld [vmem:[%s936_s5 + $0x30] sm:$0xff]  ;;  %v331_v18 = vld [vmem:[%s936_s5 + $0x28] sm:$0xff] }
  0x1c   :  { %186 = vmatpush1.msra.mxu1 %v65_v38  ;;  %454 = vmatprep.subr.mxu0 %v48_v40  ;;  %v330_v19 = vld [vmem:[%s936_s5 + $0x20] sm:$0xff]  ;;  %v329_v20 = vld [vmem:[%s936_s5 + $0x18] sm:$0xff]  ;;  %v328_v30 = vld [vmem:[%s936_s5 + $0x10] sm:$0xff] }
  0x1d   :  { %187 = vmatprep.subr.mxu1 %v569_v1  ;;  %455 = vmatpush3.msra.mxu0 %v32_v42  ;;  %v424_v23 = vld [vmem:[%s937_s2] ss:$0 sm:$0xff]  ;;  %v327_v31 = vld [vmem:[%s936_s5 + $0x8] sm:$0xff] }
  0x1e   :  { %188 = vmatpush1.msra.mxu1 %v64_v41  ;;  %456 = vmatprep.subr.mxu0 %v47_v43  ;;  %v326_v32 = vld [vmem:[%s936_s5] sm:$0xff] }
  0x1f   :  { %189 = vmatprep.subr.mxu1 %v569_v1  ;;  %457 = vmatpush3.msra.mxu0 %v31_v45  ;;  %v426_v33 = vld [vmem:[%s938_s4] ss:$0 sm:$0xff] }
  0x20   :  { %190 = vmatpush1.msra.mxu1 %v63_v44  ;;  %458 = vmatprep.subr.mxu0 %v46_v46  ;;  %v427_v38 = vld [vmem:[%s939_s6] ss:$0 sm:$0xff] }
  0x21   :  { %191 = vmatprep.subr.mxu1 %v569_v1  ;;  %155 = vmatprep.mubr.f32.mxu0 %v27_v47 }
  0x22   :  { %459 = vmatpush3.msra.mxu0 %v30_v48  ;;  %192 = vmatpush1.msra.mxu1 %v62_v49 }
  0x23   :  { %156 = vmatmul.mubr.f32.vlgmr.msra.gmra.mxu0 %v26_v50  ;;  %221 = vmatprep.subr.mxu1 %v569_v1 }
  0x24   :  { %222 = vmatpush2.msra.mxu1 %v79_v51  ;;  %425 = vmatprep.mubr.msk.f32.mxu1 %vm87_vm0, %v29_v52 }
  0x25   :  { %223 = vmatprep.subr.mxu1 %v569_v1  ;;  %497 = vmatprep.subr.mxu0 %v569_v1 }
  0x26   :  { %224 = vmatpush2.msra.mxu1 %v78_v53  ;;  %498 = vmatpush3.msra.mxu0 %v247_v54 }
  0x27   :  { %226 = vmatmul.mubr.f32.vlgmr.msra.gmra.mxu1 %v28_v55  ;;  %499 = vmatprep.subr.mxu0 %v569_v1 }
  0x28   :  { %500 = vmatpush3.msra.mxu0 %v246_v56  ;;  %532 = vmatprep.subr.mxu1 %v569_v1 }
  0x29   :  { %501 = vmatprep.subr.mxu0 %v569_v1  ;;  %529 = vmatprep.mubr.msk.f32.mxu0 %vm570_vm1, %v569_v1 }
  0x2a   :  { %502 = vmatpush3.msra.mxu0 %v245_v57  ;;  %564 = vmatprep.mubr.msk.f32.mxu1 %vm570_vm1, %v569_v1 }
  0x2b   :  { %503 = vmatprep.subr.mxu0 %v569_v1  ;;  %533 = vmatpush3.msra.mxu1 %v341_v8 }
  0x2c   :  { %504 = vmatpush3.msra.mxu0 %v244_v58  ;;  %534 = vmatprep.subr.mxu1 %v569_v1 }
  0x2d   :  { %505 = vmatprep.subr.mxu0 %v569_v1  ;;  %535 = vmatpush3.msra.mxu1 %v340_v9 }
  0x2e   :  { %506 = vmatpush3.msra.mxu0 %v243_v59  ;;  %536 = vmatprep.subr.mxu1 %v569_v1 }
  0x2f   :  { %507 = vmatprep.subr.mxu0 %v569_v1  ;;  %537 = vmatpush3.msra.mxu1 %v339_v10 }
  0x30   :  { %508 = vmatpush3.msra.mxu0 %v242_v60  ;;  %538 = vmatprep.subr.mxu1 %v569_v1 }
  0x31   :  { %509 = vmatprep.subr.mxu0 %v569_v1  ;;  %539 = vmatpush3.msra.mxu1 %v338_v11 }
  0x32   :  { %510 = vmatpush3.msra.mxu0 %v241_v61  ;;  %540 = vmatprep.subr.mxu1 %v569_v1 }
  0x33   :  { %511 = vmatprep.subr.mxu0 %v569_v1  ;;  %541 = vmatpush3.msra.mxu1 %v337_v12 }
  0x34   :  { %512 = vmatpush3.msra.mxu0 %v240_v62  ;;  %542 = vmatprep.subr.mxu1 %v569_v1 }
  0x35   :  { %513 = vmatprep.subr.mxu0 %v569_v1  ;;  %543 = vmatpush3.msra.mxu1 %v336_v13 }
  0x36   :  { %514 = vmatpush3.msra.mxu0 %v239_v63  ;;  %544 = vmatprep.subr.mxu1 %v569_v1 }
  0x37   :  { %515 = vmatprep.subr.mxu0 %v569_v1  ;;  %545 = vmatpush3.msra.mxu1 %v335_v14 }
  0x38   :  { %516 = vmatpush3.msra.mxu0 %v238_v0  ;;  %546 = vmatprep.subr.mxu1 %v569_v1 }
  0x39   :  { %517 = vmatprep.subr.mxu0 %v569_v1  ;;  %547 = vmatpush3.msra.mxu1 %v334_v15 }
  0x3a   :  { %518 = vmatpush3.msra.mxu0 %v237_v2  ;;  %548 = vmatprep.subr.mxu1 %v569_v1 }
  0x3b   :  { %519 = vmatprep.subr.mxu0 %v569_v1  ;;  %549 = vmatpush3.msra.mxu1 %v333_v16 }
  0x3c   :  { %520 = vmatpush3.msra.mxu0 %v236_v3  ;;  %550 = vmatprep.subr.mxu1 %v569_v1 }
  0x3d   :  { %521 = vmatprep.subr.mxu0 %v569_v1  ;;  %551 = vmatpush3.msra.mxu1 %v332_v17 }
  0x3e   :  { %522 = vmatpush3.msra.mxu0 %v235_v4  ;;  %552 = vmatprep.subr.mxu1 %v569_v1 }
  0x3f   :  { %523 = vmatprep.subr.mxu0 %v569_v1  ;;  %553 = vmatpush3.msra.mxu1 %v331_v18 }
  0x40   :  { %524 = vmatpush3.msra.mxu0 %v234_v5  ;;  %554 = vmatprep.subr.mxu1 %v569_v1 }
  0x41   :  { %525 = vmatprep.subr.mxu0 %v569_v1  ;;  %555 = vmatpush3.msra.mxu1 %v330_v19 }
  0x42   :  { %526 = vmatpush3.msra.mxu0 %v233_v6  ;;  %556 = vmatprep.subr.mxu1 %v569_v1 }
  0x43   :  { %527 = vmatprep.subr.mxu0 %v569_v1  ;;  %557 = vmatpush3.msra.mxu1 %v329_v20 }
  0x44   :  { %528 = vmatpush3.msra.mxu0 %v232_v7  ;;  %558 = vmatprep.subr.mxu1 %v569_v1 }
  0x45   :  { %559 = vmatpush3.msra.mxu1 %v328_v30 }
  0x46   :  { %560 = vmatprep.subr.mxu1 %v569_v1 }
  0x47   :  { %561 = vmatpush3.msra.mxu1 %v327_v31 }
  0x48   :  { %562 = vmatprep.subr.mxu1 %v569_v1 }
  0x49   :  { %563 = vmatpush3.msra.mxu1 %v326_v32 }
  0xe3   :  { %v460_v21 = vpop.f32.mrf.mxu0 }
  0xe5   :  { %v461_v22 = vpop.f32.mrf.mxu0 }
  0xe6   :  { %v462_v24 = vadd.f32 %v461_v22, %v460_v21 }
  0xe7   :  { %v227_v25 = vpop.f32.mrf.mxu1 }
  0xe8   :  { %v158_v26 = vadd.f32 %v462_v24, %v424_v23 }
  0xe9   :  { %v229_v27 = vpop.f32.mrf.mxu1 }
  0xea   :  { %v228_v28 = vadd.f32 %v227_v25, %v158_v26 }
  0xec   :  { %v231_v29 = vmax.f32 %v228_v28, 0.0 }
  0xee   :  { %530 = vmatmul.mubr.f32.vlgmr.msra.gmra.mxu0 %v231_v29 }
 0x1ae   :  { %v321_v34 = vpop.f32.mrf.mxu0 }
 0x1af   :  { %v322_v35 = vadd.f32 %v426_v33, %v321_v34 }
 0x1b0   :  { %v531_v36 = vpop.f32.mrf.mxu0 }
 0x1b1   :  { %v325_v37 = vmax.f32 %v322_v35, 0.0 }
 0x1b3   :  { %565 = vmatmul.mubr.f32.vlgmr.msra.gmra.mxu1 %v325_v37 }
 0x273   :  { %v415_v39 = vpop.f32.mrf.mxu1 }
 0x274   :  { %v416_v1 = vadd.f32 %v427_v38, %v415_v39 }
 0x275   :  { %v566_v40 = vpop.f32.mrf.mxu1 }
 0x276   :  { %419 = vst [vmem:[%s940_s7] sm:$0xff] %v416_v1 }

</bundles_post_ra>
